<compile_context>
chip_gen: v5e
topology: v5e:2x2
jax: 0.10.0
libtpu: 0.0.40
codegen_flags: <defaults>
</compile_context>

<pallas_src>
import numpy as np

import jax
import jax.numpy as jnp
from jax.experimental import pallas as pl
from jax.experimental.pallas import tpu as pltpu

_VMEM = pl.BlockSpec(memory_space=pltpu.MemorySpace.VMEM)
_BN_EPS = 1e-5
_VMEM_LIMIT = 32 * 1024 * 1024  # well under v7x's 64 MiB physical VMEM

IN_CHANS = 3
NUM_CLASSES = 10
STEM_C = 16          # stem out list [8, 16]   -> largest = 16
S0_C = 24            # stage0 out list [16,24] -> largest = 24
S1_C = 32            # stage1 out list [24,32] -> largest = 32
HEAD_C = 64          # head features [64]
SE_RATIO = 0.25
EXP_RATIO = 6

# Per-block / head ref ordering inside the fused kernel.
_BLK_KEYS = ("exp_w", "exp_s", "exp_b", "dw_t", "dw_w", "dw_b",
             "se_rw", "se_rb", "se_ew", "se_eb", "pw_w", "pw_s", "pw_b")
_HEAD_KEYS = ("head_w", "head_s", "head_b", "cls_w", "cls_b")


# ----------------------------------------------------------------------------
# Host-side constant matrices (built at trace time with numpy).
# ----------------------------------------------------------------------------
def _dw_sample_matrix(n, h, w, stride):
    """(9*m_out, m_in) 0/1 matrix: tap k rows select input row (s*oh+kh-1, s*ow+kw-1)
    of the same image (zero row where the 3x3 tap falls in the zero padding)."""
    ho = (h - 1) // stride + 1
    wo = (w - 1) // stride + 1
    m_in, m_out = n * h * w, n * ho * wo
    t = np.zeros((9, m_out, m_in), np.float32)
    for img in range(n):
        for oh in range(ho):
            for ow in range(wo):
                r = img * ho * wo + oh * wo + ow
                for kh in range(3):
                    for kw in range(3):
                        ih = stride * oh + kh - 1
                        iw = stride * ow + kw - 1
                        if 0 <= ih < h and 0 <= iw < w:
                            t[kh * 3 + kw, r, img * h * w + ih * w + iw] = 1.0
    return jnp.asarray(t.reshape(9 * m_out, m_in), jnp.bfloat16)


def _pool_matrix(n, hw):
    """(n, n*hw): per-image global-average-pool as a matmul (1/hw is a power of 2)."""
    p = np.zeros((n, n * hw), np.float32)
    for i in range(n):
        p[i, i * hw:(i + 1) * hw] = 1.0 / hw
    return jnp.asarray(p, jnp.bfloat16)


def _bcast_matrix(n, hw):
    """(n*hw, n): one-hot image membership, broadcasts the (n, C) SE gate to rows."""
    g = np.zeros((n * hw, n), np.float32)
    for i in range(n):
        g[i * hw:(i + 1) * hw, i] = 1.0
    return jnp.asarray(g, jnp.bfloat16)


# ----------------------------------------------------------------------------
# Fused whole-network kernel.
# ----------------------------------------------------------------------------
def _make_dsnet_kernel(*, n, hw1, hw2):
    f32, bf16 = jnp.float32, jnp.bfloat16
    nblk = len(_BLK_KEYS)

    def mbconv(x2d, refs, pool, bcast, *, m_out, has_residual):
        (exp_w, exp_s, exp_b, dw_t, dw_w, dw_b,
         se_rw, se_rb, se_ew, se_eb, pw_w, pw_s, pw_b) = [r[...] for r in refs]

        # 1) expand (or stem) conv as one MXU matmul + folded BN + ReLU.
        ex = jnp.dot(x2d.astype(bf16), exp_w, preferred_element_type=f32)
        ex = jnp.maximum(ex * exp_s + exp_b, 0.0)                # (m_in, cmid) f32

        # 2) depthwise 3x3 (+ zero pad + stride) as one constant shift/sample
        #    matmul producing all 9 taps, then 9 full-width VPU mul-adds over
        #    8-aligned row slices (dw BN scale pre-folded into dw_w).
        taps = jnp.dot(dw_t, ex.astype(bf16), preferred_element_type=f32)  # (9*m_out, cmid)
        acc = taps[0:m_out, :] * dw_w[0:1, :]
        for k in range(1, 9):
            acc = acc + taps[k * m_out:(k + 1) * m_out, :] * dw_w[k:k + 1, :]
        dw = jnp.maximum(acc + dw_b, 0.0)                        # (m_out, cmid)

        # 3) squeeze-and-excite: pool and gate-broadcast are tiny matmuls
        #    (no per-image concatenate, no reshapes).
        pooled = jnp.dot(pool, dw.astype(bf16), preferred_element_type=f32)      # (n, cmid)
        hid = jnp.maximum(
            jnp.dot(pooled.astype(bf16), se_rw, preferred_element_type=f32) + se_rb, 0.0)
        gate = jax.nn.sigmoid(
            jnp.dot(hid.astype(bf16), se_ew, preferred_element_type=f32) + se_eb)  # (n, cmid)
        gate_rows = jnp.dot(bcast, gate.astype(bf16), preferred_element_type=f32)  # (m_out, cmid)
        gated = dw * gate_rows

        # 4) project conv + folded BN (+ residual).
        y = jnp.dot(gated.astype(bf16), pw_w, preferred_element_type=f32)
        y = y * pw_s + pw_b
        if has_residual:
            y = y + x2d
        return y

    def head(x2d, refs, pool):
        head_w, head_s, head_b, cls_w, cls_b = [r[...] for r in refs]
        y = jnp.dot(x2d.astype(bf16), head_w, preferred_element_type=f32)
        y = jnp.maximum(y * head_s + head_b, 0.0)                # (m, HEAD_C)
        pooled = jnp.dot(pool, y.astype(bf16), preferred_element_type=f32)        # (n, HEAD_C)
        return jnp.dot(pooled.astype(bf16), cls_w, preferred_element_type=f32) + cls_b

    def kernel(*refs):
        cols_ref = refs[0]
        p0_ref, g0_ref, p1_ref, g1_ref = refs[1:5]
        blk_refs = [refs[5 + i * nblk: 5 + (i + 1) * nblk] for i in range(3)]
        head_refs = refs[5 + 3 * nblk: 5 + 3 * nblk + len(_HEAD_KEYS)]
        o_ref = refs[-1]

        pool0, bcast0 = p0_ref[...], g0_ref[...]
        pool1, bcast1 = p1_ref[...], g1_ref[...]

        x = cols_ref[...]                                        # (n*hw1, 27)
        # block 0: conv_stem + bn1 + relu fused with stage0 DepthwiseSeparable.
        x = mbconv(x, blk_refs[0], pool0, bcast0, m_out=n * hw1, has_residual=False)
        # block 1: stage1 InvertedResidual, stride 2 (sample matrix decimates).
        x = mbconv(x, blk_refs[1], pool1, bcast1, m_out=n * hw2, has_residual=False)
        # block 2: stage1 InvertedResidual, stride 1, residual.
        x = mbconv(x, blk_refs[2], pool1, bcast1, m_out=n * hw2, has_residual=True)
        # head: conv_head + bn2 + relu + global avg pool + classifier.
        o_ref[...] = head(x, head_refs, pool1)

    return kernel


# ----------------------------------------------------------------------------
# Glue: stem im2col on the 3-channel network input (tiny: (N*64, 27) f32)
# ----------------------------------------------------------------------------
def _stem_im2col(x_nhwc, k=3, stride=2, pad=1):
    n, h, w, c = x_nhwc.shape
    ho = (h + 2 * pad - k) // stride + 1
    wo = (w + 2 * pad - k) // stride + 1
    xp = jnp.pad(x_nhwc, ((0, 0), (pad, pad), (pad, pad), (0, 0)))
    cols = []
    for kh in range(k):
        for kw in range(k):
            cols.append(xp[:, kh:kh + stride * ho:stride, kw:kw + stride * wo:stride, :])
    cols = jnp.stack(cols, axis=3).reshape(n * ho * wo, k * k * c)
    return cols, ho, wo


# ----------------------------------------------------------------------------
# Parameter construction (synthetic 'largest' config) and kernel-friendly
# re-layout (BN folded, matmul weights transposed + bf16, dw weights (9, C) f32
# with BN scale folded in).
# ----------------------------------------------------------------------------
def make_params(key):
    keys = iter(jax.random.split(key, 128))

    def conv_w(cout, cin, k):
        return 0.1 * jax.random.normal(next(keys), (cout, cin, k, k), jnp.float32)

    def bn(c):
        return (1.0 + 0.1 * jax.random.normal(next(keys), (c,), jnp.float32),   # gamma
                0.1 * jax.random.normal(next(keys), (c,), jnp.float32),          # beta
                0.1 * jax.random.normal(next(keys), (c,), jnp.float32),          # running_mean
                1.0 + 0.1 * jax.random.uniform(next(keys), (c,), jnp.float32))   # running_var

    def se(c):
        # TODO(synk): dyn_slim's MultiHeadGate may use make_divisible for the
        # reduced channel count; here reduced = int(C * se_ratio).
        cred = max(1, int(c * SE_RATIO))
        return dict(se_rw=conv_w(cred, c, 1),
                    se_rb=0.1 * jax.random.normal(next(keys), (cred,), jnp.float32),
                    se_ew=conv_w(c, cred, 1),
                    se_eb=0.1 * jax.random.normal(next(keys), (c,), jnp.float32))

    p = {}
    p["stem_w"] = conv_w(STEM_C, IN_CHANS, 3)
    p["bn1"] = bn(STEM_C)

    # stage 0, first block: DepthwiseSeparable (exp_ratio = 1)
    blk = dict(dw_w=conv_w(STEM_C, 1, 3), dw_bn=bn(STEM_C),
               pw_w=conv_w(S0_C, STEM_C, 1), pw_bn=bn(S0_C))
    blk.update(se(STEM_C))
    p["s0b0"] = blk

    # stage 1, block 0: InvertedResidual (stride 2, no residual)
    mid0 = S0_C * EXP_RATIO
    blk = dict(exp_w=conv_w(mid0, S0_C, 1), exp_bn=bn(mid0),
               dw_w=conv_w(mid0, 1, 3), dw_bn=bn(mid0),
               pw_w=conv_w(S1_C, mid0, 1), pw_bn=bn(S1_C))
    blk.update(se(mid0))
    p["s1b0"] = blk

    # stage 1, block 1: InvertedResidual (stride 1, residual)
    mid1 = S1_C * EXP_RATIO
    blk = dict(exp_w=conv_w(mid1, S1_C, 1), exp_bn=bn(mid1),
               dw_w=conv_w(mid1, 1, 3), dw_bn=bn(mid1),
               pw_w=conv_w(S1_C, mid1, 1), pw_bn=bn(S1_C))
    blk.update(se(mid1))
    p["s1b1"] = blk

    p["head_w"] = conv_w(HEAD_C, S1_C, 1)
    p["bn2"] = bn(HEAD_C)
    p["cls_w"] = 0.1 * jax.random.normal(next(keys), (NUM_CLASSES, HEAD_C), jnp.float32)
    p["cls_b"] = 0.01 * jax.random.normal(next(keys), (NUM_CLASSES,), jnp.float32)
    return p


def _fold_bn(bn):
    gamma, beta, mean, var = bn
    scale = gamma / jnp.sqrt(var + _BN_EPS)
    return (scale.reshape(1, -1).astype(jnp.float32),
            (beta - mean * scale).reshape(1, -1).astype(jnp.float32))


def _pw_w(w):        # (Cout, Cin, 1, 1) -> (Cin, Cout), bf16 for the MXU
    cout, cin = w.shape[0], w.shape[1]
    return jnp.transpose(w.reshape(cout, cin)).astype(jnp.bfloat16)


def _dw_w(w):        # (C, 1, 3, 3) -> (9, C), f32 (VPU path stays f32)
    c = w.shape[0]
    return jnp.transpose(w.reshape(c, 9)).astype(jnp.float32)


def _vec(v):
    return v.reshape(1, -1).astype(jnp.float32)


def prepare_params(p):
    """Fold eval-mode BN and re-layout weights into kernel-friendly form."""
    kp = {}

    def se_part(blk):
        return dict(se_rw=_pw_w(blk["se_rw"]), se_rb=_vec(blk["se_rb"]),
                    se_ew=_pw_w(blk["se_ew"]), se_eb=_vec(blk["se_eb"]))

    # Block 0 = conv_stem + bn1 + act1 fused with the stage-0 DepthwiseSeparable
    # (exp_ratio=1, so the stem matmul plays the "expand" role in the fused block).
    stem_w = jnp.transpose(p["stem_w"], (2, 3, 1, 0)).reshape(-1, p["stem_w"].shape[0])
    es, eb = _fold_bn(p["bn1"])
    blk = p["s0b0"]
    dws, dwb = _fold_bn(blk["dw_bn"])
    pws, pwb = _fold_bn(blk["pw_bn"])
    kp["blk0"] = dict(exp_w=stem_w.astype(jnp.bfloat16), exp_s=es, exp_b=eb,
                      dw_w=_dw_w(blk["dw_w"]) * dws, dw_b=dwb,
                      pw_w=_pw_w(blk["pw_w"]), pw_s=pws, pw_b=pwb, **se_part(blk))

    for src, dst in (("s1b0", "blk1"), ("s1b1", "blk2")):
        blk = p[src]
        es, eb = _fold_bn(blk["exp_bn"])
        dws, dwb = _fold_bn(blk["dw_bn"])
        pws, pwb = _fold_bn(blk["pw_bn"])
        kp[dst] = dict(exp_w=_pw_w(blk["exp_w"]), exp_s=es, exp_b=eb,
                       dw_w=_dw_w(blk["dw_w"]) * dws, dw_b=dwb,
                       pw_w=_pw_w(blk["pw_w"]), pw_s=pws, pw_b=pwb, **se_part(blk))

    hs, hb = _fold_bn(p["bn2"])
    kp["head"] = dict(head_w=_pw_w(p["head_w"]), head_s=hs, head_b=hb,
                      cls_w=jnp.transpose(p["cls_w"]).astype(jnp.bfloat16),
                      cls_b=_vec(p["cls_b"]))
    return kp


# ----------------------------------------------------------------------------
# DSNet forward ('largest' mode): ONE fused pallas_call.
# ----------------------------------------------------------------------------
def dsnet_forward(x_nchw, p):
    kp = prepare_params(p)
    x = jnp.transpose(x_nchw, (0, 2, 3, 1)).astype(jnp.float32)        # NCHW -> NHWC
    n = x.shape[0]

    # tiny host-side im2col of the 3-channel input feeds the single fused kernel
    cols, h1, w1 = _stem_im2col(x)                                     # (n*8*8, 27)
    h2, w2 = (h1 - 1) // 2 + 1, (w1 - 1) // 2 + 1

    # constant shift/sample + pool + gate-broadcast matrices (trace-time numpy)
    kp["blk0"]["dw_t"] = _dw_sample_matrix(n, h1, w1, 1)
    kp["blk1"]["dw_t"] = _dw_sample_matrix(n, h1, w1, 2)
    kp["blk2"]["dw_t"] = _dw_sample_matrix(n, h2, w2, 1)
    pool0, bcast0 = _pool_matrix(n, h1 * w1), _bcast_matrix(n, h1 * w1)
    pool1, bcast1 = _pool_matrix(n, h2 * w2), _bcast_matrix(n, h2 * w2)

    args = [cols, pool0, bcast0, pool1, bcast1]
    for name in ("blk0", "blk1", "blk2"):
        args += [kp[name][k] for k in _BLK_KEYS]
    args += [kp["head"][k] for k in _HEAD_KEYS]

    kernel = _make_dsnet_kernel(n=n, hw1=h1 * w1, hw2=h2 * w2)
    return pl.pallas_call(
        kernel,
        out_shape=jax.ShapeDtypeStruct((n, NUM_CLASSES), jnp.float32),
        in_specs=[_VMEM] * len(args),
        out_specs=_VMEM,
        compiler_params=pltpu.CompilerParams(vmem_limit_bytes=_VMEM_LIMIT),
    )(*args)


if __name__ == "__main__":
    key = jax.random.PRNGKey(0)
    k_x, k_p = jax.random.split(key)
    x = jax.random.normal(k_x, (2, IN_CHANS, 16, 16), jnp.float32)     # NCHW input
    params = make_params(k_p)

    fwd = jax.jit(dsnet_forward)
    out = jax.block_until_ready(fwd(x, params))
    assert out.shape == (2, NUM_CLASSES)
    assert bool(jnp.all(jnp.isfinite(out)))
    print("KERNEL_OK")
</pallas_src>

<mosaic_0001>
module attributes {stable_mosaic.version = 11 : i64} {
  func.func @kernel(%arg0: memref<128x27xf32, #tpu.memory_space<vmem>>, %arg1: memref<2x128xbf16, #tpu.memory_space<vmem>>, %arg2: memref<128x2xbf16, #tpu.memory_space<vmem>>, %arg3: memref<2x32xbf16, #tpu.memory_space<vmem>>, %arg4: memref<32x2xbf16, #tpu.memory_space<vmem>>, %arg5: memref<27x16xbf16, #tpu.memory_space<vmem>>, %arg6: memref<1x16xf32, #tpu.memory_space<vmem>>, %arg7: memref<1x16xf32, #tpu.memory_space<vmem>>, %arg8: memref<1152x128xbf16, #tpu.memory_space<vmem>>, %arg9: memref<9x16xf32, #tpu.memory_space<vmem>>, %arg10: memref<1x16xf32, #tpu.memory_space<vmem>>, %arg11: memref<16x4xbf16, #tpu.memory_space<vmem>>, %arg12: memref<1x4xf32, #tpu.memory_space<vmem>>, %arg13: memref<4x16xbf16, #tpu.memory_space<vmem>>, %arg14: memref<1x16xf32, #tpu.memory_space<vmem>>, %arg15: memref<16x24xbf16, #tpu.memory_space<vmem>>, %arg16: memref<1x24xf32, #tpu.memory_space<vmem>>, %arg17: memref<1x24xf32, #tpu.memory_space<vmem>>, %arg18: memref<24x144xbf16, #tpu.memory_space<vmem>>, %arg19: memref<1x144xf32, #tpu.memory_space<vmem>>, %arg20: memref<1x144xf32, #tpu.memory_space<vmem>>, %arg21: memref<288x128xbf16, #tpu.memory_space<vmem>>, %arg22: memref<9x144xf32, #tpu.memory_space<vmem>>, %arg23: memref<1x144xf32, #tpu.memory_space<vmem>>, %arg24: memref<144x36xbf16, #tpu.memory_space<vmem>>, %arg25: memref<1x36xf32, #tpu.memory_space<vmem>>, %arg26: memref<36x144xbf16, #tpu.memory_space<vmem>>, %arg27: memref<1x144xf32, #tpu.memory_space<vmem>>, %arg28: memref<144x32xbf16, #tpu.memory_space<vmem>>, %arg29: memref<1x32xf32, #tpu.memory_space<vmem>>, %arg30: memref<1x32xf32, #tpu.memory_space<vmem>>, %arg31: memref<32x192xbf16, #tpu.memory_space<vmem>>, %arg32: memref<1x192xf32, #tpu.memory_space<vmem>>, %arg33: memref<1x192xf32, #tpu.memory_space<vmem>>, %arg34: memref<288x32xbf16, #tpu.memory_space<vmem>>, %arg35: memref<9x192xf32, #tpu.memory_space<vmem>>, %arg36: memref<1x192xf32, #tpu.memory_space<vmem>>, %arg37: memref<192x48xbf16, #tpu.memory_space<vmem>>, %arg38: memref<1x48xf32, #tpu.memory_space<vmem>>, %arg39: memref<48x192xbf16, #tpu.memory_space<vmem>>, %arg40: memref<1x192xf32, #tpu.memory_space<vmem>>, %arg41: memref<192x32xbf16, #tpu.memory_space<vmem>>, %arg42: memref<1x32xf32, #tpu.memory_space<vmem>>, %arg43: memref<1x32xf32, #tpu.memory_space<vmem>>, %arg44: memref<32x64xbf16, #tpu.memory_space<vmem>>, %arg45: memref<1x64xf32, #tpu.memory_space<vmem>>, %arg46: memref<1x64xf32, #tpu.memory_space<vmem>>, %arg47: memref<64x10xbf16, #tpu.memory_space<vmem>>, %arg48: memref<1x10xf32, #tpu.memory_space<vmem>>, %arg49: memref<2x10xf32, #tpu.memory_space<vmem>>) attributes {dimension_semantics = [], scalar_prefetch = 0 : i64, scratch_operands = 0 : i64, tpu.core_type = #tpu.core_type<tc>} {
    %c0 = arith.constant 0 : index
    %c0_0 = arith.constant 0 : index
    %0 = vector.load %arg1[%c0, %c0_0] : memref<2x128xbf16, #tpu.memory_space<vmem>>, vector<2x128xbf16>
    %c0_1 = arith.constant 0 : index
    %c0_2 = arith.constant 0 : index
    %1 = vector.load %arg2[%c0_1, %c0_2] : memref<128x2xbf16, #tpu.memory_space<vmem>>, vector<128x2xbf16>
    %c0_3 = arith.constant 0 : index
    %c0_4 = arith.constant 0 : index
    %2 = vector.load %arg3[%c0_3, %c0_4] : memref<2x32xbf16, #tpu.memory_space<vmem>>, vector<2x32xbf16>
    %c0_5 = arith.constant 0 : index
    %c0_6 = arith.constant 0 : index
    %3 = vector.load %arg4[%c0_5, %c0_6] : memref<32x2xbf16, #tpu.memory_space<vmem>>, vector<32x2xbf16>
    %c0_7 = arith.constant 0 : index
    %c0_8 = arith.constant 0 : index
    %4 = vector.load %arg0[%c0_7, %c0_8] : memref<128x27xf32, #tpu.memory_space<vmem>>, vector<128x27xf32>
    %c0_9 = arith.constant 0 : index
    %c0_10 = arith.constant 0 : index
    %5 = vector.load %arg5[%c0_9, %c0_10] : memref<27x16xbf16, #tpu.memory_space<vmem>>, vector<27x16xbf16>
    %c0_11 = arith.constant 0 : index
    %c0_12 = arith.constant 0 : index
    %6 = vector.load %arg6[%c0_11, %c0_12] : memref<1x16xf32, #tpu.memory_space<vmem>>, vector<1x16xf32>
    %c0_13 = arith.constant 0 : index
    %c0_14 = arith.constant 0 : index
    %7 = vector.load %arg7[%c0_13, %c0_14] : memref<1x16xf32, #tpu.memory_space<vmem>>, vector<1x16xf32>
    %c0_15 = arith.constant 0 : index
    %c0_16 = arith.constant 0 : index
    %8 = vector.load %arg8[%c0_15, %c0_16] : memref<1152x128xbf16, #tpu.memory_space<vmem>>, vector<1152x128xbf16>
    %c0_17 = arith.constant 0 : index
    %c0_18 = arith.constant 0 : index
    %9 = vector.load %arg9[%c0_17, %c0_18] : memref<9x16xf32, #tpu.memory_space<vmem>>, vector<9x16xf32>
    %c0_19 = arith.constant 0 : index
    %c0_20 = arith.constant 0 : index
    %10 = vector.load %arg10[%c0_19, %c0_20] : memref<1x16xf32, #tpu.memory_space<vmem>>, vector<1x16xf32>
    %c0_21 = arith.constant 0 : index
    %c0_22 = arith.constant 0 : index
    %11 = vector.load %arg11[%c0_21, %c0_22] : memref<16x4xbf16, #tpu.memory_space<vmem>>, vector<16x4xbf16>
    %c0_23 = arith.constant 0 : index
    %c0_24 = arith.constant 0 : index
    %12 = vector.load %arg12[%c0_23, %c0_24] : memref<1x4xf32, #tpu.memory_space<vmem>>, vector<1x4xf32>
    %c0_25 = arith.constant 0 : index
    %c0_26 = arith.constant 0 : index
    %13 = vector.load %arg13[%c0_25, %c0_26] : memref<4x16xbf16, #tpu.memory_space<vmem>>, vector<4x16xbf16>
    %c0_27 = arith.constant 0 : index
    %c0_28 = arith.constant 0 : index
    %14 = vector.load %arg14[%c0_27, %c0_28] : memref<1x16xf32, #tpu.memory_space<vmem>>, vector<1x16xf32>
    %c0_29 = arith.constant 0 : index
    %c0_30 = arith.constant 0 : index
    %15 = vector.load %arg15[%c0_29, %c0_30] : memref<16x24xbf16, #tpu.memory_space<vmem>>, vector<16x24xbf16>
    %c0_31 = arith.constant 0 : index
    %c0_32 = arith.constant 0 : index
    %16 = vector.load %arg16[%c0_31, %c0_32] : memref<1x24xf32, #tpu.memory_space<vmem>>, vector<1x24xf32>
    %c0_33 = arith.constant 0 : index
    %c0_34 = arith.constant 0 : index
    %17 = vector.load %arg17[%c0_33, %c0_34] : memref<1x24xf32, #tpu.memory_space<vmem>>, vector<1x24xf32>
    %18 = arith.truncf %4 : vector<128x27xf32> to vector<128x27xbf16>
    %cst = arith.constant dense<0.000000e+00> : vector<128x16xf32>
    %19 = tpu.matmul %18, %5, %cst {dimension_numbers = #tpu.dot_dimension_numbers<[1], [0], [0], [1], [0, 0, 1, 1], [], []>} : vector<128x27xbf16>, vector<27x16xbf16>, vector<128x16xf32> -> vector<128x16xf32>
    %20 = vector.broadcast %6 : vector<1x16xf32> to vector<128x16xf32>
    %21 = arith.mulf %19, %20 : vector<128x16xf32>
    %22 = vector.broadcast %7 : vector<1x16xf32> to vector<128x16xf32>
    %23 = arith.addf %21, %22 : vector<128x16xf32>
    %cst_35 = arith.constant 0.000000e+00 : f32
    %24 = vector.broadcast %cst_35 : f32 to vector<128x16xf32>
    %25 = arith.maximumf %23, %24 : vector<128x16xf32>
    %26 = arith.truncf %25 : vector<128x16xf32> to vector<128x16xbf16>
    %cst_36 = arith.constant dense<0.000000e+00> : vector<1152x16xf32>
    %27 = tpu.matmul %8, %26, %cst_36 {dimension_numbers = #tpu.dot_dimension_numbers<[1], [0], [0], [1], [0, 0, 1, 1], [], []>} : vector<1152x128xbf16>, vector<128x16xbf16>, vector<1152x16xf32> -> vector<1152x16xf32>
    %28 = vector.extract_strided_slice %27 {offsets = [0, 0], sizes = [128, 16], strides = [1, 1]} : vector<1152x16xf32> to vector<128x16xf32>
    %29 = vector.extract_strided_slice %9 {offsets = [0, 0], sizes = [1, 16], strides = [1, 1]} : vector<9x16xf32> to vector<1x16xf32>
    %30 = vector.broadcast %29 : vector<1x16xf32> to vector<128x16xf32>
    %31 = arith.mulf %28, %30 : vector<128x16xf32>
    %32 = vector.extract_strided_slice %27 {offsets = [128, 0], sizes = [128, 16], strides = [1, 1]} : vector<1152x16xf32> to vector<128x16xf32>
    %33 = vector.extract_strided_slice %9 {offsets = [1, 0], sizes = [1, 16], strides = [1, 1]} : vector<9x16xf32> to vector<1x16xf32>
    %34 = vector.broadcast %33 : vector<1x16xf32> to vector<128x16xf32>
    %35 = arith.mulf %32, %34 : vector<128x16xf32>
    %36 = arith.addf %31, %35 : vector<128x16xf32>
    %37 = vector.extract_strided_slice %27 {offsets = [256, 0], sizes = [128, 16], strides = [1, 1]} : vector<1152x16xf32> to vector<128x16xf32>
    %38 = vector.extract_strided_slice %9 {offsets = [2, 0], sizes = [1, 16], strides = [1, 1]} : vector<9x16xf32> to vector<1x16xf32>
    %39 = vector.broadcast %38 : vector<1x16xf32> to vector<128x16xf32>
    %40 = arith.mulf %37, %39 : vector<128x16xf32>
    %41 = arith.addf %36, %40 : vector<128x16xf32>
    %42 = vector.extract_strided_slice %27 {offsets = [384, 0], sizes = [128, 16], strides = [1, 1]} : vector<1152x16xf32> to vector<128x16xf32>
    %43 = vector.extract_strided_slice %9 {offsets = [3, 0], sizes = [1, 16], strides = [1, 1]} : vector<9x16xf32> to vector<1x16xf32>
    %44 = vector.broadcast %43 : vector<1x16xf32> to vector<128x16xf32>
    %45 = arith.mulf %42, %44 : vector<128x16xf32>
    %46 = arith.addf %41, %45 : vector<128x16xf32>
    %47 = vector.extract_strided_slice %27 {offsets = [512, 0], sizes = [128, 16], strides = [1, 1]} : vector<1152x16xf32> to vector<128x16xf32>
    %48 = vector.extract_strided_slice %9 {offsets = [4, 0], sizes = [1, 16], strides = [1, 1]} : vector<9x16xf32> to vector<1x16xf32>
    %49 = vector.broadcast %48 : vector<1x16xf32> to vector<128x16xf32>
    %50 = arith.mulf %47, %49 : vector<128x16xf32>
    %51 = arith.addf %46, %50 : vector<128x16xf32>
    %52 = vector.extract_strided_slice %27 {offsets = [640, 0], sizes = [128, 16], strides = [1, 1]} : vector<1152x16xf32> to vector<128x16xf32>
    %53 = vector.extract_strided_slice %9 {offsets = [5, 0], sizes = [1, 16], strides = [1, 1]} : vector<9x16xf32> to vector<1x16xf32>
    %54 = vector.broadcast %53 : vector<1x16xf32> to vector<128x16xf32>
    %55 = arith.mulf %52, %54 : vector<128x16xf32>
    %56 = arith.addf %51, %55 : vector<128x16xf32>
    %57 = vector.extract_strided_slice %27 {offsets = [768, 0], sizes = [128, 16], strides = [1, 1]} : vector<1152x16xf32> to vector<128x16xf32>
    %58 = vector.extract_strided_slice %9 {offsets = [6, 0], sizes = [1, 16], strides = [1, 1]} : vector<9x16xf32> to vector<1x16xf32>
    %59 = vector.broadcast %58 : vector<1x16xf32> to vector<128x16xf32>
    %60 = arith.mulf %57, %59 : vector<128x16xf32>
    %61 = arith.addf %56, %60 : vector<128x16xf32>
    %62 = vector.extract_strided_slice %27 {offsets = [896, 0], sizes = [128, 16], strides = [1, 1]} : vector<1152x16xf32> to vector<128x16xf32>
    %63 = vector.extract_strided_slice %9 {offsets = [7, 0], sizes = [1, 16], strides = [1, 1]} : vector<9x16xf32> to vector<1x16xf32>
    %64 = vector.broadcast %63 : vector<1x16xf32> to vector<128x16xf32>
    %65 = arith.mulf %62, %64 : vector<128x16xf32>
    %66 = arith.addf %61, %65 : vector<128x16xf32>
    %67 = vector.extract_strided_slice %27 {offsets = [1024, 0], sizes = [128, 16], strides = [1, 1]} : vector<1152x16xf32> to vector<128x16xf32>
    %68 = vector.extract_strided_slice %9 {offsets = [8, 0], sizes = [1, 16], strides = [1, 1]} : vector<9x16xf32> to vector<1x16xf32>
    %69 = vector.broadcast %68 : vector<1x16xf32> to vector<128x16xf32>
    %70 = arith.mulf %67, %69 : vector<128x16xf32>
    %71 = arith.addf %66, %70 : vector<128x16xf32>
    %72 = vector.broadcast %10 : vector<1x16xf32> to vector<128x16xf32>
    %73 = arith.addf %71, %72 : vector<128x16xf32>
    %cst_37 = arith.constant 0.000000e+00 : f32
    %74 = vector.broadcast %cst_37 : f32 to vector<128x16xf32>
    %75 = arith.maximumf %73, %74 : vector<128x16xf32>
    %76 = arith.truncf %75 : vector<128x16xf32> to vector<128x16xbf16>
    %cst_38 = arith.constant dense<0.000000e+00> : vector<2x16xf32>
    %77 = tpu.matmul %0, %76, %cst_38 {dimension_numbers = #tpu.dot_dimension_numbers<[1], [0], [0], [1], [0, 0, 1, 1], [], []>} : vector<2x128xbf16>, vector<128x16xbf16>, vector<2x16xf32> -> vector<2x16xf32>
    %78 = arith.truncf %77 : vector<2x16xf32> to vector<2x16xbf16>
    %cst_39 = arith.constant dense<0.000000e+00> : vector<2x4xf32>
    %79 = tpu.matmul %78, %11, %cst_39 {dimension_numbers = #tpu.dot_dimension_numbers<[1], [0], [0], [1], [0, 0, 1, 1], [], []>} : vector<2x16xbf16>, vector<16x4xbf16>, vector<2x4xf32> -> vector<2x4xf32>
    %80 = vector.broadcast %12 : vector<1x4xf32> to vector<2x4xf32>
    %81 = arith.addf %79, %80 : vector<2x4xf32>
    %cst_40 = arith.constant 0.000000e+00 : f32
    %82 = vector.broadcast %cst_40 : f32 to vector<2x4xf32>
    %83 = arith.maximumf %81, %82 : vector<2x4xf32>
    %84 = arith.truncf %83 : vector<2x4xf32> to vector<2x4xbf16>
    %cst_41 = arith.constant dense<0.000000e+00> : vector<2x16xf32>
    %85 = tpu.matmul %84, %13, %cst_41 {dimension_numbers = #tpu.dot_dimension_numbers<[1], [0], [0], [1], [0, 0, 1, 1], [], []>} : vector<2x4xbf16>, vector<4x16xbf16>, vector<2x16xf32> -> vector<2x16xf32>
    %86 = vector.broadcast %14 : vector<1x16xf32> to vector<2x16xf32>
    %87 = arith.addf %85, %86 : vector<2x16xf32>
    %88 = arith.negf %87 : vector<2x16xf32>
    %89 = math.exp %88 : vector<2x16xf32>
    %cst_42 = arith.constant 1.000000e+00 : f32
    %90 = vector.broadcast %cst_42 : f32 to vector<2x16xf32>
    %91 = arith.addf %90, %89 : vector<2x16xf32>
    %92 = arith.divf %90, %91 : vector<2x16xf32>
    %93 = arith.truncf %92 : vector<2x16xf32> to vector<2x16xbf16>
    %cst_43 = arith.constant dense<0.000000e+00> : vector<128x16xf32>
    %94 = tpu.matmul %1, %93, %cst_43 {dimension_numbers = #tpu.dot_dimension_numbers<[1], [0], [0], [1], [0, 0, 1, 1], [], []>} : vector<128x2xbf16>, vector<2x16xbf16>, vector<128x16xf32> -> vector<128x16xf32>
    %95 = arith.mulf %75, %94 : vector<128x16xf32>
    %96 = arith.truncf %95 : vector<128x16xf32> to vector<128x16xbf16>
    %cst_44 = arith.constant dense<0.000000e+00> : vector<128x24xf32>
    %97 = tpu.matmul %96, %15, %cst_44 {dimension_numbers = #tpu.dot_dimension_numbers<[1], [0], [0], [1], [0, 0, 1, 1], [], []>} : vector<128x16xbf16>, vector<16x24xbf16>, vector<128x24xf32> -> vector<128x24xf32>
    %98 = vector.broadcast %16 : vector<1x24xf32> to vector<128x24xf32>
    %99 = arith.mulf %97, %98 : vector<128x24xf32>
    %100 = vector.broadcast %17 : vector<1x24xf32> to vector<128x24xf32>
    %101 = arith.addf %99, %100 : vector<128x24xf32>
    %c0_45 = arith.constant 0 : index
    %c0_46 = arith.constant 0 : index
    %102 = vector.load %arg18[%c0_45, %c0_46] : memref<24x144xbf16, #tpu.memory_space<vmem>>, vector<24x144xbf16>
    %c0_47 = arith.constant 0 : index
    %c0_48 = arith.constant 0 : index
    %103 = vector.load %arg19[%c0_47, %c0_48] : memref<1x144xf32, #tpu.memory_space<vmem>>, vector<1x144xf32>
    %c0_49 = arith.constant 0 : index
    %c0_50 = arith.constant 0 : index
    %104 = vector.load %arg20[%c0_49, %c0_50] : memref<1x144xf32, #tpu.memory_space<vmem>>, vector<1x144xf32>
    %c0_51 = arith.constant 0 : index
    %c0_52 = arith.constant 0 : index
    %105 = vector.load %arg21[%c0_51, %c0_52] : memref<288x128xbf16, #tpu.memory_space<vmem>>, vector<288x128xbf16>
    %c0_53 = arith.constant 0 : index
    %c0_54 = arith.constant 0 : index
    %106 = vector.load %arg22[%c0_53, %c0_54] : memref<9x144xf32, #tpu.memory_space<vmem>>, vector<9x144xf32>
    %c0_55 = arith.constant 0 : index
    %c0_56 = arith.constant 0 : index
    %107 = vector.load %arg23[%c0_55, %c0_56] : memref<1x144xf32, #tpu.memory_space<vmem>>, vector<1x144xf32>
    %c0_57 = arith.constant 0 : index
    %c0_58 = arith.constant 0 : index
    %108 = vector.load %arg24[%c0_57, %c0_58] : memref<144x36xbf16, #tpu.memory_space<vmem>>, vector<144x36xbf16>
    %c0_59 = arith.constant 0 : index
    %c0_60 = arith.constant 0 : index
    %109 = vector.load %arg25[%c0_59, %c0_60] : memref<1x36xf32, #tpu.memory_space<vmem>>, vector<1x36xf32>
    %c0_61 = arith.constant 0 : index
    %c0_62 = arith.constant 0 : index
    %110 = vector.load %arg26[%c0_61, %c0_62] : memref<36x144xbf16, #tpu.memory_space<vmem>>, vector<36x144xbf16>
    %c0_63 = arith.constant 0 : index
    %c0_64 = arith.constant 0 : index
    %111 = vector.load %arg27[%c0_63, %c0_64] : memref<1x144xf32, #tpu.memory_space<vmem>>, vector<1x144xf32>
    %c0_65 = arith.constant 0 : index
    %c0_66 = arith.constant 0 : index
    %112 = vector.load %arg28[%c0_65, %c0_66] : memref<144x32xbf16, #tpu.memory_space<vmem>>, vector<144x32xbf16>
    %c0_67 = arith.constant 0 : index
    %c0_68 = arith.constant 0 : index
    %113 = vector.load %arg29[%c0_67, %c0_68] : memref<1x32xf32, #tpu.memory_space<vmem>>, vector<1x32xf32>
    %c0_69 = arith.constant 0 : index
    %c0_70 = arith.constant 0 : index
    %114 = vector.load %arg30[%c0_69, %c0_70] : memref<1x32xf32, #tpu.memory_space<vmem>>, vector<1x32xf32>
    %115 = arith.truncf %101 : vector<128x24xf32> to vector<128x24xbf16>
    %cst_71 = arith.constant dense<0.000000e+00> : vector<128x144xf32>
    %116 = tpu.matmul %115, %102, %cst_71 {dimension_numbers = #tpu.dot_dimension_numbers<[1], [0], [0], [1], [0, 0, 1, 1], [], []>} : vector<128x24xbf16>, vector<24x144xbf16>, vector<128x144xf32> -> vector<128x144xf32>
    %117 = vector.broadcast %103 : vector<1x144xf32> to vector<128x144xf32>
    %118 = arith.mulf %116, %117 : vector<128x144xf32>
    %119 = vector.broadcast %104 : vector<1x144xf32> to vector<128x144xf32>
    %120 = arith.addf %118, %119 : vector<128x144xf32>
    %cst_72 = arith.constant 0.000000e+00 : f32
    %121 = vector.broadcast %cst_72 : f32 to vector<128x144xf32>
    %122 = arith.maximumf %120, %121 : vector<128x144xf32>
    %123 = arith.truncf %122 : vector<128x144xf32> to vector<128x144xbf16>
    %cst_73 = arith.constant dense<0.000000e+00> : vector<288x144xf32>
    %124 = tpu.matmul %105, %123, %cst_73 {dimension_numbers = #tpu.dot_dimension_numbers<[1], [0], [0], [1], [0, 0, 1, 1], [], []>} : vector<288x128xbf16>, vector<128x144xbf16>, vector<288x144xf32> -> vector<288x144xf32>
    %125 = vector.extract_strided_slice %124 {offsets = [0, 0], sizes = [32, 144], strides = [1, 1]} : vector<288x144xf32> to vector<32x144xf32>
    %126 = vector.extract_strided_slice %106 {offsets = [0, 0], sizes = [1, 144], strides = [1, 1]} : vector<9x144xf32> to vector<1x144xf32>
    %127 = vector.broadcast %126 : vector<1x144xf32> to vector<32x144xf32>
    %128 = arith.mulf %125, %127 : vector<32x144xf32>
    %129 = vector.extract_strided_slice %124 {offsets = [32, 0], sizes = [32, 144], strides = [1, 1]} : vector<288x144xf32> to vector<32x144xf32>
    %130 = vector.extract_strided_slice %106 {offsets = [1, 0], sizes = [1, 144], strides = [1, 1]} : vector<9x144xf32> to vector<1x144xf32>
    %131 = vector.broadcast %130 : vector<1x144xf32> to vector<32x144xf32>
    %132 = arith.mulf %129, %131 : vector<32x144xf32>
    %133 = arith.addf %128, %132 : vector<32x144xf32>
    %134 = vector.extract_strided_slice %124 {offsets = [64, 0], sizes = [32, 144], strides = [1, 1]} : vector<288x144xf32> to vector<32x144xf32>
    %135 = vector.extract_strided_slice %106 {offsets = [2, 0], sizes = [1, 144], strides = [1, 1]} : vector<9x144xf32> to vector<1x144xf32>
    %136 = vector.broadcast %135 : vector<1x144xf32> to vector<32x144xf32>
    %137 = arith.mulf %134, %136 : vector<32x144xf32>
    %138 = arith.addf %133, %137 : vector<32x144xf32>
    %139 = vector.extract_strided_slice %124 {offsets = [96, 0], sizes = [32, 144], strides = [1, 1]} : vector<288x144xf32> to vector<32x144xf32>
    %140 = vector.extract_strided_slice %106 {offsets = [3, 0], sizes = [1, 144], strides = [1, 1]} : vector<9x144xf32> to vector<1x144xf32>
    %141 = vector.broadcast %140 : vector<1x144xf32> to vector<32x144xf32>
    %142 = arith.mulf %139, %141 : vector<32x144xf32>
    %143 = arith.addf %138, %142 : vector<32x144xf32>
    %144 = vector.extract_strided_slice %124 {offsets = [128, 0], sizes = [32, 144], strides = [1, 1]} : vector<288x144xf32> to vector<32x144xf32>
    %145 = vector.extract_strided_slice %106 {offsets = [4, 0], sizes = [1, 144], strides = [1, 1]} : vector<9x144xf32> to vector<1x144xf32>
    %146 = vector.broadcast %145 : vector<1x144xf32> to vector<32x144xf32>
    %147 = arith.mulf %144, %146 : vector<32x144xf32>
    %148 = arith.addf %143, %147 : vector<32x144xf32>
    %149 = vector.extract_strided_slice %124 {offsets = [160, 0], sizes = [32, 144], strides = [1, 1]} : vector<288x144xf32> to vector<32x144xf32>
    %150 = vector.extract_strided_slice %106 {offsets = [5, 0], sizes = [1, 144], strides = [1, 1]} : vector<9x144xf32> to vector<1x144xf32>
    %151 = vector.broadcast %150 : vector<1x144xf32> to vector<32x144xf32>
    %152 = arith.mulf %149, %151 : vector<32x144xf32>
    %153 = arith.addf %148, %152 : vector<32x144xf32>
    %154 = vector.extract_strided_slice %124 {offsets = [192, 0], sizes = [32, 144], strides = [1, 1]} : vector<288x144xf32> to vector<32x144xf32>
    %155 = vector.extract_strided_slice %106 {offsets = [6, 0], sizes = [1, 144], strides = [1, 1]} : vector<9x144xf32> to vector<1x144xf32>
    %156 = vector.broadcast %155 : vector<1x144xf32> to vector<32x144xf32>
    %157 = arith.mulf %154, %156 : vector<32x144xf32>
    %158 = arith.addf %153, %157 : vector<32x144xf32>
    %159 = vector.extract_strided_slice %124 {offsets = [224, 0], sizes = [32, 144], strides = [1, 1]} : vector<288x144xf32> to vector<32x144xf32>
    %160 = vector.extract_strided_slice %106 {offsets = [7, 0], sizes = [1, 144], strides = [1, 1]} : vector<9x144xf32> to vector<1x144xf32>
    %161 = vector.broadcast %160 : vector<1x144xf32> to vector<32x144xf32>
    %162 = arith.mulf %159, %161 : vector<32x144xf32>
    %163 = arith.addf %158, %162 : vector<32x144xf32>
    %164 = vector.extract_strided_slice %124 {offsets = [256, 0], sizes = [32, 144], strides = [1, 1]} : vector<288x144xf32> to vector<32x144xf32>
    %165 = vector.extract_strided_slice %106 {offsets = [8, 0], sizes = [1, 144], strides = [1, 1]} : vector<9x144xf32> to vector<1x144xf32>
    %166 = vector.broadcast %165 : vector<1x144xf32> to vector<32x144xf32>
    %167 = arith.mulf %164, %166 : vector<32x144xf32>
    %168 = arith.addf %163, %167 : vector<32x144xf32>
    %169 = vector.broadcast %107 : vector<1x144xf32> to vector<32x144xf32>
    %170 = arith.addf %168, %169 : vector<32x144xf32>
    %cst_74 = arith.constant 0.000000e+00 : f32
    %171 = vector.broadcast %cst_74 : f32 to vector<32x144xf32>
    %172 = arith.maximumf %170, %171 : vector<32x144xf32>
    %173 = arith.truncf %172 : vector<32x144xf32> to vector<32x144xbf16>
    %cst_75 = arith.constant dense<0.000000e+00> : vector<2x144xf32>
    %174 = tpu.matmul %2, %173, %cst_75 {dimension_numbers = #tpu.dot_dimension_numbers<[1], [0], [0], [1], [0, 0, 1, 1], [], []>} : vector<2x32xbf16>, vector<32x144xbf16>, vector<2x144xf32> -> vector<2x144xf32>
    %175 = arith.truncf %174 : vector<2x144xf32> to vector<2x144xbf16>
    %cst_76 = arith.constant dense<0.000000e+00> : vector<2x36xf32>
    %176 = tpu.matmul %175, %108, %cst_76 {dimension_numbers = #tpu.dot_dimension_numbers<[1], [0], [0], [1], [0, 0, 1, 1], [], []>} : vector<2x144xbf16>, vector<144x36xbf16>, vector<2x36xf32> -> vector<2x36xf32>
    %177 = vector.broadcast %109 : vector<1x36xf32> to vector<2x36xf32>
    %178 = arith.addf %176, %177 : vector<2x36xf32>
    %cst_77 = arith.constant 0.000000e+00 : f32
    %179 = vector.broadcast %cst_77 : f32 to vector<2x36xf32>
    %180 = arith.maximumf %178, %179 : vector<2x36xf32>
    %181 = arith.truncf %180 : vector<2x36xf32> to vector<2x36xbf16>
    %cst_78 = arith.constant dense<0.000000e+00> : vector<2x144xf32>
    %182 = tpu.matmul %181, %110, %cst_78 {dimension_numbers = #tpu.dot_dimension_numbers<[1], [0], [0], [1], [0, 0, 1, 1], [], []>} : vector<2x36xbf16>, vector<36x144xbf16>, vector<2x144xf32> -> vector<2x144xf32>
    %183 = vector.broadcast %111 : vector<1x144xf32> to vector<2x144xf32>
    %184 = arith.addf %182, %183 : vector<2x144xf32>
    %185 = arith.negf %184 : vector<2x144xf32>
    %186 = math.exp %185 : vector<2x144xf32>
    %cst_79 = arith.constant 1.000000e+00 : f32
    %187 = vector.broadcast %cst_79 : f32 to vector<2x144xf32>
    %188 = arith.addf %187, %186 : vector<2x144xf32>
    %189 = arith.divf %187, %188 : vector<2x144xf32>
    %190 = arith.truncf %189 : vector<2x144xf32> to vector<2x144xbf16>
    %cst_80 = arith.constant dense<0.000000e+00> : vector<32x144xf32>
    %191 = tpu.matmul %3, %190, %cst_80 {dimension_numbers = #tpu.dot_dimension_numbers<[1], [0], [0], [1], [0, 0, 1, 1], [], []>} : vector<32x2xbf16>, vector<2x144xbf16>, vector<32x144xf32> -> vector<32x144xf32>
    %192 = arith.mulf %172, %191 : vector<32x144xf32>
    %193 = arith.truncf %192 : vector<32x144xf32> to vector<32x144xbf16>
    %cst_81 = arith.constant dense<0.000000e+00> : vector<32x32xf32>
    %194 = tpu.matmul %193, %112, %cst_81 {dimension_numbers = #tpu.dot_dimension_numbers<[1], [0], [0], [1], [0, 0, 1, 1], [], []>} : vector<32x144xbf16>, vector<144x32xbf16>, vector<32x32xf32> -> vector<32x32xf32>
    %195 = vector.broadcast %113 : vector<1x32xf32> to vector<32x32xf32>
    %196 = arith.mulf %194, %195 : vector<32x32xf32>
    %197 = vector.broadcast %114 : vector<1x32xf32> to vector<32x32xf32>
    %198 = arith.addf %196, %197 : vector<32x32xf32>
    %c0_82 = arith.constant 0 : index
    %c0_83 = arith.constant 0 : index
    %199 = vector.load %arg31[%c0_82, %c0_83] : memref<32x192xbf16, #tpu.memory_space<vmem>>, vector<32x192xbf16>
    %c0_84 = arith.constant 0 : index
    %c0_85 = arith.constant 0 : index
    %200 = vector.load %arg32[%c0_84, %c0_85] : memref<1x192xf32, #tpu.memory_space<vmem>>, vector<1x192xf32>
    %c0_86 = arith.constant 0 : index
    %c0_87 = arith.constant 0 : index
    %201 = vector.load %arg33[%c0_86, %c0_87] : memref<1x192xf32, #tpu.memory_space<vmem>>, vector<1x192xf32>
    %c0_88 = arith.constant 0 : index
    %c0_89 = arith.constant 0 : index
    %202 = vector.load %arg34[%c0_88, %c0_89] : memref<288x32xbf16, #tpu.memory_space<vmem>>, vector<288x32xbf16>
    %c0_90 = arith.constant 0 : index
    %c0_91 = arith.constant 0 : index
    %203 = vector.load %arg35[%c0_90, %c0_91] : memref<9x192xf32, #tpu.memory_space<vmem>>, vector<9x192xf32>
    %c0_92 = arith.constant 0 : index
    %c0_93 = arith.constant 0 : index
    %204 = vector.load %arg36[%c0_92, %c0_93] : memref<1x192xf32, #tpu.memory_space<vmem>>, vector<1x192xf32>
    %c0_94 = arith.constant 0 : index
    %c0_95 = arith.constant 0 : index
    %205 = vector.load %arg37[%c0_94, %c0_95] : memref<192x48xbf16, #tpu.memory_space<vmem>>, vector<192x48xbf16>
    %c0_96 = arith.constant 0 : index
    %c0_97 = arith.constant 0 : index
    %206 = vector.load %arg38[%c0_96, %c0_97] : memref<1x48xf32, #tpu.memory_space<vmem>>, vector<1x48xf32>
    %c0_98 = arith.constant 0 : index
    %c0_99 = arith.constant 0 : index
    %207 = vector.load %arg39[%c0_98, %c0_99] : memref<48x192xbf16, #tpu.memory_space<vmem>>, vector<48x192xbf16>
    %c0_100 = arith.constant 0 : index
    %c0_101 = arith.constant 0 : index
    %208 = vector.load %arg40[%c0_100, %c0_101] : memref<1x192xf32, #tpu.memory_space<vmem>>, vector<1x192xf32>
    %c0_102 = arith.constant 0 : index
    %c0_103 = arith.constant 0 : index
    %209 = vector.load %arg41[%c0_102, %c0_103] : memref<192x32xbf16, #tpu.memory_space<vmem>>, vector<192x32xbf16>
    %c0_104 = arith.constant 0 : index
    %c0_105 = arith.constant 0 : index
    %210 = vector.load %arg42[%c0_104, %c0_105] : memref<1x32xf32, #tpu.memory_space<vmem>>, vector<1x32xf32>
    %c0_106 = arith.constant 0 : index
    %c0_107 = arith.constant 0 : index
    %211 = vector.load %arg43[%c0_106, %c0_107] : memref<1x32xf32, #tpu.memory_space<vmem>>, vector<1x32xf32>
    %212 = arith.truncf %198 : vector<32x32xf32> to vector<32x32xbf16>
    %cst_108 = arith.constant dense<0.000000e+00> : vector<32x192xf32>
    %213 = tpu.matmul %212, %199, %cst_108 {dimension_numbers = #tpu.dot_dimension_numbers<[1], [0], [0], [1], [0, 0, 1, 1], [], []>} : vector<32x32xbf16>, vector<32x192xbf16>, vector<32x192xf32> -> vector<32x192xf32>
    %214 = vector.broadcast %200 : vector<1x192xf32> to vector<32x192xf32>
    %215 = arith.mulf %213, %214 : vector<32x192xf32>
    %216 = vector.broadcast %201 : vector<1x192xf32> to vector<32x192xf32>
    %217 = arith.addf %215, %216 : vector<32x192xf32>
    %cst_109 = arith.constant 0.000000e+00 : f32
    %218 = vector.broadcast %cst_109 : f32 to vector<32x192xf32>
    %219 = arith.maximumf %217, %218 : vector<32x192xf32>
    %220 = arith.truncf %219 : vector<32x192xf32> to vector<32x192xbf16>
    %cst_110 = arith.constant dense<0.000000e+00> : vector<288x192xf32>
    %221 = tpu.matmul %202, %220, %cst_110 {dimension_numbers = #tpu.dot_dimension_numbers<[1], [0], [0], [1], [0, 0, 1, 1], [], []>} : vector<288x32xbf16>, vector<32x192xbf16>, vector<288x192xf32> -> vector<288x192xf32>
    %222 = vector.extract_strided_slice %221 {offsets = [0, 0], sizes = [32, 192], strides = [1, 1]} : vector<288x192xf32> to vector<32x192xf32>
    %223 = vector.extract_strided_slice %203 {offsets = [0, 0], sizes = [1, 192], strides = [1, 1]} : vector<9x192xf32> to vector<1x192xf32>
    %224 = vector.broadcast %223 : vector<1x192xf32> to vector<32x192xf32>
    %225 = arith.mulf %222, %224 : vector<32x192xf32>
    %226 = vector.extract_strided_slice %221 {offsets = [32, 0], sizes = [32, 192], strides = [1, 1]} : vector<288x192xf32> to vector<32x192xf32>
    %227 = vector.extract_strided_slice %203 {offsets = [1, 0], sizes = [1, 192], strides = [1, 1]} : vector<9x192xf32> to vector<1x192xf32>
    %228 = vector.broadcast %227 : vector<1x192xf32> to vector<32x192xf32>
    %229 = arith.mulf %226, %228 : vector<32x192xf32>
    %230 = arith.addf %225, %229 : vector<32x192xf32>
    %231 = vector.extract_strided_slice %221 {offsets = [64, 0], sizes = [32, 192], strides = [1, 1]} : vector<288x192xf32> to vector<32x192xf32>
    %232 = vector.extract_strided_slice %203 {offsets = [2, 0], sizes = [1, 192], strides = [1, 1]} : vector<9x192xf32> to vector<1x192xf32>
    %233 = vector.broadcast %232 : vector<1x192xf32> to vector<32x192xf32>
    %234 = arith.mulf %231, %233 : vector<32x192xf32>
    %235 = arith.addf %230, %234 : vector<32x192xf32>
    %236 = vector.extract_strided_slice %221 {offsets = [96, 0], sizes = [32, 192], strides = [1, 1]} : vector<288x192xf32> to vector<32x192xf32>
    %237 = vector.extract_strided_slice %203 {offsets = [3, 0], sizes = [1, 192], strides = [1, 1]} : vector<9x192xf32> to vector<1x192xf32>
    %238 = vector.broadcast %237 : vector<1x192xf32> to vector<32x192xf32>
    %239 = arith.mulf %236, %238 : vector<32x192xf32>
    %240 = arith.addf %235, %239 : vector<32x192xf32>
    %241 = vector.extract_strided_slice %221 {offsets = [128, 0], sizes = [32, 192], strides = [1, 1]} : vector<288x192xf32> to vector<32x192xf32>
    %242 = vector.extract_strided_slice %203 {offsets = [4, 0], sizes = [1, 192], strides = [1, 1]} : vector<9x192xf32> to vector<1x192xf32>
    %243 = vector.broadcast %242 : vector<1x192xf32> to vector<32x192xf32>
    %244 = arith.mulf %241, %243 : vector<32x192xf32>
    %245 = arith.addf %240, %244 : vector<32x192xf32>
    %246 = vector.extract_strided_slice %221 {offsets = [160, 0], sizes = [32, 192], strides = [1, 1]} : vector<288x192xf32> to vector<32x192xf32>
    %247 = vector.extract_strided_slice %203 {offsets = [5, 0], sizes = [1, 192], strides = [1, 1]} : vector<9x192xf32> to vector<1x192xf32>
    %248 = vector.broadcast %247 : vector<1x192xf32> to vector<32x192xf32>
    %249 = arith.mulf %246, %248 : vector<32x192xf32>
    %250 = arith.addf %245, %249 : vector<32x192xf32>
    %251 = vector.extract_strided_slice %221 {offsets = [192, 0], sizes = [32, 192], strides = [1, 1]} : vector<288x192xf32> to vector<32x192xf32>
    %252 = vector.extract_strided_slice %203 {offsets = [6, 0], sizes = [1, 192], strides = [1, 1]} : vector<9x192xf32> to vector<1x192xf32>
    %253 = vector.broadcast %252 : vector<1x192xf32> to vector<32x192xf32>
    %254 = arith.mulf %251, %253 : vector<32x192xf32>
    %255 = arith.addf %250, %254 : vector<32x192xf32>
    %256 = vector.extract_strided_slice %221 {offsets = [224, 0], sizes = [32, 192], strides = [1, 1]} : vector<288x192xf32> to vector<32x192xf32>
    %257 = vector.extract_strided_slice %203 {offsets = [7, 0], sizes = [1, 192], strides = [1, 1]} : vector<9x192xf32> to vector<1x192xf32>
    %258 = vector.broadcast %257 : vector<1x192xf32> to vector<32x192xf32>
    %259 = arith.mulf %256, %258 : vector<32x192xf32>
    %260 = arith.addf %255, %259 : vector<32x192xf32>
    %261 = vector.extract_strided_slice %221 {offsets = [256, 0], sizes = [32, 192], strides = [1, 1]} : vector<288x192xf32> to vector<32x192xf32>
    %262 = vector.extract_strided_slice %203 {offsets = [8, 0], sizes = [1, 192], strides = [1, 1]} : vector<9x192xf32> to vector<1x192xf32>
    %263 = vector.broadcast %262 : vector<1x192xf32> to vector<32x192xf32>
    %264 = arith.mulf %261, %263 : vector<32x192xf32>
    %265 = arith.addf %260, %264 : vector<32x192xf32>
    %266 = vector.broadcast %204 : vector<1x192xf32> to vector<32x192xf32>
    %267 = arith.addf %265, %266 : vector<32x192xf32>
    %cst_111 = arith.constant 0.000000e+00 : f32
    %268 = vector.broadcast %cst_111 : f32 to vector<32x192xf32>
    %269 = arith.maximumf %267, %268 : vector<32x192xf32>
    %270 = arith.truncf %269 : vector<32x192xf32> to vector<32x192xbf16>
    %cst_112 = arith.constant dense<0.000000e+00> : vector<2x192xf32>
    %271 = tpu.matmul %2, %270, %cst_112 {dimension_numbers = #tpu.dot_dimension_numbers<[1], [0], [0], [1], [0, 0, 1, 1], [], []>} : vector<2x32xbf16>, vector<32x192xbf16>, vector<2x192xf32> -> vector<2x192xf32>
    %272 = arith.truncf %271 : vector<2x192xf32> to vector<2x192xbf16>
    %cst_113 = arith.constant dense<0.000000e+00> : vector<2x48xf32>
    %273 = tpu.matmul %272, %205, %cst_113 {dimension_numbers = #tpu.dot_dimension_numbers<[1], [0], [0], [1], [0, 0, 1, 1], [], []>} : vector<2x192xbf16>, vector<192x48xbf16>, vector<2x48xf32> -> vector<2x48xf32>
    %274 = vector.broadcast %206 : vector<1x48xf32> to vector<2x48xf32>
    %275 = arith.addf %273, %274 : vector<2x48xf32>
    %cst_114 = arith.constant 0.000000e+00 : f32
    %276 = vector.broadcast %cst_114 : f32 to vector<2x48xf32>
    %277 = arith.maximumf %275, %276 : vector<2x48xf32>
    %278 = arith.truncf %277 : vector<2x48xf32> to vector<2x48xbf16>
    %cst_115 = arith.constant dense<0.000000e+00> : vector<2x192xf32>
    %279 = tpu.matmul %278, %207, %cst_115 {dimension_numbers = #tpu.dot_dimension_numbers<[1], [0], [0], [1], [0, 0, 1, 1], [], []>} : vector<2x48xbf16>, vector<48x192xbf16>, vector<2x192xf32> -> vector<2x192xf32>
    %280 = vector.broadcast %208 : vector<1x192xf32> to vector<2x192xf32>
    %281 = arith.addf %279, %280 : vector<2x192xf32>
    %282 = arith.negf %281 : vector<2x192xf32>
    %283 = math.exp %282 : vector<2x192xf32>
    %cst_116 = arith.constant 1.000000e+00 : f32
    %284 = vector.broadcast %cst_116 : f32 to vector<2x192xf32>
    %285 = arith.addf %284, %283 : vector<2x192xf32>
    %286 = arith.divf %284, %285 : vector<2x192xf32>
    %287 = arith.truncf %286 : vector<2x192xf32> to vector<2x192xbf16>
    %cst_117 = arith.constant dense<0.000000e+00> : vector<32x192xf32>
    %288 = tpu.matmul %3, %287, %cst_117 {dimension_numbers = #tpu.dot_dimension_numbers<[1], [0], [0], [1], [0, 0, 1, 1], [], []>} : vector<32x2xbf16>, vector<2x192xbf16>, vector<32x192xf32> -> vector<32x192xf32>
    %289 = arith.mulf %269, %288 : vector<32x192xf32>
    %290 = arith.truncf %289 : vector<32x192xf32> to vector<32x192xbf16>
    %cst_118 = arith.constant dense<0.000000e+00> : vector<32x32xf32>
    %291 = tpu.matmul %290, %209, %cst_118 {dimension_numbers = #tpu.dot_dimension_numbers<[1], [0], [0], [1], [0, 0, 1, 1], [], []>} : vector<32x192xbf16>, vector<192x32xbf16>, vector<32x32xf32> -> vector<32x32xf32>
    %292 = vector.broadcast %210 : vector<1x32xf32> to vector<32x32xf32>
    %293 = arith.mulf %291, %292 : vector<32x32xf32>
    %294 = vector.broadcast %211 : vector<1x32xf32> to vector<32x32xf32>
    %295 = arith.addf %293, %294 : vector<32x32xf32>
    %296 = arith.addf %295, %198 : vector<32x32xf32>
    %c0_119 = arith.constant 0 : index
    %c0_120 = arith.constant 0 : index
    %297 = vector.load %arg44[%c0_119, %c0_120] : memref<32x64xbf16, #tpu.memory_space<vmem>>, vector<32x64xbf16>
    %c0_121 = arith.constant 0 : index
    %c0_122 = arith.constant 0 : index
    %298 = vector.load %arg45[%c0_121, %c0_122] : memref<1x64xf32, #tpu.memory_space<vmem>>, vector<1x64xf32>
    %c0_123 = arith.constant 0 : index
    %c0_124 = arith.constant 0 : index
    %299 = vector.load %arg46[%c0_123, %c0_124] : memref<1x64xf32, #tpu.memory_space<vmem>>, vector<1x64xf32>
    %c0_125 = arith.constant 0 : index
    %c0_126 = arith.constant 0 : index
    %300 = vector.load %arg47[%c0_125, %c0_126] : memref<64x10xbf16, #tpu.memory_space<vmem>>, vector<64x10xbf16>
    %c0_127 = arith.constant 0 : index
    %c0_128 = arith.constant 0 : index
    %301 = vector.load %arg48[%c0_127, %c0_128] : memref<1x10xf32, #tpu.memory_space<vmem>>, vector<1x10xf32>
    %302 = arith.truncf %296 : vector<32x32xf32> to vector<32x32xbf16>
    %cst_129 = arith.constant dense<0.000000e+00> : vector<32x64xf32>
    %303 = tpu.matmul %302, %297, %cst_129 {dimension_numbers = #tpu.dot_dimension_numbers<[1], [0], [0], [1], [0, 0, 1, 1], [], []>} : vector<32x32xbf16>, vector<32x64xbf16>, vector<32x64xf32> -> vector<32x64xf32>
    %304 = vector.broadcast %298 : vector<1x64xf32> to vector<32x64xf32>
    %305 = arith.mulf %303, %304 : vector<32x64xf32>
    %306 = vector.broadcast %299 : vector<1x64xf32> to vector<32x64xf32>
    %307 = arith.addf %305, %306 : vector<32x64xf32>
    %cst_130 = arith.constant 0.000000e+00 : f32
    %308 = vector.broadcast %cst_130 : f32 to vector<32x64xf32>
    %309 = arith.maximumf %307, %308 : vector<32x64xf32>
    %310 = arith.truncf %309 : vector<32x64xf32> to vector<32x64xbf16>
    %cst_131 = arith.constant dense<0.000000e+00> : vector<2x64xf32>
    %311 = tpu.matmul %2, %310, %cst_131 {dimension_numbers = #tpu.dot_dimension_numbers<[1], [0], [0], [1], [0, 0, 1, 1], [], []>} : vector<2x32xbf16>, vector<32x64xbf16>, vector<2x64xf32> -> vector<2x64xf32>
    %312 = arith.truncf %311 : vector<2x64xf32> to vector<2x64xbf16>
    %cst_132 = arith.constant dense<0.000000e+00> : vector<2x10xf32>
    %313 = tpu.matmul %312, %300, %cst_132 {dimension_numbers = #tpu.dot_dimension_numbers<[1], [0], [0], [1], [0, 0, 1, 1], [], []>} : vector<2x64xbf16>, vector<64x10xbf16>, vector<2x10xf32> -> vector<2x10xf32>
    %314 = vector.broadcast %301 : vector<1x10xf32> to vector<2x10xf32>
    %315 = arith.addf %313, %314 : vector<2x10xf32>
    %c0_133 = arith.constant 0 : index
    %c0_134 = arith.constant 0 : index
    %316 = vector.load %arg49[%c0_133, %c0_134] : memref<2x10xf32, #tpu.memory_space<vmem>>, vector<2x10xf32>
    tpu.vector_store %arg49[%c0_133, %c0_134], %315 {strides = array<i32>} : memref<2x10xf32, #tpu.memory_space<vmem>>, vector<2x10xf32>,
    return
  }
}

</mosaic_0001>

<bundles_post_ra>
// kernel: dsnet_forward.1
= control target key start
LH: loop header
LB: loop body
LE: loop exit
PB: predicated region body
PF: predicated region fallthrough
CT: control target
= control target key end

     0   :  { %s5875_s6 = smov 1   ;;  %s5876_s10 = smov 2   ;;  %s7535_s0 = inlined_call_operand.smem [shape: u32[50], index: -1, kind: input, shape index: {}] }
   0x1   :  { %s5937_s5 = sld [smem:[%s7535_s0]]   ;;  %s5877_s14 = smov 3  }
   0x2   :  { %s5942_s9 = sld [smem:[%s7535_s0 + %s5875_s6]]   ;;  %s5878_s18 = smov 4  }
   0x3   :  { %s5947_s13 = sld [smem:[%s7535_s0 + %s5876_s10]]   ;;  %s5879_s22 = smov 5  }
   0x4   :  { %s5952_s17 = sld [smem:[%s7535_s0 + %s5877_s14]]   ;;  %s5880_s26 = smov 6  }
   0x5   :  { %s5957_s21 = sld [smem:[%s7535_s0 + %s5878_s18]]   ;;  %s5881_s30 = smov 7  }
   0x6   :  { %s5962_s25 = sld [smem:[%s7535_s0 + %s5879_s22]]   ;;  %s5882_s4 = smov 8  }
   0x7   :  { %s5967_s29 = sld [smem:[%s7535_s0 + %s5880_s26]]   ;;  %s5883_s10 = smov 9  }
   0x8   :  { %s5972_s3 = sld [smem:[%s7535_s0 + %s5881_s30]]   ;;  %s5884_s15 = smov 10  }
   0x9   :  { %s5977_s8 = sld [smem:[%s7535_s0 + %s5882_s4]]   ;;  %s5885_s20 = smov 11  }
   0xa   :  { %7551 = sst [smem:[#allocation8_spill]] %s5952_s17  ;;  %s5886_s26 = smov 12  }
   0xb   :  { %7552 = sst [smem:[#allocation9_spill]] %s5957_s21  ;;  %s5887_s1 = smov 13  }
   0xc   :  { %s5982_s14 = sld [smem:[%s7535_s0 + %s5883_s10]]   ;;  %s5888_s7 = smov 14  }
   0xd   :  { %s5987_s19 = sld [smem:[%s7535_s0 + %s5884_s15]]   ;;  %s5889_s15 = smov 15  }
   0xe   :  { %s5992_s24 = sld [smem:[%s7535_s0 + %s5885_s20]]   ;;  %s5890_s22 = smov 16  }
   0xf   :  { %s5997_s30 = sld [smem:[%s7535_s0 + %s5886_s26]]   ;;  %s5891_s28 = smov 17  }
  0x10   :  { %s6002_s6 = sld [smem:[%s7535_s0 + %s5887_s1]]  }
  0x11   :  { %s6007_s12 = sld [smem:[%s7535_s0 + %s5888_s7]]   ;;  %s5892_s7 = smov 18  }
  0x12   :  { %s6012_s20 = sld [smem:[%s7535_s0 + %s5889_s15]]   ;;  %s5893_s15 = smov 19  }
  0x13   :  { %s6017_s27 = sld [smem:[%s7535_s0 + %s5890_s22]]   ;;  %s5894_s22 = smov 20  }
  0x14   :  { %s6022_s4 = sld [smem:[%s7535_s0 + %s5891_s28]]   ;;  %s5895_s28 = smov 21  }
  0x15   :  { %s6027_s21 = sld [smem:[%s7535_s0 + %s5892_s7]]   ;;  %s5896_s7 = smov 22  }
  0x16   :  { %s6032_s17 = sld [smem:[%s7535_s0 + %s5893_s15]]   ;;  %s5897_s15 = smov 23  }
  0x19   :  { %7553 = sst [smem:[#allocation10_spill]] %s6017_s27 }
  0x1a   :  { %7554 = sst [smem:[#allocation11_spill]] %s6022_s4 }
  0x1b   :  { %7555 = sst [smem:[#allocation12_spill]] %s6027_s21 }
  0x1c   :  { %7556 = sst [smem:[#allocation13_spill]] %s6032_s17 }
  0x1d   :  { %s6037_s27 = sld [smem:[%s7535_s0 + %s5894_s22]]   ;;  %s5898_s22 = smov 24  }
  0x1e   :  { %s6042_s4 = sld [smem:[%s7535_s0 + %s5895_s28]]   ;;  %s5899_s28 = smov 25  }
  0x1f   :  { %s6047_s21 = sld [smem:[%s7535_s0 + %s5896_s7]]   ;;  %s5900_s7 = smov 26  }
  0x20   :  { %s6052_s17 = sld [smem:[%s7535_s0 + %s5897_s15]]   ;;  %s5901_s15 = smov 27  }
  0x23   :  { %7557 = sst [smem:[#allocation14_spill]] %s6037_s27 }
  0x24   :  { %7558 = sst [smem:[#allocation15_spill]] %s6042_s4 }
  0x25   :  { %7559 = sst [smem:[#allocation16_spill]] %s6047_s21 }
  0x26   :  { %7560 = sst [smem:[#allocation17_spill]] %s6052_s17 }
  0x27   :  { %s6057_s27 = sld [smem:[%s7535_s0 + %s5898_s22]]   ;;  %s5902_s22 = smov 28  }
  0x28   :  { %s6062_s4 = sld [smem:[%s7535_s0 + %s5899_s28]]   ;;  %s5903_s28 = smov 29  }
  0x29   :  { %s6067_s21 = sld [smem:[%s7535_s0 + %s5900_s7]]   ;;  %s5904_s7 = smov 30  }
  0x2a   :  { %s6072_s17 = sld [smem:[%s7535_s0 + %s5901_s15]]   ;;  %s5905_s15 = smov 31  }
  0x2d   :  { %7561 = sst [smem:[#allocation18_spill]] %s6057_s27 }
  0x2e   :  { %7562 = sst [smem:[#allocation19_spill]] %s6062_s4 }
  0x2f   :  { %7563 = sst [smem:[#allocation20_spill]] %s6067_s21 }
  0x30   :  { %7564 = sst [smem:[#allocation21_spill]] %s6072_s17 }
  0x31   :  { %s6077_s27 = sld [smem:[%s7535_s0 + %s5902_s22]]   ;;  %s5906_s22 = smov 32  }
  0x32   :  { %s6082_s4 = sld [smem:[%s7535_s0 + %s5903_s28]]   ;;  %s5907_s28 = smov 33  }
  0x33   :  { %s6087_s21 = sld [smem:[%s7535_s0 + %s5904_s7]]   ;;  %s5908_s7 = smov 34  }
  0x34   :  { %s6092_s17 = sld [smem:[%s7535_s0 + %s5905_s15]]   ;;  %s5909_s15 = smov 35  }
  0x37   :  { %7565 = sst [smem:[#allocation22_spill]] %s6077_s27 }
  0x38   :  { %7566 = sst [smem:[#allocation23_spill]] %s6082_s4 }
  0x39   :  { %7567 = sst [smem:[#allocation24_spill]] %s6087_s21 }
  0x3a   :  { %7568 = sst [smem:[#allocation25_spill]] %s6092_s17 }
  0x3b   :  { %s6097_s27 = sld [smem:[%s7535_s0 + %s5906_s22]]   ;;  %s5910_s22 = smov 36  }
  0x3c   :  { %s6102_s4 = sld [smem:[%s7535_s0 + %s5907_s28]]   ;;  %s5911_s28 = smov 37  }
  0x3d   :  { %s6107_s21 = sld [smem:[%s7535_s0 + %s5908_s7]]   ;;  %s5912_s7 = smov 38  }
  0x3e   :  { %s6112_s17 = sld [smem:[%s7535_s0 + %s5909_s15]]   ;;  %s5913_s15 = smov 39  }
  0x41   :  { %7569 = sst [smem:[#allocation26_spill]] %s6097_s27 }
  0x42   :  { %7570 = sst [smem:[#allocation27_spill]] %s6102_s4 }
  0x43   :  { %7571 = sst [smem:[#allocation28_spill]] %s6107_s21 }
  0x44   :  { %7572 = sst [smem:[#allocation29_spill]] %s6112_s17 }
  0x45   :  { %s6117_s27 = sld [smem:[%s7535_s0 + %s5910_s22]]   ;;  %s5914_s22 = smov 40  }
  0x46   :  { %s6122_s4 = sld [smem:[%s7535_s0 + %s5911_s28]]   ;;  %s5915_s28 = smov 41  }
  0x47   :  { %s6127_s21 = sld [smem:[%s7535_s0 + %s5912_s7]]   ;;  %s5916_s7 = smov 42  }
  0x48   :  { %s6132_s17 = sld [smem:[%s7535_s0 + %s5913_s15]]   ;;  %s5917_s15 = smov 43  }
  0x4b   :  { %7573 = sst [smem:[#allocation30_spill]] %s6117_s27 }
  0x4c   :  { %7574 = sst [smem:[#allocation31_spill]] %s6122_s4 }
  0x4d   :  { %7575 = sst [smem:[#allocation32_spill]] %s6127_s21 }
  0x4e   :  { %7576 = sst [smem:[#allocation33_spill]] %s6132_s17 }
  0x4f   :  { %s6137_s27 = sld [smem:[%s7535_s0 + %s5914_s22]]   ;;  %s5918_s22 = smov 44  }
  0x50   :  { %s6142_s4 = sld [smem:[%s7535_s0 + %s5915_s28]]   ;;  %s5919_s28 = smov 45  }
  0x51   :  { %s6147_s21 = sld [smem:[%s7535_s0 + %s5916_s7]]   ;;  %s5920_s7 = smov 46  }
  0x52   :  { %s6152_s17 = sld [smem:[%s7535_s0 + %s5917_s15]]   ;;  %s5921_s15 = smov 47  }
  0x55   :  { %7577 = sst [smem:[#allocation34_spill]] %s6137_s27 }
  0x56   :  { %7578 = sst [smem:[#allocation35_spill]] %s6142_s4 }
  0x57   :  { %7579 = sst [smem:[#allocation36_spill]] %s6147_s21 }
  0x58   :  { %7580 = sst [smem:[#allocation37_spill]] %s6152_s17 }
  0x59   :  { %s6157_s27 = sld [smem:[%s7535_s0 + %s5918_s22]]   ;;  %s5922_s22 = smov 48  }
  0x5a   :  { %s6162_s4 = sld [smem:[%s7535_s0 + %s5919_s28]]   ;;  %s5923_s28 = smov 49  }
  0x5b   :  { %s6167_s21 = sld [smem:[%s7535_s0 + %s5920_s7]]  }
  0x5c   :  { %s6172_s17 = sld [smem:[%s7535_s0 + %s5921_s15]]  }
  0x5f   :  { %7581 = sst [smem:[#allocation38_spill]] %s6157_s27 }
  0x60   :  { %7582 = sst [smem:[#allocation39_spill]] %s6162_s4 }
  0x61   :  { %s6177_s27 = sld [smem:[%s7535_s0 + %s5922_s22]]  }
  0x62   :  { %s6182_s4 = sld [smem:[%s7535_s0 + %s5923_s28]]  }
  0x63   :  { %104 = vsyncpa [#allocation3], 0 }
  0x64   :  { %105 = vsyncpa [#allocation4], 0  ;;  %s126_s7 = sshll.u32 %s5977_s8, 4  ;;  %s5924_s10 = smov [#allocation2]   ;;  %s127_s7 = int_to_ptr.hbm [resolvable:$true] %s126_s7 }
  0x65   :  { %s128_s11 = sshll.u32 %s5924_s10, 4  ;;  %s5823_s15 = sshra.s32 %s127_s7, 4  ;;  %s129_s11 = int_to_ptr.vmem [resolvable:$true] %s128_s11  ;;  %s5824_s15 = int_to_ptr.hbm [resolvable:$true] %s5823_s15 }
  0x66   :  { %s5825_s16 = scalar_lea.hbm %s5824_s15, 576  ;;  %s5827_s18 = scalar_lea.hbm %s5977_s8, 576 }
  0x67   :  { %p5826_p0 = scmp.ne.s32.totalorder %s5824_s15, %s5825_s16  ;;  %p5828_p1 = scmp.lt.s32.totalorder %s5824_s15, %s5977_s8 }
  0x68   :  { %p5829_p2 = scmp.lt.s32.totalorder %s5827_s18, %s5825_s16 }
  0x6a   :  { %p5830_p3 = por %p5829_p2, %p5828_p1 }
  0x6c   :  { %p5831_p4 = pnand %p5830_p3, %p5826_p0 }
  0x6e   :  { %5834 = shalt.err (!%p5831_p4)
}
  0x6f   :  { %s5925_s0 = smov 64   ;;  %s5926_s22 = smov 4  }
  0x70   :  { %134 = dma.hbm_to_vmem [thread:$0]  %s127_s7, 9216, %s129_s11, [#allocation3], %s5925_s0, %s5925_s0, %s5926_s22  }
  0x71   :  { %5871 = dma.done.wait [#allocation3], 9216  }
  0x72   :  { %5872 = vsyncadd [#allocation3], 4294958080  ;;  %vm464_vm0 = vcmask 1044480   ;;  %vm465_vm1 = vcmask 1045504   ;;  %v5927_v0 = vmov 65535   ;;  %v5539_v7 = vld [vmem:[%s5962_s25] sm:$0xff] }
  0x73   :  { %v466_v1 = vsel %vm464_vm0, 4294967295, %v5927_v0  ;;  %v4678_v2 = vld [vmem:[%s5962_s25 + $0x8] sm:$0xf]  ;;  %v5540_v3 = vld [vmem:[%s5962_s25 + $0x8] sm:$0x30]  ;;  %v242_v8 = vld [vmem:[%s5937_s5] sm:$0xff] }
  0x74   :  { %v467_v4 = vsel %vm465_vm1, %v466_v1, 0  ;;  %v4679_v5 = vor.u32 %v5540_v3, %v4678_v2  ;;  %v243_v9 = vld [vmem:[%s5937_s5 + $0x8] sm:$0xff]  ;;  %vm439_vm2 = vcmask 220160   ;;  %v254_v10 = vld [vmem:[%s5937_s5 + $0x60] sm:$0xff]  ;;  %v244_v14 = vld [vmem:[%s5937_s5 + $0x10] sm:$0xff]  ;;  %vm1730_vm3 = vcmask 130048  }
  0x75   :  { %v255_v11 = vld [vmem:[%s5937_s5 + $0x68] sm:$0xff]  ;;  %v420_v12 = vpack.c.bf16 %v243_v9, %v242_v8  ;;  %v245_v15 = vld [vmem:[%s5937_s5 + $0x18] sm:$0xff]  ;;  %v256_v16 = vld [vmem:[%s5937_s5 + $0x70] sm:$0xff]  ;;  %vm1756_vm4 = vcmask 1041408   ;;  %vm1752_vm5 = vcmask 31744   ;;  %vm1858_vm10 = vcmask 1040384  }
  0x76   :  { %v469_v6 = vand.u32 %v4679_v5, %v467_v4  ;;  %v426_v13 = vpack.c.bf16 %v255_v11, %v254_v10  ;;  %v257_v17 = vld [vmem:[%s5937_s5 + $0x78] sm:$0xff]  ;;  %v421_v18 = vpack.c.bf16 %v245_v15, %v244_v14  ;;  %v246_v20 = vld [vmem:[%s5937_s5 + $0x20] sm:$0xff]  ;;  %v247_v21 = vld [vmem:[%s5937_s5 + $0x28] sm:$0xff]  ;;  %vm1833_vm11 = vcmask 15360   ;;  %s7586_s25 = sld [smem:[#allocation13_spill]] }
  0x77   :  { %v427_v19 = vpack.c.bf16 %v257_v17, %v256_v16  ;;  %v422_v22 = vpack.c.bf16 %v247_v21, %v246_v20  ;;  %v248_v23 = vld [vmem:[%s5937_s5 + $0x30] sm:$0xff]  ;;  %v249_v24 = vld [vmem:[%s5937_s5 + $0x38] sm:$0xff]  ;;  %v250_v26 = vld [vmem:[%s5937_s5 + $0x40] sm:$0xff]  ;;  %vm2191_vm12 = vcmask 1043456   ;;  %vm2166_vm13 = vcmask 195584   ;;  %s7589_s8 = sld [smem:[#allocation16_spill]] }
  0x78   :  { %477 = vmatpush.bf16.msra.mxu0 %v469_v6  ;;  %5715 = vmatpush.bf16.msra.mxu3 %v469_v6  ;;  %v423_v25 = vpack.c.bf16 %v249_v24, %v248_v23  ;;  %v251_v27 = vld [vmem:[%s5937_s5 + $0x48] sm:$0xff]  ;;  %v252_v29 = vld [vmem:[%s5937_s5 + $0x50] sm:$0xff]  ;;  %v253_v30 = vld [vmem:[%s5937_s5 + $0x58] sm:$0xff]  ;;  %s7583_s5 = sld [smem:[#allocation12_spill]]  ;;  %vm2903_vm14 = vcmask 261120   ;;  %vm3053_vm15 = vcmask 293888  }
  0x79   :  { %v424_v28 = vpack.c.bf16 %v251_v27, %v250_v26  ;;  %v425_v31 = vpack.c.bf16 %v253_v30, %v252_v29  ;;  %v6219_v38 = vld [vmem:[%s5967_s29] ss:$0 sm:$0xff]  ;;  %s7587_s29 = sld [smem:[#allocation14_spill]] }
  0x7a   :  { %v6223_v41 = vld [vmem:[%s5972_s3] ss:$0 sm:$0xff]  ;;  %s7588_s3 = sld [smem:[#allocation15_spill]] }
  0x7b   :  { %s7597_s23 = sld [smem:[#allocation22_spill]] }
  0x7c   :  { %478 = vmatpush.bf16.msra.mxu0 %v5539_v7  ;;  %5716 = vmatpush.bf16.msra.mxu3 %v5539_v7  ;;  %s7598_s26 = sld [smem:[#allocation25_spill]] }
  0x7d   :  { %s7599_s28 = sld [smem:[#allocation23_spill]] }
  0x7e   :  { %s7600_s1 = sld [smem:[#allocation24_spill]] }
  0x7f   :  { %4680 = vmatmul.msk.bf16.vlgmr.msra.gmra.mxu0 %vm439_vm2, %v420_v12  ;;  %4686 = vmatmul.msk.bf16.vlgmr.msra.gmra.mxu3 %vm439_vm2, %v426_v13  ;;  %s7601_s2 = sld [smem:[#allocation26_spill]] }
  0x80   :  { %s7602_s7 = sld [smem:[#allocation27_spill]] }
  0x81   :  { %s7603_s10 = sld [smem:[#allocation28_spill]] }
  0x82   :  { %s7604_s11 = sld [smem:[#allocation29_spill]] }
  0x83   :  { %s7605_s15 = sld [smem:[#allocation30_spill]] }
  0x84   :  { %s7606_s16 = sld [smem:[#allocation31_spill]] }
  0x85   :  { %s7607_s18 = sld [smem:[#allocation33_spill]] }
  0x86   :  { %s7608_s0 = sld [smem:[#allocation32_spill]] }
  0x87   :  { %s7609_s22 = sld [smem:[#allocation34_spill]] }
  0x8f   :  { %4681 = vmatmul.msk.bf16.gmra.mxu0 %vm439_vm2, %v421_v18  ;;  %4687 = vmatmul.msk.bf16.gmra.mxu3 %vm439_vm2, %v427_v19 }
  0x9f   :  { %4682 = vmatmul.msk.bf16.gmra.mxu0 %vm439_vm2, %v422_v22 }
  0xaf   :  { %4683 = vmatmul.msk.bf16.gmra.mxu0 %vm439_vm2, %v423_v25 }
  0xbf   :  { %4684 = vmatmul.msk.bf16.gmra.mxu0 %vm439_vm2, %v424_v28 }
  0xcf   :  { %4685 = vmatmul.msk.bf16.gmra.mxu0 %vm439_vm2, %v425_v31 }
  0xfc   :  { %v6214_v32 = vpop.f32.mrf.mxu0 }
  0xfd   :  { %v523_v30 = vmul.f32 %v6219_v38, %v6214_v32 }
 0x102   :  { %v510_v33 = vpop.f32.mrf.mxu3 }
 0x103   :  { %v535_v42 = vmul.f32 %v6219_v38, %v510_v33 }
 0x104   :  { %v6216_v34 = vpop.f32.mrf.mxu0 }
 0x105   :  { %v554_v46 = vadd.f32 %v6223_v41, %v535_v42  ;;  %v524_v26 = vmul.f32 %v6219_v38, %v6216_v34 }
 0x107   :  { %v570_v52 = vmax.f32 %v554_v46, 0.0  ;;  %v5558_v46 = vld [vmem:[#allocation2 + $0x88] sm:$0xff] }
 0x10a   :  { %v512_v35 = vpop.f32.mrf.mxu3 }
 0x10b   :  { %v536_v43 = vmul.f32 %v6219_v38, %v512_v35  ;;  %v543_v35 = vadd.f32 %v6223_v41, %v524_v26 }
 0x10c   :  { %v485_v36 = vpop.f32.mrf.mxu0 }
 0x10d   :  { %v555_v47 = vadd.f32 %v6223_v41, %v536_v43  ;;  %v525_v23 = vmul.f32 %v6219_v38, %v485_v36  ;;  %v559_v42 = vmax.f32 %v543_v35, 0.0 }
 0x10f   :  { %v571_v54 = vmax.f32 %v555_v47, 0.0  ;;  %v544_v31 = vadd.f32 %v6223_v41, %v525_v23  ;;  %v5559_v47 = vld [vmem:[#allocation2 + $0x90] sm:$0xff] }
 0x111   :  { %v580_v56 = vpack.c.bf16 %v571_v54, %v570_v52  ;;  %v5546_v52 = vld [vmem:[#allocation2 + $0x28] sm:$0xff]  ;;  %v5547_v54 = vld [vmem:[#allocation2 + $0x30] sm:$0xff] }
 0x112   :  { %v515_v37 = vpop.f32.mrf.mxu3 }
 0x113   :  { %v537_v40 = vmul.f32 %v6219_v38, %v515_v37 }
 0x114   :  { %v487_v39 = vpop.f32.mrf.mxu0 }
 0x115   :  { %v556_v44 = vadd.f32 %v6223_v41, %v537_v40  ;;  %v526_v19 = vmul.f32 %v6219_v38, %v487_v39  ;;  %v542_v39 = vadd.f32 %v6223_v41, %v523_v30  ;;  %v560_v40 = vmax.f32 %v544_v31, 0.0  ;;  %v5555_v30 = vld [vmem:[#allocation2 + $0x70] sm:$0xff] }
 0x116   :  { %v5571_v31 = vld [vmem:[#allocation2 + $0xf0] sm:$0xff] }
 0x117   :  { %v572_v50 = vmax.f32 %v556_v44, 0.0  ;;  %v545_v27 = vadd.f32 %v6223_v41, %v526_v19  ;;  %v558_v43 = vmax.f32 %v542_v39, 0.0  ;;  %v5557_v44 = vld [vmem:[#allocation2 + $0x80] sm:$0xff]  ;;  %v5556_v39 = vld [vmem:[#allocation2 + $0x78] sm:$0xff] }
 0x118   :  { %v5569_v19 = vld [vmem:[#allocation2 + $0xe0] sm:$0xff] }
 0x119   :  { %v561_v37 = vmax.f32 %v545_v27, 0.0  ;;  %v574_v32 = vpack.c.bf16 %v559_v42, %v558_v43 }
 0x11a   :  { %v517_v45 = vpop.f32.mrf.mxu3 }
 0x11b   :  { %v538_v48 = vmul.f32 %v6219_v38, %v517_v45  ;;  %v575_v34 = vpack.c.bf16 %v561_v37, %v560_v40  ;;  %v5542_v45 = vld [vmem:[#allocation2 + $0x8] sm:$0xff]  ;;  %v5572_v40 = vld [vmem:[#allocation2 + $0xf8] sm:$0xff] }
 0x11c   :  { %v490_v49 = vpop.f32.mrf.mxu0 }
 0x11d   :  { %v557_v51 = vadd.f32 %v6223_v41, %v538_v48  ;;  %v527_v16 = vmul.f32 %v6219_v38, %v490_v49  ;;  %v5544_v48 = vld [vmem:[#allocation2 + $0x18] sm:$0xff] }
 0x11e   :  { %v5560_v49 = vld [vmem:[#allocation2 + $0x98] sm:$0xff] }
 0x11f   :  { %v573_v53 = vmax.f32 %v557_v51, 0.0  ;;  %v546_v24 = vadd.f32 %v6223_v41, %v527_v16  ;;  %v5561_v51 = vld [vmem:[#allocation2 + $0xa0] sm:$0xff] }
 0x121   :  { %v581_v55 = vpack.c.bf16 %v573_v53, %v572_v50  ;;  %v562_v33 = vmax.f32 %v546_v24, 0.0  ;;  %v5545_v50 = vld [vmem:[#allocation2 + $0x20] sm:$0xff]  ;;  %v5562_v53 = vld [vmem:[#allocation2 + $0xa8] sm:$0xff] }
 0x122   :  { %v5554_v24 = vld [vmem:[#allocation2 + $0x68] sm:$0xff] }
 0x123   :  { %1014 = vmatpush.bf16.msrb.mxu0 %v581_v55  ;;  %5717 = vmatpush.bf16.msra.mxu1 %v581_v55  ;;  %v5563_v55 = vld [vmem:[#allocation2 + $0xb0] sm:$0xff] }
 0x124   :  { %v492_v57 = vpop.f32.mrf.mxu0 }
 0x125   :  { %v528_v12 = vmul.f32 %v6219_v38, %v492_v57  ;;  %v5564_v57 = vld [vmem:[#allocation2 + $0xb8] sm:$0xff] }
 0x127   :  { %1015 = vmatpush.bf16.msrb.mxu0 %v580_v56  ;;  %5718 = vmatpush.bf16.msra.mxu1 %v580_v56  ;;  %v547_v20 = vadd.f32 %v6223_v41, %v528_v12  ;;  %v5548_v56 = vld [vmem:[#allocation2 + $0x38] sm:$0xff] }
 0x128   :  { %v5552_v12 = vld [vmem:[#allocation2 + $0x58] sm:$0xff] }
 0x129   :  { %v563_v29 = vmax.f32 %v547_v20, 0.0 }
 0x12b   :  { %v576_v36 = vpack.c.bf16 %v563_v29, %v562_v33 }
 0x12c   :  { %v495_v58 = vpop.f32.mrf.mxu0 }
 0x12d   :  { %v529_v8 = vmul.f32 %v6219_v38, %v495_v58  ;;  %v5549_v58 = vld [vmem:[#allocation2 + $0x40] sm:$0xff] }
 0x12f   :  { %v548_v17 = vadd.f32 %v6223_v41, %v529_v8 }
 0x131   :  { %v564_v25 = vmax.f32 %v548_v17, 0.0 }
 0x134   :  { %v497_v59 = vpop.f32.mrf.mxu0 }
 0x135   :  { %v530_v5 = vmul.f32 %v6219_v38, %v497_v59  ;;  %v5565_v59 = vld [vmem:[#allocation2 + $0xc0] sm:$0xff] }
 0x137   :  { %v549_v13 = vadd.f32 %v6223_v41, %v530_v5 }
 0x139   :  { %v565_v22 = vmax.f32 %v549_v13, 0.0  ;;  %v5568_v13 = vld [vmem:[#allocation2 + $0xd8] sm:$0xff] }
 0x13b   :  { %v577_v28 = vpack.c.bf16 %v565_v22, %v564_v25  ;;  %v5570_v25 = vld [vmem:[#allocation2 + $0xe8] sm:$0xff] }
 0x13c   :  { %v500_v60 = vpop.f32.mrf.mxu0 }
 0x13d   :  { %v531_v2 = vmul.f32 %v6219_v38, %v500_v60 }
 0x13f   :  { %v550_v9 = vadd.f32 %v6223_v41, %v531_v2 }
 0x141   :  { %v566_v18 = vmax.f32 %v550_v9, 0.0 }
 0x144   :  { %v502_v61 = vpop.f32.mrf.mxu0 }
 0x145   :  { %v532_v0 = vmul.f32 %v6219_v38, %v502_v61 }
 0x147   :  { %v551_v6 = vadd.f32 %v6223_v41, %v532_v0  ;;  %v5550_v0 = vld [vmem:[#allocation2 + $0x48] sm:$0xff] }
 0x149   :  { %v567_v15 = vmax.f32 %v551_v6, 0.0  ;;  %v5551_v6 = vld [vmem:[#allocation2 + $0x50] sm:$0xff] }
 0x14b   :  { %v578_v21 = vpack.c.bf16 %v567_v15, %v566_v18  ;;  %v5553_v18 = vld [vmem:[#allocation2 + $0x60] sm:$0xff] }
 0x14c   :  { %v505_v62 = vpop.f32.mrf.mxu0 }
 0x14d   :  { %v533_v63 = vmul.f32 %v6219_v38, %v505_v62 }
 0x14f   :  { %v552_v3 = vadd.f32 %v6223_v41, %v533_v63 }
 0x151   :  { %v568_v10 = vmax.f32 %v552_v3, 0.0 }
 0x154   :  { %v507_v1 = vpop.f32.mrf.mxu0 }
 0x155   :  { %v534_v4 = vmul.f32 %v6219_v38, %v507_v1  ;;  %v5541_v38 = vld [vmem:[#allocation2] sm:$0xff]  ;;  %v5566_v1 = vld [vmem:[#allocation2 + $0xc8] sm:$0xff] }
 0x157   :  { %v553_v7 = vadd.f32 %v6223_v41, %v534_v4  ;;  %v5543_v41 = vld [vmem:[#allocation2 + $0x10] sm:$0xff] }
 0x159   :  { %v569_v11 = vmax.f32 %v553_v7, 0.0  ;;  %v5567_v7 = vld [vmem:[#allocation2 + $0xd0] sm:$0xff] }
 0x15b   :  { %v579_v14 = vpack.c.bf16 %v569_v11, %v568_v10 }
 0x15d   :  { %1016 = vmatpush.bf16.msrb.mxu0 %v579_v14  ;;  %5719 = vmatpush.bf16.msra.mxu1 %v579_v14 }
 0x161   :  { %1017 = vmatpush.bf16.msrb.mxu0 %v578_v21  ;;  %5720 = vmatpush.bf16.msra.mxu1 %v578_v21 }
 0x165   :  { %1018 = vmatpush.bf16.msrb.mxu0 %v577_v28  ;;  %5721 = vmatpush.bf16.msra.mxu1 %v577_v28 }
 0x169   :  { %1019 = vmatpush.bf16.msrb.mxu0 %v576_v36  ;;  %5722 = vmatpush.bf16.msra.mxu1 %v576_v36 }
 0x16d   :  { %1020 = vmatpush.bf16.msrb.mxu0 %v575_v34  ;;  %5723 = vmatpush.bf16.msra.mxu1 %v575_v34 }
 0x171   :  { %1021 = vmatpush.bf16.msrb.mxu0 %v574_v32  ;;  %5724 = vmatpush.bf16.msra.mxu1 %v574_v32 }
 0x174   :  { %1022 = vmatmul.bf16.vlgmr.msrb.gmra.mxu0 %v5541_v38  ;;  %1102 = vmatmul.bf16.vlgmr.msra.gmra.mxu1 %v5557_v44  ;;  %v6323_v38 = vld [vmem:[%s5982_s14] sm:$0xff] }
 0x175   :  { %v6326_v44 = vperm.slane %v6323_v38, 0 }
 0x184   :  { %1027 = vmatmul.bf16.gmra.mxu0 %v5542_v45  ;;  %1107 = vmatmul.bf16.gmra.mxu1 %v5558_v46  ;;  %v6329_v45 = vperm.slane %v6323_v38, 1 }
 0x194   :  { %1032 = vmatmul.bf16.gmra.mxu0 %v5543_v41  ;;  %1112 = vmatmul.bf16.gmra.mxu1 %v5559_v47  ;;  %v6334_v41 = vperm.slane %v6323_v38, 2  ;;  %v5573_v47 = vld [vmem:[#allocation2 + $0x100] sm:$0xff] }
 0x1a4   :  { %1037 = vmatmul.bf16.gmra.mxu0 %v5544_v48  ;;  %1117 = vmatmul.bf16.gmra.mxu1 %v5560_v49 }
 0x1b4   :  { %1042 = vmatmul.bf16.gmra.mxu0 %v5545_v50  ;;  %1122 = vmatmul.bf16.gmra.mxu1 %v5561_v51  ;;  %v6338_v51 = vperm.slane %v6323_v38, 3 }
 0x1c4   :  { %1047 = vmatmul.bf16.gmra.mxu0 %v5546_v52  ;;  %1127 = vmatmul.bf16.gmra.mxu1 %v5562_v53 }
 0x1d4   :  { %1052 = vmatmul.bf16.gmra.mxu0 %v5547_v54  ;;  %1132 = vmatmul.bf16.gmra.mxu1 %v5563_v55 }
 0x1e4   :  { %1057 = vmatmul.bf16.gmra.mxu0 %v5548_v56  ;;  %1137 = vmatmul.bf16.gmra.mxu1 %v5564_v57 }
 0x1f1   :  { %v6258_v60 = vpop.f32.mrf.mxu0  ;;  %v6260_v61 = vpop.f32.mrf.mxu1 }
 0x1f2   :  { %v1384_v46 = vmul.f32 %v6326_v44, %v6258_v60  ;;  %v1434_v52 = vmul.f32 %v6334_v41, %v6260_v61 }
 0x1f4   :  { %1062 = vmatmul.bf16.gmra.mxu0 %v5549_v58  ;;  %1142 = vmatmul.bf16.gmra.mxu1 %v5565_v59 }
 0x1f9   :  { %v6262_v62 = vpop.f32.mrf.mxu0  ;;  %v6264_v63 = vpop.f32.mrf.mxu1 }
 0x1fa   :  { %v1385_v56 = vmul.f32 %v6326_v44, %v6262_v62 }
 0x201   :  { %v6266_v2 = vpop.f32.mrf.mxu0  ;;  %v6268_v3 = vpop.f32.mrf.mxu1 }
 0x204   :  { %1067 = vmatmul.bf16.gmra.mxu0 %v5550_v0  ;;  %1147 = vmatmul.bf16.gmra.mxu1 %v5566_v1  ;;  %v1435_v0 = vmul.f32 %v6334_v41, %v6264_v63 }
 0x209   :  { %v6270_v4 = vpop.f32.mrf.mxu0  ;;  %v6272_v5 = vpop.f32.mrf.mxu1 }
 0x211   :  { %v6274_v8 = vpop.f32.mrf.mxu0  ;;  %v6276_v9 = vpop.f32.mrf.mxu1 }
 0x214   :  { %1072 = vmatmul.bf16.gmra.mxu0 %v5551_v6  ;;  %1152 = vmatmul.bf16.gmra.mxu1 %v5567_v7  ;;  %v1386_v7 = vmul.f32 %v6326_v44, %v6266_v2 }
 0x219   :  { %v6278_v10 = vpop.f32.mrf.mxu0  ;;  %v6280_v11 = vpop.f32.mrf.mxu1 }
 0x221   :  { %v6282_v14 = vpop.f32.mrf.mxu0  ;;  %v6284_v15 = vpop.f32.mrf.mxu1 }
 0x224   :  { %1077 = vmatmul.bf16.gmra.mxu0 %v5552_v12  ;;  %1157 = vmatmul.bf16.gmra.mxu1 %v5568_v13  ;;  %v5574_v13 = vld [vmem:[#allocation2 + $0x108] sm:$0xff] }
 0x229   :  { %v6286_v16 = vpop.f32.mrf.mxu0  ;;  %v6288_v17 = vpop.f32.mrf.mxu1 }
 0x231   :  { %v6290_v20 = vpop.f32.mrf.mxu0  ;;  %v6292_v21 = vpop.f32.mrf.mxu1 }
 0x234   :  { %1082 = vmatmul.bf16.gmra.mxu0 %v5553_v18  ;;  %1162 = vmatmul.bf16.gmra.mxu1 %v5569_v19 }
 0x239   :  { %v6294_v22 = vpop.f32.mrf.mxu0  ;;  %v6296_v23 = vpop.f32.mrf.mxu1 }
 0x241   :  { %v6298_v26 = vpop.f32.mrf.mxu0  ;;  %v6300_v27 = vpop.f32.mrf.mxu1 }
 0x244   :  { %1087 = vmatmul.bf16.gmra.mxu0 %v5554_v24  ;;  %1167 = vmatmul.bf16.gmra.mxu1 %v5570_v25  ;;  %v1436_v24 = vmul.f32 %v6334_v41, %v6268_v3 }
 0x249   :  { %v6302_v28 = vpop.f32.mrf.mxu0  ;;  %v6304_v29 = vpop.f32.mrf.mxu1 }
 0x251   :  { %v6306_v33 = vpop.f32.mrf.mxu0  ;;  %v6308_v35 = vpop.f32.mrf.mxu1 }
 0x254   :  { %1092 = vmatmul.bf16.gmra.mxu0 %v5555_v30  ;;  %1172 = vmatmul.bf16.gmra.mxu1 %v5571_v31  ;;  %v1387_v31 = vmul.f32 %v6326_v44, %v6270_v4 }
 0x259   :  { %v6310_v36 = vpop.f32.mrf.mxu0  ;;  %v6312_v37 = vpop.f32.mrf.mxu1 }
 0x261   :  { %v6314_v34 = vpop.f32.mrf.mxu0  ;;  %v6316_v42 = vpop.f32.mrf.mxu1 }
 0x264   :  { %1097 = vmatmul.bf16.gmra.mxu0 %v5556_v39  ;;  %1177 = vmatmul.bf16.gmra.mxu1 %v5572_v40 }
 0x269   :  { %v6318_v43 = vpop.f32.mrf.mxu0  ;;  %v6320_v32 = vpop.f32.mrf.mxu1 }
 0x271   :  { %v1063_v48 = vpop.f32.mrf.mxu0  ;;  %v1143_v49 = vpop.f32.mrf.mxu1 }
 0x272   :  { %v1401_v50 = vmul.f32 %v6329_v45, %v1063_v48  ;;  %v1467_v55 = vmul.f32 %v6338_v51, %v1143_v49 }
 0x274   :  { %v1417_v53 = vadd.f32 %v1401_v50, %v1384_v46  ;;  %1182 = vmatmul.bf16.gmra.mxu1 %v5573_v47  ;;  %v1437_v47 = vmul.f32 %v6334_v41, %v6272_v5  ;;  %v1388_v50 = vmul.f32 %v6326_v44, %v6274_v8 }
 0x276   :  { %v1450_v54 = vadd.f32 %v1434_v52, %v1417_v53  ;;  %v5575_v53 = vld [vmem:[#allocation2 + $0x110] sm:$0xff] }
 0x278   :  { %v6345_v57 = vadd.f32 %v1467_v55, %v1450_v54 }
 0x279   :  { %v1065_v58 = vpop.f32.mrf.mxu0  ;;  %v1145_v59 = vpop.f32.mrf.mxu1 }
 0x27a   :  { %v1402_v60 = vmul.f32 %v6329_v45, %v1065_v58  ;;  %v1468_v61 = vmul.f32 %v6338_v51, %v1145_v59 }
 0x27c   :  { %v1418_v1 = vadd.f32 %v1402_v60, %v1385_v56  ;;  %v1438_v56 = vmul.f32 %v6334_v41, %v6276_v9  ;;  %v1389_v60 = vmul.f32 %v6326_v44, %v6278_v10 }
 0x27e   :  { %v1451_v6 = vadd.f32 %v1435_v0, %v1418_v1 }
 0x280   :  { %v6353_v12 = vadd.f32 %v1468_v61, %v1451_v6  ;;  %v1439_v61 = vmul.f32 %v6334_v41, %v6280_v11 }
 0x281   :  { %v1068_v62 = vpop.f32.mrf.mxu0  ;;  %v1148_v18 = vpop.f32.mrf.mxu1 }
 0x282   :  { %v1403_v19 = vmul.f32 %v6329_v45, %v1068_v62  ;;  %v1469_v30 = vmul.f32 %v6338_v51, %v1148_v18  ;;  %v1390_v62 = vmul.f32 %v6326_v44, %v6282_v14 }
 0x284   :  { %v1419_v25 = vadd.f32 %v1403_v19, %v1386_v7  ;;  %1187 = vmatmul.bf16.gmra.mxu1 %v5574_v13  ;;  %v5576_v19 = vld [vmem:[#allocation2 + $0x118] sm:$0xff] }
 0x286   :  { %v1452_v63 = vadd.f32 %v1436_v24, %v1419_v25 }
 0x288   :  { %v6361_v39 = vadd.f32 %v1469_v30, %v1452_v63  ;;  %v1440_v63 = vmul.f32 %v6334_v41, %v6284_v15 }
 0x289   :  { %v1070_v2 = vpop.f32.mrf.mxu0  ;;  %v1150_v40 = vpop.f32.mrf.mxu1 }
 0x28a   :  { %v1404_v46 = vmul.f32 %v6329_v45, %v1070_v2  ;;  %v1470_v3 = vmul.f32 %v6338_v51, %v1150_v40  ;;  %v1391_v2 = vmul.f32 %v6326_v44, %v6286_v16 }
 0x28c   :  { %v1420_v48 = vadd.f32 %v1404_v46, %v1387_v31 }
 0x28e   :  { %v1453_v49 = vadd.f32 %v1437_v47, %v1420_v48  ;;  %v1441_v48 = vmul.f32 %v6334_v41, %v6288_v17 }
 0x290   :  { %v6369_v52 = vadd.f32 %v1470_v3, %v1453_v49 }
 0x291   :  { %v1073_v4 = vpop.f32.mrf.mxu0  ;;  %v1153_v54 = vpop.f32.mrf.mxu1 }
 0x292   :  { %v1405_v55 = vmul.f32 %v6329_v45, %v1073_v4  ;;  %v1471_v59 = vmul.f32 %v6338_v51, %v1153_v54  ;;  %v5577_v4 = vld [vmem:[#allocation2 + $0x120] sm:$0xff] }
 0x294   :  { %v1421_v58 = vadd.f32 %v1405_v55, %v1388_v50  ;;  %1192 = vmatmul.bf16.gmra.mxu1 %v5575_v53  ;;  %v1392_v50 = vmul.f32 %v6326_v44, %v6290_v20 }
 0x296   :  { %v1454_v5 = vadd.f32 %v1438_v56, %v1421_v58  ;;  %v1442_v56 = vmul.f32 %v6334_v41, %v6292_v21 }
 0x298   :  { %v6377_v0 = vadd.f32 %v1471_v59, %v1454_v5  ;;  %v1393_v59 = vmul.f32 %v6326_v44, %v6294_v22 }
 0x299   :  { %v1075_v8 = vpop.f32.mrf.mxu0  ;;  %v1155_v1 = vpop.f32.mrf.mxu1 }
 0x29a   :  { %v1406_v6 = vmul.f32 %v6329_v45, %v1075_v8  ;;  %v1472_v9 = vmul.f32 %v6338_v51, %v1155_v1 }
 0x29c   :  { %v1422_v7 = vadd.f32 %v1406_v6, %v1389_v60  ;;  %v1443_v6 = vmul.f32 %v6334_v41, %v6296_v23 }
 0x29e   :  { %v1455_v13 = vadd.f32 %v1439_v61, %v1422_v7 }
 0x2a0   :  { %v6385_v18 = vadd.f32 %v1472_v9, %v1455_v13  ;;  %v1394_v13 = vmul.f32 %v6326_v44, %v6298_v26 }
 0x2a1   :  { %v1078_v10 = vpop.f32.mrf.mxu0  ;;  %v1158_v24 = vpop.f32.mrf.mxu1 }
 0x2a2   :  { %v1407_v25 = vmul.f32 %v6329_v45, %v1078_v10  ;;  %v1473_v31 = vmul.f32 %v6338_v51, %v1158_v24  ;;  %v1444_v24 = vmul.f32 %v6334_v41, %v6300_v27 }
 0x2a4   :  { %v1423_v30 = vadd.f32 %v1407_v25, %v1390_v62  ;;  %1197 = vmatmul.bf16.gmra.mxu1 %v5576_v19  ;;  %v5578_v62 = vld [vmem:[#allocation2 + $0x128] sm:$0xff] }
 0x2a6   :  { %v1456_v11 = vadd.f32 %v1440_v63, %v1423_v30  ;;  %v1395_v30 = vmul.f32 %v6326_v44, %v6302_v28 }
 0x2a8   :  { %v6393_v40 = vadd.f32 %v1473_v31, %v1456_v11 }
 0x2a9   :  { %v1080_v14 = vpop.f32.mrf.mxu0  ;;  %v1160_v46 = vpop.f32.mrf.mxu1 }
 0x2aa   :  { %v1408_v47 = vmul.f32 %v6329_v45, %v1080_v14  ;;  %v1474_v15 = vmul.f32 %v6338_v51, %v1160_v46  ;;  %v1445_v14 = vmul.f32 %v6334_v41, %v6304_v29 }
 0x2ac   :  { %v1424_v49 = vadd.f32 %v1408_v47, %v1391_v2 }
 0x2ae   :  { %v1457_v3 = vadd.f32 %v1441_v48, %v1424_v49  ;;  %v1396_v48 = vmul.f32 %v6326_v44, %v6306_v33 }
 0x2b0   :  { %v6401_v53 = vadd.f32 %v1474_v15, %v1457_v3  ;;  %v5579_v3 = vld [vmem:[#allocation2 + $0x130] sm:$0xff] }
 0x2b1   :  { %v1083_v16 = vpop.f32.mrf.mxu0  ;;  %v1163_v54 = vpop.f32.mrf.mxu1 }
 0x2b2   :  { %v1409_v55 = vmul.f32 %v6329_v45, %v1083_v16  ;;  %v1475_v5 = vmul.f32 %v6338_v51, %v1163_v54 }
 0x2b4   :  { %v1425_v58 = vadd.f32 %v1409_v55, %v1392_v50  ;;  %1202 = vmatmul.bf16.gmra.mxu1 %v5577_v4  ;;  %v1446_v4 = vmul.f32 %v6334_v41, %v6308_v35  ;;  %v1397_v55 = vmul.f32 %v6326_v44, %v6310_v36 }
 0x2b6   :  { %v1458_v17 = vadd.f32 %v1442_v56, %v1425_v58 }
 0x2b8   :  { %v6409_v60 = vadd.f32 %v1475_v5, %v1458_v17  ;;  %v1447_v5 = vmul.f32 %v6334_v41, %v6312_v37 }
 0x2b9   :  { %v1085_v20 = vpop.f32.mrf.mxu0  ;;  %v1165_v8 = vpop.f32.mrf.mxu1 }
 0x2ba   :  { %v1410_v1 = vmul.f32 %v6329_v45, %v1085_v20  ;;  %v1476_v21 = vmul.f32 %v6338_v51, %v1165_v8  ;;  %v1398_v8 = vmul.f32 %v6326_v44, %v6314_v34 }
 0x2bc   :  { %v1426_v61 = vadd.f32 %v1410_v1, %v1393_v59 }
 0x2be   :  { %v1459_v7 = vadd.f32 %v1443_v6, %v1426_v61  ;;  %v5580_v6 = vld [vmem:[#allocation2 + $0x138] sm:$0xff] }
 0x2c0   :  { %v6417_v9 = vadd.f32 %v1476_v21, %v1459_v7  ;;  %v1448_v21 = vmul.f32 %v6334_v41, %v6316_v42 }
 0x2c1   :  { %v1088_v22 = vpop.f32.mrf.mxu0  ;;  %v1168_v19 = vpop.f32.mrf.mxu1 }
 0x2c2   :  { %v1411_v10 = vmul.f32 %v6329_v45, %v1088_v22  ;;  %v1477_v63 = vmul.f32 %v6338_v51, %v1168_v19  ;;  %v1399_v22 = vmul.f32 %v6326_v44, %v6318_v43 }
 0x2c4   :  { %v1427_v25 = vadd.f32 %v1411_v10, %v1394_v13  ;;  %1207 = vmatmul.bf16.gmra.mxu1 %v5578_v62 }
 0x2c6   :  { %v1460_v23 = vadd.f32 %v1444_v24, %v1427_v25  ;;  %v1449_v25 = vmul.f32 %v6334_v41, %v6320_v32 }
 0x2c8   :  { %v6425_v11 = vadd.f32 %v1477_v63, %v1460_v23 }
 0x2c9   :  { %v1090_v26 = vpop.f32.mrf.mxu0  ;;  %v1170_v31 = vpop.f32.mrf.mxu1 }
 0x2ca   :  { %v1412_v2 = vmul.f32 %v6329_v45, %v1090_v26  ;;  %v1478_v27 = vmul.f32 %v6338_v51, %v1170_v31  ;;  %v5581_v31 = vld [vmem:[#allocation2 + $0x140] sm:$0xff] }
 0x2cc   :  { %v1428_v46 = vadd.f32 %v1412_v2, %v1395_v30  ;;  %v6464_v30 = vperm.slane %v6323_v38, 4 }
 0x2ce   :  { %v1461_v47 = vadd.f32 %v1445_v14, %v1428_v46 }
 0x2d0   :  { %v6433_v49 = vadd.f32 %v1478_v27, %v1461_v47 }
 0x2d1   :  { %v1093_v28 = vpop.f32.mrf.mxu0  ;;  %v1173_v15 = vpop.f32.mrf.mxu1 }
 0x2d2   :  { %v1413_v50 = vmul.f32 %v6329_v45, %v1093_v28  ;;  %v1479_v54 = vmul.f32 %v6338_v51, %v1173_v15 }
 0x2d4   :  { %v1429_v16 = vadd.f32 %v1413_v50, %v1396_v48  ;;  %1212 = vmatmul.bf16.gmra.mxu1 %v5579_v3  ;;  %v5583_v3 = vld [vmem:[#allocation2 + $0x150] sm:$0xff] }
 0x2d6   :  { %v1462_v29 = vadd.f32 %v1446_v4, %v1429_v16  ;;  %v5584_v16 = vld [vmem:[#allocation2 + $0x158] sm:$0xff] }
 0x2d8   :  { %v6441_v56 = vadd.f32 %v1479_v54, %v1462_v29 }
 0x2d9   :  { %v1095_v33 = vpop.f32.mrf.mxu0  ;;  %v1175_v58 = vpop.f32.mrf.mxu1 }
 0x2da   :  { %v1414_v17 = vmul.f32 %v6329_v45, %v1095_v33  ;;  %v1480_v35 = vmul.f32 %v6338_v51, %v1175_v58  ;;  %v5585_v58 = vld [vmem:[#allocation2 + $0x160] sm:$0xff] }
 0x2dc   :  { %v1430_v59 = vadd.f32 %v1414_v17, %v1397_v55 }
 0x2de   :  { %v1463_v20 = vadd.f32 %v1447_v5, %v1430_v59 }
 0x2e0   :  { %v6449_v1 = vadd.f32 %v1480_v35, %v1463_v20  ;;  %v5586_v35 = vld [vmem:[#allocation2 + $0x168] sm:$0xff] }
 0x2e1   :  { %v1098_v36 = vpop.f32.mrf.mxu0  ;;  %v1178_v61 = vpop.f32.mrf.mxu1 }
 0x2e2   :  { %v1415_v7 = vmul.f32 %v6329_v45, %v1098_v36  ;;  %v1481_v62 = vmul.f32 %v6338_v51, %v1178_v61 }
 0x2e4   :  { %v1431_v13 = vadd.f32 %v1415_v7, %v1398_v8  ;;  %1217 = vmatmul.bf16.gmra.mxu1 %v5580_v6  ;;  %v5587_v7 = vld [vmem:[#allocation2 + $0x170] sm:$0xff] }
 0x2e6   :  { %v1464_v37 = vadd.f32 %v1448_v21, %v1431_v13 }
 0x2e8   :  { %v6457_v19 = vadd.f32 %v1481_v62, %v1464_v37 }
 0x2e9   :  { %v1100_v34 = vpop.f32.mrf.mxu0  ;;  %v1180_v10 = vpop.f32.mrf.mxu1 }
 0x2ea   :  { %v1416_v24 = vmul.f32 %v6329_v45, %v1100_v34  ;;  %v1482_v42 = vmul.f32 %v6338_v51, %v1180_v10  ;;  %v5582_v51 = vld [vmem:[#allocation2 + $0x148] sm:$0xff] }
 0x2ec   :  { %v1432_v23 = vadd.f32 %v1416_v24, %v1399_v22  ;;  %v5588_v22 = vld [vmem:[#allocation2 + $0x178] sm:$0xff] }
 0x2ee   :  { %v1465_v63 = vadd.f32 %v1449_v25, %v1432_v23  ;;  %v6533_v23 = vperm.slane %v6323_v38, 5 }
 0x2f0   :  { %v6466_v26 = vadd.f32 %v1482_v42, %v1465_v63  ;;  %v5589_v63 = vld [vmem:[#allocation2 + $0x180] sm:$0xff] }
 0x2f1   :  { %v1183_v43 = vpop.f32.mrf.mxu1 }
 0x2f2   :  { %v1500_v44 = vmul.f32 %v6464_v30, %v1183_v43 }
 0x2f4   :  { %v6470_v2 = vadd.f32 %v1500_v44, %v6345_v57  ;;  %1222 = vmatmul.bf16.gmra.mxu1 %v5581_v31 }
 0x2f9   :  { %v1185_v45 = vpop.f32.mrf.mxu1 }
 0x2fa   :  { %v1501_v32 = vmul.f32 %v6464_v30, %v1185_v45 }
 0x2fc   :  { %v6474_v41 = vadd.f32 %v1501_v32, %v6353_v12 }
 0x301   :  { %v1188_v14 = vpop.f32.mrf.mxu1 }
 0x302   :  { %v1502_v46 = vmul.f32 %v6464_v30, %v1188_v14 }
 0x304   :  { %v6478_v47 = vadd.f32 %v1502_v46, %v6361_v39  ;;  %1227 = vmatmul.bf16.gmra.mxu1 %v5582_v51  ;;  %v5591_v46 = vld [vmem:[#allocation2 + $0x190] sm:$0xff] }
 0x309   :  { %v1190_v27 = vpop.f32.mrf.mxu1 }
 0x30a   :  { %v1503_v48 = vmul.f32 %v6464_v30, %v1190_v27 }
 0x30c   :  { %v6482_v57 = vadd.f32 %v1503_v48, %v6369_v52 }
 0x311   :  { %v1193_v28 = vpop.f32.mrf.mxu1 }
 0x312   :  { %v1504_v15 = vmul.f32 %v6464_v30, %v1193_v28 }
 0x314   :  { %v6486_v12 = vadd.f32 %v1504_v15, %v6377_v0  ;;  %1232 = vmatmul.bf16.gmra.mxu1 %v5583_v3  ;;  %v5592_v15 = vld [vmem:[#allocation2 + $0x198] sm:$0xff] }
 0x319   :  { %v1195_v50 = vpop.f32.mrf.mxu1 }
 0x31a   :  { %v1505_v4 = vmul.f32 %v6464_v30, %v1195_v50 }
 0x31c   :  { %v6490_v39 = vadd.f32 %v1505_v4, %v6385_v18 }
 0x321   :  { %v1198_v29 = vpop.f32.mrf.mxu1 }
 0x322   :  { %v1506_v54 = vmul.f32 %v6464_v30, %v1198_v29 }
 0x324   :  { %v6494_v52 = vadd.f32 %v1506_v54, %v6393_v40  ;;  %1237 = vmatmul.bf16.gmra.mxu1 %v5584_v16  ;;  %v5593_v54 = vld [vmem:[#allocation2 + $0x1a0] sm:$0xff] }
 0x329   :  { %v1200_v55 = vpop.f32.mrf.mxu1 }
 0x32a   :  { %v1507_v33 = vmul.f32 %v6464_v30, %v1200_v55 }
 0x32c   :  { %v6498_v0 = vadd.f32 %v1507_v33, %v6401_v53 }
 0x331   :  { %v1203_v17 = vpop.f32.mrf.mxu1 }
 0x332   :  { %v1508_v5 = vmul.f32 %v6464_v30, %v1203_v17 }
 0x334   :  { %v6502_v18 = vadd.f32 %v1508_v5, %v6409_v60  ;;  %1242 = vmatmul.bf16.gmra.mxu1 %v5585_v58  ;;  %v5594_v5 = vld [vmem:[#allocation2 + $0x1a8] sm:$0xff] }
 0x339   :  { %v1205_v59 = vpop.f32.mrf.mxu1 }
 0x33a   :  { %v1509_v20 = vmul.f32 %v6464_v30, %v1205_v59 }
 0x33c   :  { %v6506_v40 = vadd.f32 %v1509_v20, %v6417_v9 }
 0x341   :  { %v1208_v8 = vpop.f32.mrf.mxu1 }
 0x342   :  { %v1510_v6 = vmul.f32 %v6464_v30, %v1208_v8 }
 0x344   :  { %v6510_v53 = vadd.f32 %v1510_v6, %v6425_v11  ;;  %1247 = vmatmul.bf16.gmra.mxu1 %v5586_v35  ;;  %v5595_v6 = vld [vmem:[#allocation2 + $0x1b0] sm:$0xff] }
 0x349   :  { %v1210_v36 = vpop.f32.mrf.mxu1 }
 0x34a   :  { %v1511_v61 = vmul.f32 %v6464_v30, %v1210_v36 }
 0x34c   :  { %v6514_v60 = vadd.f32 %v1511_v61, %v6433_v49 }
 0x351   :  { %v1213_v21 = vpop.f32.mrf.mxu1 }
 0x352   :  { %v1512_v13 = vmul.f32 %v6464_v30, %v1213_v21 }
 0x354   :  { %v6518_v9 = vadd.f32 %v1512_v13, %v6441_v56  ;;  %1252 = vmatmul.bf16.gmra.mxu1 %v5587_v7  ;;  %v5596_v13 = vld [vmem:[#allocation2 + $0x1b8] sm:$0xff] }
 0x359   :  { %v1215_v37 = vpop.f32.mrf.mxu1 }
 0x35a   :  { %v1513_v62 = vmul.f32 %v6464_v30, %v1215_v37 }
 0x35c   :  { %v6522_v11 = vadd.f32 %v1513_v62, %v6449_v1 }
 0x361   :  { %v1218_v34 = vpop.f32.mrf.mxu1 }
 0x362   :  { %v1514_v10 = vmul.f32 %v6464_v30, %v1218_v34 }
 0x364   :  { %v6526_v49 = vadd.f32 %v1514_v10, %v6457_v19  ;;  %1257 = vmatmul.bf16.gmra.mxu1 %v5588_v22  ;;  %v6600_v10 = vperm.slane %v6323_v38, 6 }
 0x369   :  { %v1220_v24 = vpop.f32.mrf.mxu1 }
 0x36a   :  { %v1515_v25 = vmul.f32 %v6464_v30, %v1220_v24  ;;  %v5590_v30 = vld [vmem:[#allocation2 + $0x188] sm:$0xff]  ;;  %v5597_v24 = vld [vmem:[#allocation2 + $0x1c0] sm:$0xff] }
 0x36c   :  { %v6530_v56 = vadd.f32 %v1515_v25, %v6466_v26 }
 0x371   :  { %v1223_v1 = vpop.f32.mrf.mxu1 }
 0x372   :  { %v1533_v42 = vmul.f32 %v6533_v23, %v1223_v1 }
 0x374   :  { %v6537_v31 = vadd.f32 %v1533_v42, %v6470_v2  ;;  %1262 = vmatmul.bf16.gmra.mxu1 %v5589_v63 }
 0x379   :  { %v1225_v19 = vpop.f32.mrf.mxu1 }
 0x37a   :  { %v1534_v43 = vmul.f32 %v6533_v23, %v1225_v19 }
 0x37c   :  { %v6541_v44 = vadd.f32 %v1534_v43, %v6474_v41 }
 0x381   :  { %v1228_v26 = vpop.f32.mrf.mxu1 }
 0x382   :  { %v1535_v45 = vmul.f32 %v6533_v23, %v1228_v26 }
 0x384   :  { %v6545_v32 = vadd.f32 %v1535_v45, %v6478_v47  ;;  %1267 = vmatmul.bf16.gmra.mxu1 %v5590_v30  ;;  %v5599_v45 = vld [vmem:[#allocation2 + $0x1d0] sm:$0xff] }
 0x389   :  { %v1230_v51 = vpop.f32.mrf.mxu1 }
 0x38a   :  { %v1536_v14 = vmul.f32 %v6533_v23, %v1230_v51 }
 0x38c   :  { %v6549_v2 = vadd.f32 %v1536_v14, %v6482_v57 }
 0x391   :  { %v1233_v27 = vpop.f32.mrf.mxu1 }
 0x392   :  { %v1537_v48 = vmul.f32 %v6533_v23, %v1233_v27 }
 0x394   :  { %v6553_v41 = vadd.f32 %v1537_v48, %v6486_v12  ;;  %1272 = vmatmul.bf16.gmra.mxu1 %v5591_v46  ;;  %v5600_v48 = vld [vmem:[#allocation2 + $0x1d8] sm:$0xff] }
 0x399   :  { %v1235_v3 = vpop.f32.mrf.mxu1 }
 0x39a   :  { %v1538_v28 = vmul.f32 %v6533_v23, %v1235_v3 }
 0x39c   :  { %v6557_v47 = vadd.f32 %v1538_v28, %v6490_v39 }
 0x3a1   :  { %v1238_v50 = vpop.f32.mrf.mxu1 }
 0x3a2   :  { %v1539_v4 = vmul.f32 %v6533_v23, %v1238_v50 }
 0x3a4   :  { %v6561_v57 = vadd.f32 %v1539_v4, %v6494_v52  ;;  %1277 = vmatmul.bf16.gmra.mxu1 %v5592_v15  ;;  %v5601_v4 = vld [vmem:[#allocation2 + $0x1e0] sm:$0xff] }
 0x3a9   :  { %v1240_v16 = vpop.f32.mrf.mxu1 }
 0x3aa   :  { %v1540_v29 = vmul.f32 %v6533_v23, %v1240_v16 }
 0x3ac   :  { %v6565_v12 = vadd.f32 %v1540_v29, %v6498_v0 }
 0x3b1   :  { %v1243_v55 = vpop.f32.mrf.mxu1 }
 0x3b2   :  { %v1541_v33 = vmul.f32 %v6533_v23, %v1243_v55 }
 0x3b4   :  { %v6569_v39 = vadd.f32 %v1541_v33, %v6502_v18  ;;  %1282 = vmatmul.bf16.gmra.mxu1 %v5593_v54  ;;  %v5602_v33 = vld [vmem:[#allocation2 + $0x1e8] sm:$0xff] }
 0x3b9   :  { %v1245_v58 = vpop.f32.mrf.mxu1 }
 0x3ba   :  { %v1542_v17 = vmul.f32 %v6533_v23, %v1245_v58 }
 0x3bc   :  { %v6573_v52 = vadd.f32 %v1542_v17, %v6506_v40 }
 0x3c1   :  { %v1248_v59 = vpop.f32.mrf.mxu1 }
 0x3c2   :  { %v1543_v20 = vmul.f32 %v6533_v23, %v1248_v59 }
 0x3c4   :  { %v6577_v0 = vadd.f32 %v1543_v20, %v6510_v53  ;;  %1287 = vmatmul.bf16.gmra.mxu1 %v5594_v5  ;;  %v5603_v20 = vld [vmem:[#allocation2 + $0x1f0] sm:$0xff] }
 0x3c9   :  { %v1250_v35 = vpop.f32.mrf.mxu1 }
 0x3ca   :  { %v1544_v8 = vmul.f32 %v6533_v23, %v1250_v35 }
 0x3cc   :  { %v6581_v18 = vadd.f32 %v1544_v8, %v6514_v60 }
 0x3d1   :  { %v1253_v36 = vpop.f32.mrf.mxu1 }
 0x3d2   :  { %v1545_v61 = vmul.f32 %v6533_v23, %v1253_v36 }
 0x3d4   :  { %v6585_v40 = vadd.f32 %v1545_v61, %v6518_v9  ;;  %1292 = vmatmul.bf16.gmra.mxu1 %v5595_v6  ;;  %v5604_v61 = vld [vmem:[#allocation2 + $0x1f8] sm:$0xff] }
 0x3d9   :  { %v1255_v7 = vpop.f32.mrf.mxu1 }
 0x3da   :  { %v1546_v21 = vmul.f32 %v6533_v23, %v1255_v7 }
 0x3dc   :  { %v6589_v53 = vadd.f32 %v1546_v21, %v6522_v11 }
 0x3e1   :  { %v1258_v37 = vpop.f32.mrf.mxu1 }
 0x3e2   :  { %v1547_v62 = vmul.f32 %v6533_v23, %v1258_v37 }
 0x3e4   :  { %v6593_v60 = vadd.f32 %v1547_v62, %v6526_v49  ;;  %1297 = vmatmul.bf16.gmra.mxu1 %v5596_v13  ;;  %v6667_v62 = vperm.slane %v6323_v38, 7 }
 0x3e9   :  { %v1260_v22 = vpop.f32.mrf.mxu1 }
 0x3ea   :  { %v1548_v34 = vmul.f32 %v6533_v23, %v1260_v22  ;;  %v5598_v23 = vld [vmem:[#allocation2 + $0x1c8] sm:$0xff]  ;;  %v5605_v22 = vld [vmem:[#allocation2 + $0x200] sm:$0xff] }
 0x3ec   :  { %v6597_v9 = vadd.f32 %v1548_v34, %v6530_v56 }
 0x3f1   :  { %v1263_v11 = vpop.f32.mrf.mxu1 }
 0x3f2   :  { %v1566_v25 = vmul.f32 %v6600_v10, %v1263_v11 }
 0x3f4   :  { %v6604_v63 = vadd.f32 %v1566_v25, %v6537_v31  ;;  %1302 = vmatmul.bf16.gmra.mxu1 %v5597_v24 }
 0x3f9   :  { %v1265_v49 = vpop.f32.mrf.mxu1 }
 0x3fa   :  { %v1567_v1 = vmul.f32 %v6600_v10, %v1265_v49 }
 0x3fc   :  { %v6608_v42 = vadd.f32 %v1567_v1, %v6541_v44 }
 0x401   :  { %v1268_v56 = vpop.f32.mrf.mxu1 }
 0x402   :  { %v1568_v19 = vmul.f32 %v6600_v10, %v1268_v56  ;;  %v5607_v56 = vld [vmem:[#allocation2 + $0x210] sm:$0xff] }
 0x404   :  { %v6612_v43 = vadd.f32 %v1568_v19, %v6545_v32  ;;  %1307 = vmatmul.bf16.gmra.mxu1 %v5598_v23 }
 0x409   :  { %v1270_v30 = vpop.f32.mrf.mxu1 }
 0x40a   :  { %v1569_v26 = vmul.f32 %v6600_v10, %v1270_v30 }
 0x40c   :  { %v6616_v31 = vadd.f32 %v1569_v26, %v6549_v2 }
 0x411   :  { %v1273_v51 = vpop.f32.mrf.mxu1 }
 0x412   :  { %v1570_v14 = vmul.f32 %v6600_v10, %v1273_v51 }
 0x414   :  { %v6620_v44 = vadd.f32 %v1570_v14, %v6553_v41  ;;  %1312 = vmatmul.bf16.gmra.mxu1 %v5599_v45  ;;  %v5608_v14 = vld [vmem:[#allocation2 + $0x218] sm:$0xff] }
 0x419   :  { %v1275_v46 = vpop.f32.mrf.mxu1 }
 0x41a   :  { %v1571_v27 = vmul.f32 %v6600_v10, %v1275_v46 }
 0x41c   :  { %v6624_v32 = vadd.f32 %v1571_v27, %v6557_v47 }
 0x421   :  { %v1278_v3 = vpop.f32.mrf.mxu1 }
 0x422   :  { %v1572_v28 = vmul.f32 %v6600_v10, %v1278_v3 }
 0x424   :  { %v6628_v2 = vadd.f32 %v1572_v28, %v6561_v57  ;;  %1317 = vmatmul.bf16.gmra.mxu1 %v5600_v48  ;;  %v5609_v28 = vld [vmem:[#allocation2 + $0x220] sm:$0xff] }
 0x429   :  { %v1280_v15 = vpop.f32.mrf.mxu1 }
 0x42a   :  { %v1573_v50 = vmul.f32 %v6600_v10, %v1280_v15 }
 0x42c   :  { %v6632_v41 = vadd.f32 %v1573_v50, %v6565_v12 }
 0x431   :  { %v1283_v16 = vpop.f32.mrf.mxu1 }
 0x432   :  { %v1574_v29 = vmul.f32 %v6600_v10, %v1283_v16 }
 0x434   :  { %v6636_v47 = vadd.f32 %v1574_v29, %v6569_v39  ;;  %1322 = vmatmul.bf16.gmra.mxu1 %v5601_v4 }
 0x439   :  { %v1285_v54 = vpop.f32.mrf.mxu1 }
 0x43a   :  { %v1575_v55 = vmul.f32 %v6600_v10, %v1285_v54 }
 0x43c   :  { %v6640_v57 = vadd.f32 %v1575_v55, %v6573_v52 }
 0x441   :  { %v1288_v58 = vpop.f32.mrf.mxu1 }
 0x442   :  { %v1576_v17 = vmul.f32 %v6600_v10, %v1288_v58  ;;  %v5611_v58 = vld [vmem:[#allocation2 + $0x230] sm:$0xff] }
 0x444   :  { %v6644_v12 = vadd.f32 %v1576_v17, %v6577_v0  ;;  %1327 = vmatmul.bf16.gmra.mxu1 %v5602_v33 }
 0x449   :  { %v1290_v5 = vpop.f32.mrf.mxu1 }
 0x44a   :  { %v1577_v59 = vmul.f32 %v6600_v10, %v1290_v5 }
 0x44c   :  { %v6648_v39 = vadd.f32 %v1577_v59, %v6581_v18 }
 0x451   :  { %v1293_v35 = vpop.f32.mrf.mxu1 }
 0x452   :  { %v1578_v8 = vmul.f32 %v6600_v10, %v1293_v35  ;;  %v5612_v35 = vld [vmem:[#allocation2 + $0x238] sm:$0xff] }
 0x454   :  { %v6652_v52 = vadd.f32 %v1578_v8, %v6585_v40  ;;  %1332 = vmatmul.bf16.gmra.mxu1 %v5603_v20 }
 0x459   :  { %v1295_v6 = vpop.f32.mrf.mxu1 }
 0x45a   :  { %v1579_v36 = vmul.f32 %v6600_v10, %v1295_v6 }
 0x45c   :  { %v6656_v0 = vadd.f32 %v1579_v36, %v6589_v53 }
 0x461   :  { %v1298_v7 = vpop.f32.mrf.mxu1 }
 0x462   :  { %v1580_v21 = vmul.f32 %v6600_v10, %v1298_v7 }
 0x464   :  { %v6660_v18 = vadd.f32 %v1580_v21, %v6593_v60  ;;  %1337 = vmatmul.bf16.gmra.mxu1 %v5604_v61  ;;  %v5781_v21 = vld [vmem:[%s5982_s14 + $0x8] ss:$0 sm:$0xff]  ;;  %s7590_s14 = sld [smem:[#allocation17_spill]] }
 0x469   :  { %v1300_v13 = vpop.f32.mrf.mxu1 }
 0x46a   :  { %v1581_v37 = vmul.f32 %v6600_v10, %v1300_v13  ;;  %v5606_v10 = vld [vmem:[#allocation2 + $0x208] sm:$0xff] }
 0x46c   :  { %v6664_v40 = vadd.f32 %v1581_v37, %v6597_v9 }
 0x471   :  { %v1303_v53 = vpop.f32.mrf.mxu1 }
 0x472   :  { %v1599_v34 = vmul.f32 %v6667_v62, %v1303_v53 }
 0x474   :  { %v6671_v24 = vadd.f32 %v1599_v34, %v6604_v63  ;;  %1342 = vmatmul.bf16.gmra.mxu1 %v5605_v22 }
 0x479   :  { %v1305_v60 = vpop.f32.mrf.mxu1 }
 0x47a   :  { %v1600_v11 = vmul.f32 %v6667_v62, %v1305_v60 }
 0x47c   :  { %v6675_v25 = vadd.f32 %v1600_v11, %v6608_v42 }
 0x481   :  { %v1308_v9 = vpop.f32.mrf.mxu1 }
 0x482   :  { %v1601_v49 = vmul.f32 %v6667_v62, %v1308_v9 }
 0x484   :  { %v1617_v38 = vadd.f32 %v1601_v49, %v6612_v43  ;;  %1347 = vmatmul.bf16.gmra.mxu1 %v5606_v10 }
 0x489   :  { %v1310_v1 = vpop.f32.mrf.mxu1 }
 0x48a   :  { %v1602_v23 = vmul.f32 %v6667_v62, %v1310_v1 }
 0x48c   :  { %v1618_v63 = vadd.f32 %v1602_v23, %v6616_v31 }
 0x491   :  { %v1313_v19 = vpop.f32.mrf.mxu1 }
 0x492   :  { %v1603_v30 = vmul.f32 %v6667_v62, %v1313_v19 }
 0x494   :  { %v1619_v26 = vadd.f32 %v1603_v30, %v6620_v44  ;;  %1352 = vmatmul.bf16.gmra.mxu1 %v5607_v56 }
 0x499   :  { %v1315_v42 = vpop.f32.mrf.mxu1 }
 0x49a   :  { %v1604_v45 = vmul.f32 %v6667_v62, %v1315_v42 }
 0x49c   :  { %v1620_v51 = vadd.f32 %v1604_v45, %v6624_v32 }
 0x4a1   :  { %v1318_v43 = vpop.f32.mrf.mxu1 }
 0x4a2   :  { %v1605_v46 = vmul.f32 %v6667_v62, %v1318_v43 }
 0x4a4   :  { %v1621_v27 = vadd.f32 %v1605_v46, %v6628_v2  ;;  %1357 = vmatmul.bf16.gmra.mxu1 %v5608_v14  ;;  %v5610_v2 = vld [vmem:[#allocation2 + $0x228] sm:$0xff] }
 0x4a9   :  { %v1320_v31 = vpop.f32.mrf.mxu1 }
 0x4aa   :  { %v1606_v48 = vmul.f32 %v6667_v62, %v1320_v31 }
 0x4ac   :  { %v1622_v3 = vadd.f32 %v1606_v48, %v6632_v41 }
 0x4b1   :  { %v1323_v44 = vpop.f32.mrf.mxu1 }
 0x4b2   :  { %v1607_v15 = vmul.f32 %v6667_v62, %v1323_v44 }
 0x4b4   :  { %v1623_v50 = vadd.f32 %v1607_v15, %v6636_v47  ;;  %1362 = vmatmul.bf16.gmra.mxu1 %v5609_v28 }
 0x4b9   :  { %v1325_v32 = vpop.f32.mrf.mxu1 }
 0x4ba   :  { %v1608_v4 = vmul.f32 %v6667_v62, %v1325_v32 }
 0x4bc   :  { %v6693_v16 = vadd.f32 %v1608_v4, %v6640_v57 }
 0x4c1   :  { %v1328_v29 = vpop.f32.mrf.mxu1 }
 0x4c2   :  { %v1609_v54 = vmul.f32 %v6667_v62, %v1328_v29 }
 0x4c4   :  { %v6697_v55 = vadd.f32 %v1609_v54, %v6644_v12  ;;  %1367 = vmatmul.bf16.gmra.mxu1 %v5610_v2  ;;  %v5782_v54 = vld [vmem:[%s5987_s19] ss:$0 sm:$0xff]  ;;  %s7591_s19 = sld [smem:[#allocation8_spill]] }
 0x4c9   :  { %v1330_v41 = vpop.f32.mrf.mxu1 }
 0x4ca   :  { %v1610_v33 = vmul.f32 %v6667_v62, %v1330_v41 }
 0x4cc   :  { %v6701_v47 = vadd.f32 %v1610_v33, %v6648_v39 }
 0x4d1   :  { %v1333_v17 = vpop.f32.mrf.mxu1 }
 0x4d2   :  { %v1611_v57 = vmul.f32 %v6667_v62, %v1333_v17 }
 0x4d4   :  { %v1627_v5 = vadd.f32 %v1611_v57, %v6652_v52  ;;  %1372 = vmatmul.bf16.gmra.mxu1 %v5611_v58 }
 0x4d9   :  { %v1335_v59 = vpop.f32.mrf.mxu1 }
 0x4da   :  { %v1612_v20 = vmul.f32 %v6667_v62, %v1335_v59 }
 0x4dc   :  { %v1628_v12 = vadd.f32 %v1612_v20, %v6656_v0 }
 0x4e1   :  { %v1338_v8 = vpop.f32.mrf.mxu1 }
 0x4e2   :  { %v1613_v6 = vmul.f32 %v6667_v62, %v1338_v8 }
 0x4e4   :  { %v1629_v39 = vadd.f32 %v1613_v6, %v6660_v18  ;;  %1377 = vmatmul.bf16.gmra.mxu1 %v5612_v35 }
 0x4e9   :  { %v1340_v36 = vpop.f32.mrf.mxu1 }
 0x4ea   :  { %v1614_v61 = vmul.f32 %v6667_v62, %v1340_v36 }
 0x4ec   :  { %v1630_v7 = vadd.f32 %v1614_v61, %v6664_v40 }
 0x4f1   :  { %v1343_v52 = vpop.f32.mrf.mxu1 }
 0x4f2   :  { %v1632_v13 = vmul.f32 %v5781_v21, %v1343_v52 }
 0x4f4   :  { %v6713_v37 = vadd.f32 %v1632_v13, %v6671_v24 }
 0x4f9   :  { %v1345_v22 = vpop.f32.mrf.mxu1 }
 0x4fa   :  { %v1633_v0 = vmul.f32 %v5781_v21, %v1345_v22 }
 0x4fc   :  { %v6716_v53 = vadd.f32 %v1633_v0, %v6675_v25 }
 0x501   :  { %v1348_v34 = vpop.f32.mrf.mxu1 }
 0x502   :  { %v1634_v60 = vmul.f32 %v5781_v21, %v1348_v34 }
 0x504   :  { %v6718_v18 = vadd.f32 %v1634_v60, %v1617_v38 }
 0x509   :  { %v1350_v11 = vpop.f32.mrf.mxu1 }
 0x50a   :  { %v1635_v10 = vmul.f32 %v5781_v21, %v1350_v11 }
 0x50c   :  { %v6720_v62 = vadd.f32 %v1635_v10, %v1618_v63 }
 0x511   :  { %v1353_v40 = vpop.f32.mrf.mxu1 }
 0x512   :  { %v1636_v9 = vmul.f32 %v5781_v21, %v1353_v40 }
 0x514   :  { %v6722_v49 = vadd.f32 %v1636_v9, %v1619_v26 }
 0x519   :  { %v1355_v1 = vpop.f32.mrf.mxu1 }
 0x51a   :  { %v1637_v24 = vmul.f32 %v5781_v21, %v1355_v1  ;;  %v6777_v1 = vadd.f32 %v5782_v54, %v6722_v49 }
 0x51c   :  { %v1653_v23 = vadd.f32 %v1637_v24, %v1620_v51 }
 0x51e   :  { %v6773_v40 = vadd.f32 %v5782_v54, %v1653_v23  ;;  %v1687_v23 = vmax.f32 %v6777_v1, 0.0 }
 0x521   :  { %v1358_v56 = vpop.f32.mrf.mxu1 }
 0x522   :  { %v1638_v19 = vmul.f32 %v5781_v21, %v1358_v56  ;;  %v1688_v56 = vmax.f32 %v6773_v40, 0.0 }
 0x524   :  { %v1654_v30 = vadd.f32 %v1638_v19, %v1621_v27  ;;  %v6785_v19 = vadd.f32 %v5782_v54, %v6720_v62  ;;  %v1701_v49 = vpack.c.bf16 %v1688_v56, %v1687_v23 }
 0x526   :  { %v6766_v60 = vadd.f32 %v5782_v54, %v1654_v30  ;;  %v6789_v30 = vadd.f32 %v5782_v54, %v6718_v18 }
 0x528   :  { %v1689_v9 = vmax.f32 %v6766_v60, 0.0  ;;  %v1685_v62 = vmax.f32 %v6789_v30, 0.0 }
 0x529   :  { %v1360_v25 = vpop.f32.mrf.mxu1 }
 0x52a   :  { %v1639_v42 = vmul.f32 %v5781_v21, %v1360_v25  ;;  %v1686_v25 = vmax.f32 %v6785_v19, 0.0 }
 0x52c   :  { %v1655_v45 = vadd.f32 %v1639_v42, %v1622_v3  ;;  %v6797_v42 = vadd.f32 %v5782_v54, %v6716_v53  ;;  %v1700_v18 = vpack.c.bf16 %v1686_v25, %v1685_v62 }
 0x52e   :  { %v6763_v0 = vadd.f32 %v5782_v54, %v1655_v45  ;;  %v6801_v45 = vadd.f32 %v5782_v54, %v6713_v37  ;;  %v220_v37 = vld [vmem:[%s5942_s9] sm:$0x1]  ;;  %s7584_s9 = sld [smem:[#allocation10_spill]] }
 0x530   :  { %v1690_v10 = vmax.f32 %v6763_v0, 0.0 }
 0x531   :  { %v1363_v14 = vpop.f32.mrf.mxu1 }
 0x532   :  { %v1640_v38 = vmul.f32 %v5781_v21, %v1363_v14  ;;  %v1702_v24 = vpack.c.bf16 %v1690_v10, %v1689_v9  ;;  %v1684_v14 = vmax.f32 %v6797_v42, 0.0 }
 0x534   :  { %v1656_v43 = vadd.f32 %v1640_v38, %v1623_v50  ;;  %v1683_v38 = vmax.f32 %v6801_v45, 0.0 }
 0x536   :  { %v6756_v52 = vadd.f32 %v5782_v54, %v1656_v43  ;;  %v1699_v53 = vpack.c.bf16 %v1684_v14, %v1683_v38  ;;  %v5613_v43 = vld [vmem:[%s5992_s24] sm:$0xff]  ;;  %s7592_s24 = sld [smem:[#allocation18_spill]] }
 0x538   :  { %v1691_v34 = vmax.f32 %v6756_v52, 0.0 }
 0x539   :  { %v1365_v46 = vpop.f32.mrf.mxu1 }
 0x53a   :  { %v1641_v50 = vmul.f32 %v5781_v21, %v1365_v46 }
 0x541   :  { %v1368_v63 = vpop.f32.mrf.mxu1 }
 0x542   :  { %v1642_v3 = vmul.f32 %v5781_v21, %v1368_v63 }
 0x544   :  { %v1658_v20 = vadd.f32 %v1642_v3, %v6697_v55 }
 0x546   :  { %v6746_v36 = vadd.f32 %v5782_v54, %v1658_v20 }
 0x549   :  { %v1370_v31 = vpop.f32.mrf.mxu1 }
 0x54a   :  { %v1643_v2 = vmul.f32 %v5781_v21, %v1370_v31 }
 0x54c   :  { %v1659_v17 = vadd.f32 %v1643_v2, %v6701_v47  ;;  %v5784_v2 = vld [vmem:[%s6007_s12] ss:$0 sm:$0xff]  ;;  %s7595_s12 = sld [smem:[#allocation21_spill]] }
 0x551   :  { %v1373_v48 = vpop.f32.mrf.mxu1 }
 0x552   :  { %v1644_v32 = vmul.f32 %v5781_v21, %v1373_v48  ;;  %v414_v48 = vld [vmem:[%s6002_s6] sm:$0x3]  ;;  %s7594_s6 = sld [smem:[#allocation19_spill]] }
 0x554   :  { %v1660_v41 = vadd.f32 %v1644_v32, %v1627_v5  ;;  %v1657_v5 = vadd.f32 %v1641_v50, %v6693_v16 }
 0x556   :  { %v6735_v8 = vadd.f32 %v5782_v54, %v1660_v41 }
 0x558   :  { %v1695_v55 = vmax.f32 %v6735_v8, 0.0 }
 0x559   :  { %v1375_v28 = vpop.f32.mrf.mxu1 }
 0x55a   :  { %v1645_v15 = vmul.f32 %v5781_v21, %v1375_v28  ;;  %v1758_v28 = vsel %vm1756_vm4, %v414_v48, 0  ;;  %v5534_v48 = vld [vmem:[%s5947_s13 + $0x28] sm:$0xff] }
 0x55c   :  { %v1661_v27 = vadd.f32 %v1645_v15, %v1628_v12 }
 0x55e   :  { %v6730_v59 = vadd.f32 %v5782_v54, %v1661_v27 }
 0x560   :  { %v1696_v47 = vmax.f32 %v6730_v59, 0.0 }
 0x561   :  { %v1378_v26 = vpop.f32.mrf.mxu1 }
 0x562   :  { %v1646_v44 = vmul.f32 %v5781_v21, %v1378_v26  ;;  %v1705_v61 = vpack.c.bf16 %v1696_v47, %v1695_v55  ;;  %v5783_v26 = vld [vmem:[%s5997_s30] ss:$0 sm:$0xff]  ;;  %s7593_s30 = sld [smem:[#allocation20_spill]] }
 0x564   :  { %v1662_v51 = vadd.f32 %v1646_v44, %v1629_v39  ;;  %v6743_v39 = vadd.f32 %v5782_v54, %v1659_v17 }
 0x566   :  { %v6725_v58 = vadd.f32 %v5782_v54, %v1662_v51  ;;  %v1694_v16 = vmax.f32 %v6743_v39, 0.0  ;;  %v2054_v39 = vld [vmem:[%s7583_s5 + $0x10] sm:$0xff] }
 0x568   :  { %v1697_v35 = vmax.f32 %v6725_v58, 0.0 }
 0x569   :  { %v1380_v4 = vpop.f32.mrf.mxu1 }
 0x56a   :  { %v1647_v29 = vmul.f32 %v5781_v21, %v1380_v4  ;;  %v1693_v21 = vmax.f32 %v6746_v36, 0.0 }
 0x56c   :  { %v1663_v33 = vadd.f32 %v1647_v29, %v1630_v7  ;;  %v6753_v7 = vadd.f32 %v5782_v54, %v1657_v5  ;;  %v1704_v13 = vpack.c.bf16 %v1694_v16, %v1693_v21 }
 0x56e   :  { %v6728_v57 = vadd.f32 %v5782_v54, %v1663_v33  ;;  %v1692_v22 = vmax.f32 %v6753_v7, 0.0 }
 0x570   :  { %v1698_v12 = vmax.f32 %v6728_v57, 0.0  ;;  %v1703_v11 = vpack.c.bf16 %v1692_v22, %v1691_v34 }
 0x572   :  { %v1706_v6 = vpack.c.bf16 %v1698_v12, %v1697_v35 }
 0x574   :  { %1707 = vmatpush.bf16.msrb.mxu3 %v1706_v6 }
 0x578   :  { %1708 = vmatpush.bf16.msrb.mxu3 %v1705_v61 }
 0x57c   :  { %1709 = vmatpush.bf16.msrb.mxu3 %v1704_v13 }
 0x580   :  { %1710 = vmatpush.bf16.msrb.mxu3 %v1703_v11 }
 0x584   :  { %1711 = vmatpush.bf16.msrb.mxu3 %v1702_v24 }
 0x588   :  { %1712 = vmatpush.bf16.msrb.mxu3 %v1701_v49 }
 0x58c   :  { %1713 = vmatpush.bf16.msrb.mxu3 %v1700_v18 }
 0x590   :  { %1714 = vmatpush.bf16.msrb.mxu3 %v1699_v53 }
 0x593   :  { %1715 = vmatmul.bf16.vlgmr.msrb.gmra.mxu3 %v220_v37  ;;  %v5529_v37 = vld [vmem:[%s5947_s13] sm:$0xff] }
 0x594   :  { %1741 = vmatpush.bf16.msra.mxu3 %v5613_v43  ;;  %v5530_v43 = vld [vmem:[%s5947_s13 + $0x8] sm:$0xff] }
 0x598   :  { %1767 = vmatpush.bf16.msrb.mxu3 %v1758_v28  ;;  %v5535_v28 = vld [vmem:[%s5947_s13 + $0x30] sm:$0xff] }
 0x616   :  { %v1716_v46 = vpop.f32.mrf.mxu3 }
 0x617   :  { %v1720_v63 = vpack.c.bf16 %v1716_v46, %v1716_v46  ;;  %v5531_v46 = vld [vmem:[%s5947_s13 + $0x10] sm:$0xff] }
 0x619   :  { %4980 = vmatmul.msk.bf16.vlgmr.msra.gmra.mxu3 %vm1730_vm3, %v1720_v63  ;;  %v5532_v63 = vld [vmem:[%s5947_s13 + $0x18] sm:$0xff] }
 0x61e   :  { %v1718_v31 = vpop.f32.mrf.mxu3 }
 0x61f   :  { %v5533_v31 = vld [vmem:[%s5947_s13 + $0x20] sm:$0xff] }
 0x69c   :  { %v1743_v44 = vpop.f32.mrf.mxu3 }
 0x69d   :  { %v1744_v15 = vadd.f32 %v5783_v26, %v1743_v44  ;;  %v5614_v26 = vld [vmem:[%s6012_s20] sm:$0xff]  ;;  %v5536_v44 = vld [vmem:[%s5947_s13 + $0x38] sm:$0xff]  ;;  %s7585_s13 = sld [smem:[#allocation11_spill]] }
 0x69e   :  { %1972 = vmatpush.bf16.msra.mxu2 %v5614_v26  ;;  %s7596_s20 = sld [smem:[#allocation9_spill]] }
 0x69f   :  { %v1747_v32 = vmax.f32 %v1744_v15, 0.0 }
 0x6a1   :  { %v1748_v51 = vpack.c.bf16 %v1747_v32, %v1747_v32 }
 0x6a3   :  { %4981 = vmatmul.msk.bf16.vlgmr.msrb.gmra.mxu3 %vm1752_vm5, %v1748_v51 }
 0x6a4   :  { %v1745_v4 = vpop.f32.mrf.mxu3 }
 0x726   :  { %v1769_v27 = vpop.f32.mrf.mxu3 }
 0x727   :  { %v1770_v29 = vadd.f32 %v5784_v2, %v1769_v27 }
 0x729   :  { %v4982_v54 = vmul.f32 -1.442695, %v1770_v29 }
 0x72b   :  { %5800 = vpow2.f32 %v4982_v54 }
 0x72e   :  { %v1771_v3 = vpop.f32.mrf.mxu3 }
 0x731   :  { %v5801_v41 = vpop.eup %5800 }
 0x732   :  { %v1776_v33 = vadd.f32 1.0, %v5801_v41 }
 0x734   :  { %5802 = vrcp.f32 %v1776_v33  ;;  %v1788_v5 = vand.u32 2147483648, %v1776_v33  ;;  %v1786_v61 = vand.u32 2147483647, %v1776_v33  ;;  %vm1782_vm7 = vweird.f32 %v1776_v33 }
 0x736   :  { %v1789_v11 = vor.u32 1.1754944e-38, %v1788_v5  ;;  %vm1787_vm9 = vcmp.eq.f32.partialorder %v1786_v61, 8.507059e+37 }
 0x73a   :  { %v5803_v50 = vpop.eup %5802 }
 0x73b   :  { %v1778_v17 = vmul.f32 %v5803_v50, %v1776_v33  ;;  %vm1783_vm6 = vweird.f32 %v5803_v50 }
 0x73c   :  { %vm1784_vm8 = vmor %vm1782_vm7, %vm1783_vm6 }
 0x73d   :  { %v1779_v20 = vsub.f32 1.0, %v1778_v17 }
 0x73f   :  { %v1780_v6 = vmul.f32 %v5803_v50, %v1779_v20 }
 0x741   :  { %v1781_v13 = vadd.f32 %v5803_v50, %v1780_v6 }
 0x743   :  { %v1785_v24 = vsel %vm1784_vm8, %v5803_v50, %v1781_v13 }
 0x744   :  { %v1790_v49 = vsel %vm1787_vm9, %v1789_v11, %v1785_v24  ;;  %v5037_v11 = vld [vmem:[%s7583_s5] sm:$0xf]  ;;  %v5616_v24 = vld [vmem:[%s7583_s5 + $0x4] sm:$0xf0]  ;;  %vm4213_vm9 = vcmask 392192  }
 0x745   :  { %v1792_v18 = vpack.c.bf16 %v1790_v49, %v1790_v49  ;;  %v5615_v49 = vld [vmem:[%s7583_s5 + $0x4] sm:$0xf] }
 0x747   :  { %v1860_v53 = vsel %vm1858_vm10, %v1792_v18, 0  ;;  %v5038_v18 = vor.u32 %v5616_v24, %v5037_v11 }
 0x748   :  { %1869 = vmatpush.bf16.msra.mxu3 %v1860_v53  ;;  %v5039_v53 = vld [vmem:[%s7583_s5 + $0x8] sm:$0xf0]  ;;  %s7610_s5 = sld [smem:[#allocation35_spill]] }
 0x74b   :  { %5015 = vmatmul.msk.bf16.vlgmr.msra.gmra.mxu3 %vm1833_vm11, %v5529_v37 }
 0x75b   :  { %5016 = vmatmul.msk.bf16.gmra.mxu3 %vm1833_vm11, %v5530_v43  ;;  %v5042_v43 = vor.u32 %v5615_v49, %v5039_v53 }
 0x76b   :  { %5017 = vmatmul.msk.bf16.gmra.mxu3 %vm1833_vm11, %v5531_v46 }
 0x77b   :  { %5018 = vmatmul.msk.bf16.gmra.mxu3 %vm1833_vm11, %v5532_v63  ;;  %v6884_v63 = vld [vmem:[%s7584_s9] ss:$0 sm:$0xff]  ;;  %s7611_s9 = sld [smem:[#allocation38_spill]] }
 0x78b   :  { %5019 = vmatmul.msk.bf16.gmra.mxu3 %vm1833_vm11, %v5533_v31 }
 0x79b   :  { %5020 = vmatmul.msk.bf16.gmra.mxu3 %vm1833_vm11, %v5534_v48 }
 0x7ab   :  { %5021 = vmatmul.msk.bf16.gmra.mxu3 %vm1833_vm11, %v5535_v28 }
 0x7bb   :  { %5022 = vmatmul.msk.bf16.gmra.mxu3 %vm1833_vm11, %v5536_v44 }
 0x7ce   :  { %v1871_v15 = vpop.f32.mrf.mxu3 }
 0x7cf   :  { %v1911_v51 = vmul.f32 %v1871_v15, %v1683_v38 }
 0x7d6   :  { %v1873_v32 = vpop.f32.mrf.mxu3 }
 0x7d7   :  { %v1912_v4 = vmul.f32 %v1873_v32, %v1684_v14 }
 0x7d9   :  { %v1927_v2 = vpack.c.bf16 %v1912_v4, %v1911_v51 }
 0x7db   :  { %5027 = vmatmul.msk.bf16.vlgmr.msra.gmra.mxu2 %vm1730_vm3, %v1927_v2 }
 0x7de   :  { %v1876_v27 = vpop.f32.mrf.mxu3 }
 0x7df   :  { %v1913_v54 = vmul.f32 %v1876_v27, %v1685_v62 }
 0x7e6   :  { %v1878_v29 = vpop.f32.mrf.mxu3 }
 0x7e7   :  { %v1914_v3 = vmul.f32 %v1878_v29, %v1686_v25 }
 0x7e9   :  { %v1928_v41 = vpack.c.bf16 %v1914_v3, %v1913_v54 }
 0x7eb   :  { %5028 = vmatmul.msk.bf16.gmra.mxu2 %vm1730_vm3, %v1928_v41 }
 0x7ee   :  { %v1881_v33 = vpop.f32.mrf.mxu3 }
 0x7ef   :  { %v1915_v42 = vmul.f32 %v1881_v33, %v1687_v23 }
 0x7f6   :  { %v1883_v45 = vpop.f32.mrf.mxu3 }
 0x7f7   :  { %v1916_v14 = vmul.f32 %v1883_v45, %v1688_v56 }
 0x7f9   :  { %v1929_v38 = vpack.c.bf16 %v1916_v14, %v1915_v42 }
 0x7fb   :  { %5029 = vmatmul.msk.bf16.gmra.mxu2 %vm1730_vm3, %v1929_v38 }
 0x7fe   :  { %v1886_v50 = vpop.f32.mrf.mxu3 }
 0x7ff   :  { %v1917_v19 = vmul.f32 %v1886_v50, %v1689_v9 }
 0x806   :  { %v1888_v30 = vpop.f32.mrf.mxu3 }
 0x807   :  { %v1918_v25 = vmul.f32 %v1888_v30, %v1690_v10 }
 0x809   :  { %v1930_v62 = vpack.c.bf16 %v1918_v25, %v1917_v19 }
 0x80b   :  { %5030 = vmatmul.msk.bf16.gmra.mxu2 %vm1730_vm3, %v1930_v62 }
 0x80e   :  { %v1891_v17 = vpop.f32.mrf.mxu3 }
 0x80f   :  { %v1919_v40 = vmul.f32 %v1891_v17, %v1691_v34 }
 0x816   :  { %v1893_v1 = vpop.f32.mrf.mxu3 }
 0x817   :  { %v1920_v56 = vmul.f32 %v1893_v1, %v1692_v22 }
 0x819   :  { %v1931_v23 = vpack.c.bf16 %v1920_v56, %v1919_v40 }
 0x81b   :  { %5031 = vmatmul.msk.bf16.gmra.mxu2 %vm1730_vm3, %v1931_v23 }
 0x81e   :  { %v1896_v60 = vpop.f32.mrf.mxu3 }
 0x81f   :  { %v1921_v0 = vmul.f32 %v1896_v60, %v1693_v21  ;;  %v2159_v21 = vunpack.c.h.b16 %v2054_v39 }
 0x821   :  { %v2163_v61 = vpack.c.b16 %v2159_v21, %v2159_v21 }
 0x823   :  { %v2196_v8 = vsel %vm2191_vm12, %v2163_v61, 0 }
 0x824   :  { %2253 = vmatpush.bf16.msrb.mxu3 %v2196_v8 }
 0x826   :  { %v1898_v9 = vpop.f32.mrf.mxu3 }
 0x827   :  { %v1922_v10 = vmul.f32 %v1898_v9, %v1694_v16  ;;  %v2158_v16 = vunpack.c.l.b16 %v2054_v39 }
 0x828   :  { %2254 = vmatpush.bf16.msrb.mxu3 %v5042_v43 }
 0x829   :  { %v1932_v20 = vpack.c.bf16 %v1922_v10, %v1921_v0  ;;  %v2162_v6 = vpack.c.b16 %v2158_v16, %v2158_v16 }
 0x82b   :  { %5032 = vmatmul.msk.bf16.gmra.mxu2 %vm1730_vm3, %v1932_v20  ;;  %v2193_v13 = vsel %vm2191_vm12, %v2162_v6, 0 }
 0x82c   :  { %2204 = vmatpush.bf16.msrb.mxu2 %v2193_v13 }
 0x82e   :  { %v1901_v52 = vpop.f32.mrf.mxu3 }
 0x82f   :  { %v1923_v7 = vmul.f32 %v1901_v52, %v1695_v55 }
 0x830   :  { %2205 = vmatpush.bf16.msrb.mxu2 %v5038_v18 }
 0x836   :  { %v1903_v34 = vpop.f32.mrf.mxu3 }
 0x837   :  { %v1924_v22 = vmul.f32 %v1903_v34, %v1696_v47 }
 0x839   :  { %v1933_v5 = vpack.c.bf16 %v1924_v22, %v1923_v7 }
 0x83b   :  { %5033 = vmatmul.msk.bf16.gmra.mxu2 %vm1730_vm3, %v1933_v5 }
 0x83e   :  { %v1906_v36 = vpop.f32.mrf.mxu3 }
 0x83f   :  { %v1925_v59 = vmul.f32 %v1906_v36, %v1697_v35  ;;  %v6888_v35 = vld [vmem:[%s7585_s13] ss:$0 sm:$0xff]  ;;  %s7612_s13 = sld [smem:[#allocation36_spill]] }
 0x846   :  { %v1908_v55 = vpop.f32.mrf.mxu3 }
 0x847   :  { %v1926_v47 = vmul.f32 %v1908_v55, %v1698_v12 }
 0x849   :  { %v1934_v37 = vpack.c.bf16 %v1926_v47, %v1925_v59 }
 0x84b   :  { %5034 = vmatmul.msk.bf16.gmra.mxu2 %vm1730_vm3, %v1934_v37 }
 0x85e   :  { %v1974_v46 = vpop.f32.mrf.mxu2 }
 0x85f   :  { %v2017_v58 = vmul.f32 %v6884_v63, %v1974_v46 }
 0x861   :  { %v2036_v31 = vadd.f32 %v6888_v35, %v2017_v58 }
 0x866   :  { %v1976_v57 = vpop.f32.mrf.mxu2 }
 0x867   :  { %v2018_v12 = vmul.f32 %v6884_v63, %v1976_v57 }
 0x869   :  { %v2037_v48 = vadd.f32 %v6888_v35, %v2018_v12 }
 0x86b   :  { %v2143_v28 = vpack.c.bf16 %v2037_v48, %v2036_v31 }
 0x86d   :  { %5043 = vmatmul.msk.bf16.vlgmr.msrb.gmra.mxu2 %vm2166_vm13, %v2143_v28  ;;  %5051 = vmatmul.msk.bf16.vlgmr.msrb.gmra.mxu3 %vm2166_vm13, %v2143_v28 }
 0x86e   :  { %v1979_v26 = vpop.f32.mrf.mxu2 }
 0x86f   :  { %v2019_v44 = vmul.f32 %v6884_v63, %v1979_v26 }
 0x871   :  { %v2038_v51 = vadd.f32 %v6888_v35, %v2019_v44 }
 0x876   :  { %v1981_v15 = vpop.f32.mrf.mxu2 }
 0x877   :  { %v2020_v32 = vmul.f32 %v6884_v63, %v1981_v15 }
 0x879   :  { %v2039_v4 = vadd.f32 %v6888_v35, %v2020_v32 }
 0x87b   :  { %v2144_v2 = vpack.c.bf16 %v2039_v4, %v2038_v51 }
 0x87d   :  { %5044 = vmatmul.msk.bf16.gmra.mxu2 %vm2166_vm13, %v2144_v2  ;;  %5052 = vmatmul.msk.bf16.gmra.mxu3 %vm2166_vm13, %v2144_v2 }
 0x87e   :  { %v1984_v27 = vpop.f32.mrf.mxu2 }
 0x87f   :  { %v2021_v29 = vmul.f32 %v6884_v63, %v1984_v27 }
 0x881   :  { %v2040_v41 = vadd.f32 %v6888_v35, %v2021_v29 }
 0x886   :  { %v1986_v54 = vpop.f32.mrf.mxu2 }
 0x887   :  { %v2022_v3 = vmul.f32 %v6884_v63, %v1986_v54 }
 0x889   :  { %v2041_v33 = vadd.f32 %v6888_v35, %v2022_v3 }
 0x88b   :  { %v2145_v45 = vpack.c.bf16 %v2041_v33, %v2040_v41 }
 0x88d   :  { %5045 = vmatmul.msk.bf16.gmra.mxu2 %vm2166_vm13, %v2145_v45  ;;  %5053 = vmatmul.msk.bf16.gmra.mxu3 %vm2166_vm13, %v2145_v45  ;;  %v2055_v45 = vld [vmem:[%s7586_s25] sm:$0x3]  ;;  %s7613_s25 = sld [smem:[#allocation37_spill]] }
 0x88e   :  { %v1989_v42 = vpop.f32.mrf.mxu2 }
 0x88f   :  { %v2023_v14 = vmul.f32 %v6884_v63, %v1989_v42 }
 0x891   :  { %v2042_v30 = vadd.f32 %v6888_v35, %v2023_v14 }
 0x896   :  { %v1991_v38 = vpop.f32.mrf.mxu2 }
 0x897   :  { %v2024_v50 = vmul.f32 %v6884_v63, %v1991_v38  ;;  %v6970_v38 = vperm.slane %v2055_v45, 0 }
 0x899   :  { %v2043_v19 = vadd.f32 %v6888_v35, %v2024_v50  ;;  %v6972_v50 = vperm.slane %v2055_v45, 1 }
 0x89b   :  { %v2146_v25 = vpack.c.bf16 %v2043_v19, %v2042_v30  ;;  %v2056_v30 = vld [vmem:[%s7587_s29] sm:$0x3]  ;;  %s7614_s29 = sld [smem:[#allocation39_spill]] }
 0x89d   :  { %5046 = vmatmul.msk.bf16.gmra.mxu2 %vm2166_vm13, %v2146_v25  ;;  %5054 = vmatmul.msk.bf16.gmra.mxu3 %vm2166_vm13, %v2146_v25 }
 0x89e   :  { %v1994_v62 = vpop.f32.mrf.mxu2 }
 0x89f   :  { %v2025_v17 = vmul.f32 %v6884_v63, %v1994_v62  ;;  %v6977_v62 = vperm.slane %v2056_v30, 0 }
 0x8a1   :  { %v2044_v56 = vadd.f32 %v6888_v35, %v2025_v17  ;;  %v6979_v17 = vperm.slane %v2056_v30, 1 }
 0x8a6   :  { %v1996_v1 = vpop.f32.mrf.mxu2 }
 0x8a7   :  { %v2026_v40 = vmul.f32 %v6884_v63, %v1996_v1 }
 0x8a9   :  { %v2045_v23 = vadd.f32 %v6888_v35, %v2026_v40 }
 0x8ab   :  { %v2147_v60 = vpack.c.bf16 %v2045_v23, %v2044_v56 }
 0x8ad   :  { %5047 = vmatmul.msk.bf16.gmra.mxu2 %vm2166_vm13, %v2147_v60  ;;  %5055 = vmatmul.msk.bf16.gmra.mxu3 %vm2166_vm13, %v2147_v60 }
 0x8ae   :  { %v1999_v9 = vpop.f32.mrf.mxu2 }
 0x8af   :  { %v2027_v0 = vmul.f32 %v6884_v63, %v1999_v9 }
 0x8b1   :  { %v2046_v52 = vadd.f32 %v6888_v35, %v2027_v0 }
 0x8b6   :  { %v2001_v10 = vpop.f32.mrf.mxu2 }
 0x8b7   :  { %v2028_v20 = vmul.f32 %v6884_v63, %v2001_v10 }
 0x8b9   :  { %v2047_v34 = vadd.f32 %v6888_v35, %v2028_v20 }
 0x8bb   :  { %v2148_v7 = vpack.c.bf16 %v2047_v34, %v2046_v52 }
 0x8bd   :  { %5048 = vmatmul.msk.bf16.gmra.mxu2 %vm2166_vm13, %v2148_v7  ;;  %5056 = vmatmul.msk.bf16.gmra.mxu3 %vm2166_vm13, %v2148_v7 }
 0x8be   :  { %v2004_v22 = vpop.f32.mrf.mxu2 }
 0x8bf   :  { %v2029_v5 = vmul.f32 %v6884_v63, %v2004_v22 }
 0x8c1   :  { %v2048_v16 = vadd.f32 %v6888_v35, %v2029_v5 }
 0x8c6   :  { %v2006_v36 = vpop.f32.mrf.mxu2 }
 0x8c7   :  { %v2030_v39 = vmul.f32 %v6884_v63, %v2006_v36 }
 0x8c9   :  { %v2049_v21 = vadd.f32 %v6888_v35, %v2030_v39 }
 0x8cb   :  { %v2149_v6 = vpack.c.bf16 %v2049_v21, %v2048_v16 }
 0x8cd   :  { %5049 = vmatmul.msk.bf16.gmra.mxu2 %vm2166_vm13, %v2149_v6  ;;  %5057 = vmatmul.msk.bf16.gmra.mxu3 %vm2166_vm13, %v2149_v6 }
 0x8ce   :  { %v2009_v61 = vpop.f32.mrf.mxu2 }
 0x8cf   :  { %v2031_v13 = vmul.f32 %v6884_v63, %v2009_v61 }
 0x8d1   :  { %v2050_v59 = vadd.f32 %v6888_v35, %v2031_v13 }
 0x8d6   :  { %v2011_v8 = vpop.f32.mrf.mxu2 }
 0x8d7   :  { %v2032_v55 = vmul.f32 %v6884_v63, %v2011_v8 }
 0x8d9   :  { %v2051_v47 = vadd.f32 %v6888_v35, %v2032_v55 }
 0x8db   :  { %v2150_v11 = vpack.c.bf16 %v2051_v47, %v2050_v59 }
 0x8dd   :  { %5050 = vmatmul.msk.bf16.gmra.mxu2 %vm2166_vm13, %v2150_v11  ;;  %5058 = vmatmul.msk.bf16.gmra.mxu3 %vm2166_vm13, %v2150_v11 }
 0x8f0   :  { %v6937_v24 = vpop.f32.mrf.mxu2  ;;  %v6939_v49 = vpop.f32.mrf.mxu3 }
 0x8f8   :  { %v6941_v18 = vpop.f32.mrf.mxu2  ;;  %v6943_v53 = vpop.f32.mrf.mxu3 }
 0x900   :  { %v6945_v37 = vpop.f32.mrf.mxu2  ;;  %v6947_v43 = vpop.f32.mrf.mxu3 }
 0x908   :  { %v6949_v46 = vpop.f32.mrf.mxu2  ;;  %v6951_v63 = vpop.f32.mrf.mxu3 }
 0x910   :  { %v6953_v58 = vpop.f32.mrf.mxu2  ;;  %v6955_v35 = vpop.f32.mrf.mxu3 }
 0x918   :  { %v6957_v57 = vpop.f32.mrf.mxu2  ;;  %v6959_v12 = vpop.f32.mrf.mxu3 }
 0x920   :  { %v6961_v31 = vpop.f32.mrf.mxu2  ;;  %v6963_v48 = vpop.f32.mrf.mxu3 }
 0x928   :  { %v6965_v28 = vpop.f32.mrf.mxu2  ;;  %v6967_v26 = vpop.f32.mrf.mxu3 }
 0x929   :  { %v2316_v30 = vmul.f32 %v6972_v50, %v6967_v26 }
 0x930   :  { %v2227_v44 = vpop.f32.mrf.mxu2  ;;  %v2276_v15 = vpop.f32.mrf.mxu3 }
 0x938   :  { %v2229_v32 = vpop.f32.mrf.mxu2  ;;  %v2278_v51 = vpop.f32.mrf.mxu3 }
 0x939   :  { %v2319_v47 = vmul.f32 %v6970_v38, %v2229_v32  ;;  %v2320_v11 = vmul.f32 %v6972_v50, %v2278_v51  ;;  %v2315_v51 = vmul.f32 %v6970_v38, %v6965_v28 }
 0x940   :  { %v2232_v4 = vpop.f32.mrf.mxu2  ;;  %v2281_v2 = vpop.f32.mrf.mxu3 }
 0x941   :  { %v2321_v16 = vmul.f32 %v6970_v38, %v2232_v4  ;;  %v2322_v21 = vmul.f32 %v6972_v50, %v2281_v2 }
 0x943   :  { %v2358_v45 = vadd.f32 %v6977_v62, %v2321_v16  ;;  %v2307_v16 = vmul.f32 %v6970_v38, %v6949_v46 }
 0x948   :  { %v2234_v27 = vpop.f32.mrf.mxu2  ;;  %v2283_v29 = vpop.f32.mrf.mxu3 }
 0x949   :  { %v2323_v34 = vmul.f32 %v6970_v38, %v2234_v27  ;;  %v2324_v7 = vmul.f32 %v6972_v50, %v2283_v29 }
 0x94b   :  { %v2360_v27 = vadd.f32 %v6977_v62, %v2323_v34  ;;  %v2361_v29 = vadd.f32 %v6979_v17, %v2324_v7 }
 0x950   :  { %v2237_v54 = vpop.f32.mrf.mxu2  ;;  %v2286_v3 = vpop.f32.mrf.mxu3 }
 0x951   :  { %v2325_v56 = vmul.f32 %v6970_v38, %v2237_v54  ;;  %v2326_v23 = vmul.f32 %v6972_v50, %v2286_v3 }
 0x953   :  { %v2362_v6 = vadd.f32 %v6977_v62, %v2325_v56  ;;  %v2363_v61 = vadd.f32 %v6979_v17, %v2326_v23  ;;  %v2313_v56 = vmul.f32 %v6970_v38, %v6961_v31  ;;  %v2314_v23 = vmul.f32 %v6972_v50, %v6963_v48 }
 0x954   :  { %v2353_v31 = vadd.f32 %v6979_v17, %v2316_v30 }
 0x955   :  { %v2395_v32 = vmax.f32 %v2363_v61, 0.0 }
 0x958   :  { %v2239_v41 = vpop.f32.mrf.mxu2  ;;  %v2288_v33 = vpop.f32.mrf.mxu3 }
 0x959   :  { %v2327_v1 = vmul.f32 %v6970_v38, %v2239_v41  ;;  %v2328_v40 = vmul.f32 %v6972_v50, %v2288_v33  ;;  %v2317_v41 = vmul.f32 %v6970_v38, %v2227_v44  ;;  %v2318_v33 = vmul.f32 %v6972_v50, %v2276_v15 }
 0x95a   :  { %v2357_v44 = vadd.f32 %v6979_v17, %v2320_v11  ;;  %v2393_v15 = vmax.f32 %v2361_v29, 0.0  ;;  %v2304_v29 = vmul.f32 %v6972_v50, %v6943_v53 }
 0x95b   :  { %v2364_v22 = vadd.f32 %v6977_v62, %v2327_v1  ;;  %v2365_v5 = vadd.f32 %v6979_v17, %v2328_v40  ;;  %v2355_v28 = vadd.f32 %v6979_v17, %v2318_v33  ;;  %v2302_v33 = vmul.f32 %v6972_v50, %v6939_v49 }
 0x95c   :  { %v2389_v48 = vmax.f32 %v2357_v44, 0.0 }
 0x95d   :  { %v2396_v54 = vmax.f32 %v2364_v22, 0.0  ;;  %v2397_v4 = vmax.f32 %v2365_v5, 0.0  ;;  %v2309_v22 = vmul.f32 %v6970_v38, %v6953_v58  ;;  %v2310_v5 = vmul.f32 %v6972_v50, %v6955_v35 }
 0x95e   :  { %v2385_v35 = vmax.f32 %v2353_v31, 0.0  ;;  %v2339_v49 = vadd.f32 %v6979_v17, %v2302_v33  ;;  %v5624_v31 = vld [vmem:[%s7588_s3 + $0x38] sm:$0xff] }
 0x95f   :  { %v2415_v40 = vpack.c.bf16 %v2397_v4, %v2395_v32  ;;  %v2347_v46 = vadd.f32 %v6979_v17, %v2310_v5  ;;  %v2341_v32 = vadd.f32 %v6979_v17, %v2304_v29  ;;  %v5626_v5 = vld [vmem:[%s7588_s3 + $0x48] sm:$0xff] }
 0x960   :  { %v2242_v42 = vpop.f32.mrf.mxu2  ;;  %v2291_v14 = vpop.f32.mrf.mxu3 }
 0x961   :  { %v2329_v19 = vmul.f32 %v6970_v38, %v2242_v42  ;;  %v2330_v25 = vmul.f32 %v6972_v50, %v2291_v14  ;;  %v2359_v42 = vadd.f32 %v6979_v17, %v2322_v21  ;;  %v2394_v14 = vmax.f32 %v2362_v6, 0.0 }
 0x962   :  { %v2308_v21 = vmul.f32 %v6972_v50, %v6951_v63  ;;  %v2379_v53 = vmax.f32 %v2347_v46, 0.0 }
 0x963   :  { %v2366_v0 = vadd.f32 %v6977_v62, %v2329_v19  ;;  %v2367_v10 = vadd.f32 %v6979_v17, %v2330_v25  ;;  %v2356_v19 = vadd.f32 %v6977_v62, %v2319_v47  ;;  %v2392_v25 = vmax.f32 %v2360_v27, 0.0 }
 0x964   :  { %v2414_v1 = vpack.c.bf16 %v2396_v54, %v2394_v14  ;;  %v2391_v26 = vmax.f32 %v2359_v42, 0.0  ;;  %v2346_v47 = vadd.f32 %v6977_v62, %v2309_v22  ;;  %v2303_v27 = vmul.f32 %v6970_v38, %v6941_v18 }
 0x965   :  { %v2398_v13 = vmax.f32 %v2366_v0, 0.0  ;;  %v2399_v8 = vmax.f32 %v2367_v10, 0.0  ;;  %v2311_v0 = vmul.f32 %v6970_v38, %v6957_v57  ;;  %v2312_v10 = vmul.f32 %v6972_v50, %v6959_v12 }
 0x966   :  { %v2413_v7 = vpack.c.bf16 %v2393_v15, %v2391_v26  ;;  %v2351_v57 = vadd.f32 %v6979_v17, %v2314_v23  ;;  %v2387_v12 = vmax.f32 %v2355_v28, 0.0  ;;  %v2344_v54 = vadd.f32 %v6977_v62, %v2307_v16  ;;  %v5617_v28 = vld [vmem:[%s7588_s3] sm:$0xff]  ;;  %v5620_v26 = vld [vmem:[%s7588_s3 + $0x18] sm:$0xff] }
 0x967   :  { %v2348_v6 = vadd.f32 %v6977_v62, %v2311_v0  ;;  %v2349_v58 = vadd.f32 %v6979_v17, %v2312_v10  ;;  %v2378_v42 = vmax.f32 %v2346_v47, 0.0  ;;  %v2340_v14 = vadd.f32 %v6977_v62, %v2303_v27  ;;  %v5621_v0 = vld [vmem:[%s7588_s3 + $0x20] sm:$0xff]  ;;  %v5622_v10 = vld [vmem:[%s7588_s3 + $0x28] sm:$0xff] }
 0x968   :  { %v2244_v60 = vpop.f32.mrf.mxu2  ;;  %v2293_v9 = vpop.f32.mrf.mxu3  ;;  %v2383_v63 = vmax.f32 %v2351_v57, 0.0  ;;  %v2373_v15 = vmax.f32 %v2341_v32, 0.0  ;;  %v2371_v23 = vmax.f32 %v2339_v49, 0.0 }
 0x969   :  { %v2331_v20 = vmul.f32 %v6970_v38, %v2244_v60  ;;  %v2332_v52 = vmul.f32 %v6972_v50, %v2293_v9  ;;  %v2354_v60 = vadd.f32 %v6977_v62, %v2317_v41  ;;  %v2390_v9 = vmax.f32 %v2358_v45, 0.0 }
 0x96a   :  { %v2380_v4 = vmax.f32 %v2348_v6, 0.0  ;;  %v2301_v41 = vmul.f32 %v6970_v38, %v6937_v24 }
 0x96b   :  { %v2368_v36 = vadd.f32 %v6977_v62, %v2331_v20  ;;  %v2369_v39 = vadd.f32 %v6979_v17, %v2332_v52  ;;  %v2352_v20 = vadd.f32 %v6977_v62, %v2315_v51  ;;  %v2388_v52 = vmax.f32 %v2356_v19, 0.0 }
 0x96c   :  { %v2412_v34 = vpack.c.bf16 %v2392_v25, %v2390_v9  ;;  %v2376_v51 = vmax.f32 %v2344_v54, 0.0  ;;  %v2406_v19 = vpack.c.bf16 %v2380_v4, %v2378_v42  ;;  %v2338_v24 = vadd.f32 %v6977_v62, %v2301_v41  ;;  %v5619_v9 = vld [vmem:[%s7588_s3 + $0x10] sm:$0xff]  ;;  %v5628_v41 = vld [vmem:[%s7588_s3 + $0x58] sm:$0xff] }
 0x96d   :  { %v2400_v55 = vmax.f32 %v2368_v36, 0.0  ;;  %v2401_v59 = vmax.f32 %v2369_v39, 0.0  ;;  %v2350_v36 = vadd.f32 %v6977_v62, %v2313_v56  ;;  %v2386_v39 = vmax.f32 %v2354_v60, 0.0 }
 0x96e   :  { %v2384_v61 = vmax.f32 %v2352_v20, 0.0  ;;  %v2372_v25 = vmax.f32 %v2340_v14, 0.0  ;;  %v2370_v56 = vmax.f32 %v2338_v24, 0.0  ;;  %v5623_v20 = vld [vmem:[%s7588_s3 + $0x30] sm:$0xff] }
 0x96f   :  { %v2416_v3 = vpack.c.bf16 %v2400_v55, %v2398_v13  ;;  %v2417_v2 = vpack.c.bf16 %v2401_v59, %v2399_v8  ;;  %v2410_v13 = vpack.c.bf16 %v2388_v52, %v2386_v39  ;;  %v2411_v8 = vpack.c.bf16 %v2389_v48, %v2387_v12  ;;  %v5625_v52 = vld [vmem:[%s7588_s3 + $0x40] sm:$0xff]  ;;  %v7070_v12 = vld [vmem:[%s7589_s8 + $0x8] sm:$0xff] }
 0x970   :  { %v2305_v55 = vmul.f32 %v6970_v38, %v6945_v37  ;;  %v2306_v59 = vmul.f32 %v6972_v50, %v6947_v43  ;;  %v2382_v11 = vmax.f32 %v2350_v36, 0.0  ;;  %v2345_v37 = vadd.f32 %v6979_v17, %v2308_v21 }
 0x971   :  { %2526 = vmatpush.bf16.msra.mxu2 %v2416_v3  ;;  %2625 = vmatpush.bf16.msra.mxu0 %v2417_v2  ;;  %v2381_v43 = vmax.f32 %v2349_v58, 0.0  ;;  %v2409_v2 = vpack.c.bf16 %v2385_v35, %v2383_v63  ;;  %v2402_v60 = vpack.c.bf16 %v2372_v25, %v2370_v56  ;;  %v2725_v16 = vperm.slane %v7070_v12, 0  ;;  %v5627_v58 = vld [vmem:[%s7588_s3 + $0x50] sm:$0xff] }
 0x972   :  { %v2408_v3 = vpack.c.bf16 %v2384_v61, %v2382_v11  ;;  %v2342_v45 = vadd.f32 %v6977_v62, %v2305_v55  ;;  %v2343_v18 = vadd.f32 %v6979_v17, %v2306_v59  ;;  %v2377_v30 = vmax.f32 %v2345_v37, 0.0  ;;  %v5618_v17 = vld [vmem:[%s7588_s3 + $0x8] sm:$0xff]  ;;  %v7076_v61 = vld [vmem:[%s7589_s8] sm:$0xff] }
 0x973   :  { %v2407_v44 = vpack.c.bf16 %v2381_v43, %v2379_v53  ;;  %v2403_v62 = vpack.c.bf16 %v2373_v15, %v2371_v23  ;;  %v2735_v21 = vperm.slane %v7070_v12, 1  ;;  %v2724_v55 = vperm.slane %v7076_v61, 0 }
 0x974   :  { %v2374_v38 = vmax.f32 %v2342_v45, 0.0  ;;  %v2375_v50 = vmax.f32 %v2343_v18, 0.0  ;;  %v2734_v47 = vperm.slane %v7076_v61, 1 }
 0x975   :  { %2527 = vmatpush.bf16.msra.mxu2 %v2414_v1  ;;  %2626 = vmatpush.bf16.msra.mxu0 %v2415_v40 }
 0x976   :  { %v2404_v1 = vpack.c.bf16 %v2376_v51, %v2374_v38  ;;  %v2405_v40 = vpack.c.bf16 %v2377_v30, %v2375_v50  ;;  %v2753_v38 = vperm.slane %v7070_v12, 2 }
 0x979   :  { %2528 = vmatpush.bf16.msra.mxu2 %v2412_v34  ;;  %2627 = vmatpush.bf16.msra.mxu0 %v2413_v7 }
 0x97d   :  { %2529 = vmatpush.bf16.msra.mxu2 %v2410_v13  ;;  %2628 = vmatpush.bf16.msra.mxu0 %v2411_v8 }
 0x981   :  { %2530 = vmatpush.bf16.msra.mxu2 %v2408_v3  ;;  %2629 = vmatpush.bf16.msra.mxu0 %v2409_v2 }
 0x985   :  { %2531 = vmatpush.bf16.msra.mxu2 %v2406_v19  ;;  %2630 = vmatpush.bf16.msra.mxu0 %v2407_v44 }
 0x989   :  { %2532 = vmatpush.bf16.msra.mxu2 %v2404_v1  ;;  %2631 = vmatpush.bf16.msra.mxu0 %v2405_v40  ;;  %v5629_v1 = vld [vmem:[%s7588_s3 + $0x60] sm:$0xff] }
 0x98d   :  { %2533 = vmatpush.bf16.msra.mxu2 %v2402_v60  ;;  %2632 = vmatpush.bf16.msra.mxu0 %v2403_v62  ;;  %v2752_v62 = vperm.slane %v7076_v61, 2 }
 0x990   :  { %2534 = vmatmul.bf16.vlgmr.msra.gmra.mxu2 %v5617_v28  ;;  %2633 = vmatmul.bf16.vlgmr.msra.gmra.mxu0 %v5617_v28 }
 0x9a0   :  { %2539 = vmatmul.bf16.gmra.mxu2 %v5618_v17  ;;  %2638 = vmatmul.bf16.gmra.mxu0 %v5618_v17 }
 0x9b0   :  { %2544 = vmatmul.bf16.gmra.mxu2 %v5619_v9  ;;  %2643 = vmatmul.bf16.gmra.mxu0 %v5619_v9 }
 0x9c0   :  { %2549 = vmatmul.bf16.gmra.mxu2 %v5620_v26  ;;  %2648 = vmatmul.bf16.gmra.mxu0 %v5620_v26 }
 0x9d0   :  { %2554 = vmatmul.bf16.gmra.mxu2 %v5621_v0  ;;  %2653 = vmatmul.bf16.gmra.mxu0 %v5621_v0 }
 0x9e0   :  { %2559 = vmatmul.bf16.gmra.mxu2 %v5622_v10  ;;  %2658 = vmatmul.bf16.gmra.mxu0 %v5622_v10 }
 0x9f0   :  { %2564 = vmatmul.bf16.gmra.mxu2 %v5623_v20  ;;  %2663 = vmatmul.bf16.gmra.mxu0 %v5623_v20 }
 0xa00   :  { %2569 = vmatmul.bf16.gmra.mxu2 %v5624_v31  ;;  %2668 = vmatmul.bf16.gmra.mxu0 %v5624_v31 }
 0xa0d   :  { %v2634_v48 = vpop.f32.mrf.mxu0 }
 0xa0e   :  { %v2727_v13 = vmul.f32 %v2725_v16, %v2634_v48 }
 0xa10   :  { %2574 = vmatmul.bf16.gmra.mxu2 %v5625_v52  ;;  %2673 = vmatmul.bf16.gmra.mxu0 %v5625_v52  ;;  %v5630_v52 = vld [vmem:[%s7588_s3 + $0x68] sm:$0xff] }
 0xa13   :  { %v2535_v34 = vpop.f32.mrf.mxu2 }
 0xa14   :  { %v2726_v11 = vmul.f32 %v2724_v55, %v2535_v34 }
 0xa15   :  { %v2636_v7 = vpop.f32.mrf.mxu0 }
 0xa16   :  { %v2729_v29 = vmul.f32 %v2725_v16, %v2636_v7 }
 0xa1b   :  { %v2537_v22 = vpop.f32.mrf.mxu2 }
 0xa1c   :  { %v2728_v3 = vmul.f32 %v2724_v55, %v2537_v22 }
 0xa1d   :  { %v2639_v36 = vpop.f32.mrf.mxu0 }
 0xa1e   :  { %v2731_v45 = vmul.f32 %v2725_v16, %v2639_v36 }
 0xa20   :  { %2579 = vmatmul.bf16.gmra.mxu2 %v5626_v5  ;;  %2678 = vmatmul.bf16.gmra.mxu0 %v5626_v5 }
 0xa23   :  { %v2540_v57 = vpop.f32.mrf.mxu2 }
 0xa24   :  { %v2730_v32 = vmul.f32 %v2724_v55, %v2540_v57 }
 0xa25   :  { %v2641_v39 = vpop.f32.mrf.mxu0 }
 0xa26   :  { %v2733_v19 = vmul.f32 %v2725_v16, %v2641_v39 }
 0xa2b   :  { %v2542_v6 = vpop.f32.mrf.mxu2 }
 0xa2c   :  { %v2732_v25 = vmul.f32 %v2724_v55, %v2542_v6  ;;  %v7092_v6 = vperm.slane %v7070_v12, 3 }
 0xa2d   :  { %v2644_v35 = vpop.f32.mrf.mxu0 }
 0xa2e   :  { %v2737_v8 = vmul.f32 %v2735_v21, %v2644_v35 }
 0xa30   :  { %v2745_v59 = vadd.f32 %v2737_v8, %v2727_v13  ;;  %2584 = vmatmul.bf16.gmra.mxu2 %v5627_v58  ;;  %2683 = vmatmul.bf16.gmra.mxu0 %v5627_v58  ;;  %v5631_v13 = vld [vmem:[%s7588_s3 + $0x70] sm:$0xff] }
 0xa33   :  { %v2545_v46 = vpop.f32.mrf.mxu2 }
 0xa34   :  { %v2736_v63 = vmul.f32 %v2734_v47, %v2545_v46  ;;  %v7099_v46 = vperm.slane %v7076_v61, 3 }
 0xa35   :  { %v2646_v27 = vpop.f32.mrf.mxu0 }
 0xa36   :  { %v2744_v54 = vadd.f32 %v2736_v63, %v2726_v11  ;;  %v2739_v37 = vmul.f32 %v2735_v21, %v2646_v27 }
 0xa38   :  { %v2747_v4 = vadd.f32 %v2739_v37, %v2729_v29  ;;  %v5632_v37 = vld [vmem:[%s7588_s3 + $0x78] sm:$0xff] }
 0xa3b   :  { %v2547_v43 = vpop.f32.mrf.mxu2 }
 0xa3c   :  { %v2738_v2 = vmul.f32 %v2734_v47, %v2547_v43 }
 0xa3d   :  { %v2649_v33 = vpop.f32.mrf.mxu0 }
 0xa3e   :  { %v2746_v18 = vadd.f32 %v2738_v2, %v2728_v3  ;;  %v2741_v42 = vmul.f32 %v2735_v21, %v2649_v33 }
 0xa40   :  { %v2749_v53 = vadd.f32 %v2741_v42, %v2731_v45  ;;  %2589 = vmatmul.bf16.gmra.mxu2 %v5628_v41  ;;  %2688 = vmatmul.bf16.gmra.mxu0 %v5628_v41 }
 0xa43   :  { %v2550_v14 = vpop.f32.mrf.mxu2 }
 0xa44   :  { %v2740_v51 = vmul.f32 %v2734_v47, %v2550_v14 }
 0xa45   :  { %v2651_v30 = vpop.f32.mrf.mxu0 }
 0xa46   :  { %v2748_v44 = vadd.f32 %v2740_v51, %v2730_v32  ;;  %v2743_v24 = vmul.f32 %v2735_v21, %v2651_v30  ;;  %v7119_v30 = vperm.slane %v7076_v61, 4 }
 0xa48   :  { %v2751_v49 = vadd.f32 %v2743_v24, %v2733_v19 }
 0xa4b   :  { %v2552_v50 = vpop.f32.mrf.mxu2 }
 0xa4c   :  { %v2742_v15 = vmul.f32 %v2734_v47, %v2552_v50  ;;  %v5634_v50 = vld [vmem:[%s7588_s3 + $0x88] sm:$0xff] }
 0xa4d   :  { %v2654_v40 = vpop.f32.mrf.mxu0 }
 0xa4e   :  { %v2750_v56 = vadd.f32 %v2742_v15, %v2732_v25  ;;  %v2755_v23 = vmul.f32 %v2753_v38, %v2654_v40 }
 0xa50   :  { %v2763_v60 = vadd.f32 %v2755_v23, %v2745_v59  ;;  %2594 = vmatmul.bf16.gmra.mxu2 %v5629_v1  ;;  %2693 = vmatmul.bf16.gmra.mxu0 %v5629_v1 }
 0xa53   :  { %v2555_v28 = vpop.f32.mrf.mxu2 }
 0xa54   :  { %v2754_v17 = vmul.f32 %v2752_v62, %v2555_v28 }
 0xa55   :  { %v2656_v9 = vpop.f32.mrf.mxu0 }
 0xa56   :  { %v2762_v26 = vadd.f32 %v2754_v17, %v2744_v54  ;;  %v2757_v0 = vmul.f32 %v2753_v38, %v2656_v9 }
 0xa58   :  { %v7084_v10 = vadd.f32 %v2757_v0, %v2747_v4  ;;  %v7134_v0 = vperm.slane %v7076_v61, 5 }
 0xa5b   :  { %v2557_v20 = vpop.f32.mrf.mxu2 }
 0xa5c   :  { %v2756_v31 = vmul.f32 %v2752_v62, %v2557_v20 }
 0xa5d   :  { %v2659_v48 = vpop.f32.mrf.mxu0 }
 0xa5e   :  { %v7087_v34 = vadd.f32 %v2756_v31, %v2746_v18  ;;  %v2759_v7 = vmul.f32 %v2753_v38, %v2659_v48  ;;  %v7112_v18 = vperm.slane %v7070_v12, 4 }
 0xa60   :  { %v2767_v22 = vadd.f32 %v2759_v7, %v2749_v53  ;;  %2599 = vmatmul.bf16.gmra.mxu2 %v5630_v52  ;;  %2698 = vmatmul.bf16.gmra.mxu0 %v5630_v52  ;;  %v5633_v53 = vld [vmem:[%s7588_s3 + $0x80] sm:$0xff]  ;;  %s4613_s3 = sshll.u32 %s6182_s4, 4  ;;  %s4614_s3 = int_to_ptr.hbm [resolvable:$true] %s4613_s3 }
 0xa63   :  { %v2560_v5 = vpop.f32.mrf.mxu2 }
 0xa64   :  { %v2758_v36 = vmul.f32 %v2752_v62, %v2560_v5 }
 0xa65   :  { %v2661_v57 = vpop.f32.mrf.mxu0 }
 0xa66   :  { %v2766_v39 = vadd.f32 %v2758_v36, %v2748_v44  ;;  %v2761_v16 = vmul.f32 %v2753_v38, %v2661_v57 }
 0xa68   :  { %v7089_v21 = vadd.f32 %v2761_v16, %v2751_v49 }
 0xa6b   :  { %v2562_v58 = vpop.f32.mrf.mxu2 }
 0xa6c   :  { %v2760_v35 = vmul.f32 %v2752_v62, %v2562_v58  ;;  %v7130_v62 = vperm.slane %v7070_v12, 5 }
 0xa6d   :  { %v2664_v8 = vpop.f32.mrf.mxu0 }
 0xa6e   :  { %v7095_v55 = vadd.f32 %v2760_v35, %v2750_v56  ;;  %v2773_v59 = vmul.f32 %v7092_v6, %v2664_v8  ;;  %v2825_v35 = vperm.slane %v7070_v12, 6 }
 0xa70   :  { %v2781_v47 = vadd.f32 %v2773_v59, %v2763_v60  ;;  %2604 = vmatmul.bf16.gmra.mxu2 %v5631_v13  ;;  %2703 = vmatmul.bf16.gmra.mxu0 %v5631_v13 }
 0xa73   :  { %v2565_v11 = vpop.f32.mrf.mxu2 }
 0xa74   :  { %v2772_v63 = vmul.f32 %v7099_v46, %v2565_v11  ;;  %v2824_v11 = vperm.slane %v7076_v61, 6 }
 0xa75   :  { %v7102_v27 = vpop.f32.mrf.mxu0 }
 0xa76   :  { %v2780_v29 = vadd.f32 %v2772_v63, %v2762_v26 }
 0xa7b   :  { %v7104_v54 = vpop.f32.mrf.mxu2 }
 0xa7d   :  { %v2669_v4 = vpop.f32.mrf.mxu0 }
 0xa7e   :  { %v2777_v43 = vmul.f32 %v7092_v6, %v2669_v4 }
 0xa80   :  { %v2785_v3 = vadd.f32 %v2777_v43, %v2767_v22  ;;  %2609 = vmatmul.bf16.gmra.mxu2 %v5632_v37  ;;  %2708 = vmatmul.bf16.gmra.mxu0 %v5632_v37 }
 0xa83   :  { %v2570_v2 = vpop.f32.mrf.mxu2 }
 0xa84   :  { %v2776_v41 = vmul.f32 %v7099_v46, %v2570_v2 }
 0xa85   :  { %v7109_v33 = vpop.f32.mrf.mxu0 }
 0xa86   :  { %v2784_v45 = vadd.f32 %v2776_v41, %v2766_v39 }
 0xa8b   :  { %v7114_v42 = vpop.f32.mrf.mxu2 }
 0xa8d   :  { %v2674_v14 = vpop.f32.mrf.mxu0 }
 0xa8e   :  { %v2791_v32 = vmul.f32 %v7112_v18, %v2674_v14 }
 0xa90   :  { %v2799_v51 = vadd.f32 %v2791_v32, %v2781_v47  ;;  %2614 = vmatmul.bf16.gmra.mxu2 %v5633_v53  ;;  %2713 = vmatmul.bf16.gmra.mxu0 %v5633_v53 }
 0xa93   :  { %v2575_v19 = vpop.f32.mrf.mxu2 }
 0xa94   :  { %v2790_v44 = vmul.f32 %v7119_v30, %v2575_v19 }
 0xa95   :  { %v7122_v24 = vpop.f32.mrf.mxu0 }
 0xa96   :  { %v2798_v49 = vadd.f32 %v2790_v44, %v2780_v29 }
 0xa9b   :  { %v7124_v38 = vpop.f32.mrf.mxu2 }
 0xa9d   :  { %v2679_v25 = vpop.f32.mrf.mxu0 }
 0xa9e   :  { %v2795_v15 = vmul.f32 %v7112_v18, %v2679_v25 }
 0xaa0   :  { %v2803_v1 = vadd.f32 %v2795_v15, %v2785_v3  ;;  %2619 = vmatmul.bf16.gmra.mxu2 %v5634_v50  ;;  %2718 = vmatmul.bf16.gmra.mxu0 %v5634_v50 }
 0xaa3   :  { %v2580_v40 = vpop.f32.mrf.mxu2 }
 0xaa4   :  { %v2794_v56 = vmul.f32 %v7119_v30, %v2580_v40 }
 0xaa5   :  { %v2681_v23 = vpop.f32.mrf.mxu0 }
 0xaa6   :  { %v2802_v60 = vadd.f32 %v2794_v56, %v2784_v45 }
 0xaab   :  { %v2582_v28 = vpop.f32.mrf.mxu2 }
 0xaad   :  { %v2684_v17 = vpop.f32.mrf.mxu0 }
 0xaae   :  { %v2809_v9 = vmul.f32 %v7130_v62, %v2684_v17 }
 0xab0   :  { %v2817_v26 = vadd.f32 %v2809_v9, %v2799_v51 }
 0xab3   :  { %v2585_v20 = vpop.f32.mrf.mxu2 }
 0xab4   :  { %v2808_v31 = vmul.f32 %v7134_v0, %v2585_v20  ;;  %v2774_v20 = vmul.f32 %v7099_v46, %v7104_v54 }
 0xab5   :  { %v2686_v52 = vpop.f32.mrf.mxu0 }
 0xab6   :  { %v2816_v48 = vadd.f32 %v2808_v31, %v2798_v49  ;;  %v2782_v54 = vadd.f32 %v2774_v20, %v7087_v34 }
 0xabb   :  { %v2587_v7 = vpop.f32.mrf.mxu2 }
 0xabd   :  { %v2689_v22 = vpop.f32.mrf.mxu0 }
 0xabe   :  { %v2813_v5 = vmul.f32 %v7130_v62, %v2689_v22  ;;  %v2778_v22 = vmul.f32 %v7099_v46, %v7114_v42  ;;  %v2810_v42 = vmul.f32 %v7134_v0, %v2587_v7  ;;  %v2843_v7 = vperm.slane %v7070_v12, 7 }
 0xac0   :  { %v2821_v36 = vadd.f32 %v2813_v5, %v2803_v1  ;;  %v2793_v5 = vmul.f32 %v7112_v18, %v7122_v24  ;;  %v2786_v46 = vadd.f32 %v2778_v22, %v7095_v55  ;;  %v2842_v24 = vperm.slane %v7076_v61, 7 }
 0xac3   :  { %v2590_v57 = vpop.f32.mrf.mxu2 }
 0xac4   :  { %v2812_v39 = vmul.f32 %v7134_v0, %v2590_v57  ;;  %v2797_v57 = vmul.f32 %v7112_v18, %v2681_v23 }
 0xac5   :  { %v2691_v16 = vpop.f32.mrf.mxu0 }
 0xac6   :  { %v2820_v58 = vadd.f32 %v2812_v39, %v2802_v60  ;;  %v2815_v18 = vmul.f32 %v7130_v62, %v2691_v16 }
 0xacb   :  { %v2592_v13 = vpop.f32.mrf.mxu2 }
 0xacd   :  { %v2694_v8 = vpop.f32.mrf.mxu0 }
 0xace   :  { %v2827_v59 = vmul.f32 %v2825_v35, %v2694_v8  ;;  %v5788_v8 = vld [vmem:[%s7589_s8 + $0x10] ss:$0 sm:$0xff] }
 0xad0   :  { %v7140_v47 = vadd.f32 %v2827_v59, %v2817_v26  ;;  %v2775_v26 = vmul.f32 %v7092_v6, %v7102_v27  ;;  %v2796_v27 = vmul.f32 %v7119_v30, %v2582_v28 }
 0xad2   :  { %v2783_v39 = vadd.f32 %v2775_v26, %v7084_v10  ;;  %v2804_v28 = vadd.f32 %v2796_v27, %v2786_v46 }
 0xad3   :  { %v2595_v63 = vpop.f32.mrf.mxu2 }
 0xad4   :  { %v2826_v29 = vmul.f32 %v2824_v11, %v2595_v63 }
 0xad5   :  { %v2696_v37 = vpop.f32.mrf.mxu0 }
 0xad6   :  { %v7143_v4 = vadd.f32 %v2826_v29, %v2816_v48  ;;  %v2779_v48 = vmul.f32 %v7092_v6, %v7109_v33  ;;  %v2811_v6 = vmul.f32 %v7130_v62, %v2686_v52  ;;  %v2829_v59 = vmul.f32 %v2825_v35, %v2696_v37 }
 0xad8   :  { %v2787_v33 = vadd.f32 %v2779_v48, %v7089_v21 }
 0xada   :  { %v2805_v23 = vadd.f32 %v2797_v57, %v2787_v33 }
 0xadb   :  { %v2597_v43 = vpop.f32.mrf.mxu2 }
 0xadc   :  { %v2828_v34 = vmul.f32 %v2824_v11, %v2597_v43  ;;  %v2823_v62 = vadd.f32 %v2815_v18, %v2805_v23 }
 0xadd   :  { %v2699_v3 = vpop.f32.mrf.mxu0 }
 0xade   :  { %v2831_v2 = vmul.f32 %v2825_v35, %v2699_v3 }
 0xae0   :  { %v7145_v41 = vadd.f32 %v2831_v2, %v2821_v36  ;;  %v2792_v36 = vmul.f32 %v7119_v30, %v7124_v38  ;;  %v2801_v38 = vadd.f32 %v2793_v5, %v2783_v39  ;;  %v2814_v30 = vmul.f32 %v7134_v0, %v2592_v13 }
 0xae2   :  { %v2819_v21 = vadd.f32 %v2811_v6, %v2801_v38  ;;  %v2822_v16 = vadd.f32 %v2814_v30, %v2804_v28 }
 0xae3   :  { %v2600_v45 = vpop.f32.mrf.mxu2 }
 0xae4   :  { %v2830_v53 = vmul.f32 %v2824_v11, %v2600_v45  ;;  %v5787_v45 = vld [vmem:[%s7589_s8 + $0x18] ss:$0 sm:$0xff]  ;;  %v2837_v20 = vadd.f32 %v2829_v59, %v2819_v21  ;;  %s5859_s8 = sshra.s32 %s4614_s3, 4  ;;  %s5860_s8 = int_to_ptr.hbm [resolvable:$true] %s5859_s8 }
 0xae5   :  { %v2701_v14 = vpop.f32.mrf.mxu0  ;;  %p5864_p6 = scmp.lt.s32.totalorder %s5860_s8, %s6182_s4 }
 0xae6   :  { %v2838_v32 = vadd.f32 %v2830_v53, %v2820_v58  ;;  %v2800_v58 = vadd.f32 %v2792_v36, %v2782_v54  ;;  %v2833_v55 = vmul.f32 %v2825_v35, %v2701_v14 }
 0xae8   :  { %v2818_v63 = vadd.f32 %v2810_v42, %v2800_v58  ;;  %v2841_v37 = vadd.f32 %v2833_v55, %v2823_v62  ;;  %v5639_v62 = vld [vmem:[%s7592_s24 + $0x20] sm:$0xff] }
 0xaea   :  { %v2836_v43 = vadd.f32 %v2828_v34, %v2818_v63 }
 0xaeb   :  { %v2602_v51 = vpop.f32.mrf.mxu2 }
 0xaec   :  { %v2832_v61 = vmul.f32 %v2824_v11, %v2602_v51 }
 0xaed   :  { %v7147_v19 = vpop.f32.mrf.mxu0 }
 0xaee   :  { %v2840_v12 = vadd.f32 %v2832_v61, %v2822_v16  ;;  %v2845_v27 = vmul.f32 %v2843_v7, %v7147_v19  ;;  %v5642_v61 = vld [vmem:[%s7592_s24 + $0x38] sm:$0xff] }
 0xaef   :  { %v5638_v16 = vld [vmem:[%s7592_s24 + $0x18] sm:$0xff] }
 0xaf0   :  { %v2853_v19 = vadd.f32 %v2845_v27, %v7140_v47 }
 0xaf3   :  { %v2605_v44 = vpop.f32.mrf.mxu2 }
 0xaf4   :  { %v2844_v0 = vmul.f32 %v2842_v24, %v2605_v44 }
 0xaf5   :  { %v7149_v49 = vpop.f32.mrf.mxu0 }
 0xaf6   :  { %v2847_v22 = vmul.f32 %v2843_v7, %v7149_v49 }
 0xaf8   :  { %v2855_v49 = vadd.f32 %v2847_v22, %v2837_v20 }
 0xafb   :  { %v2607_v50 = vpop.f32.mrf.mxu2 }
 0xafc   :  { %v2846_v29 = vmul.f32 %v2842_v24, %v2607_v50  ;;  %v2852_v50 = vadd.f32 %v2844_v0, %v7143_v4  ;;  %v5637_v0 = vld [vmem:[%s7592_s24 + $0x10] sm:$0xff] }
 0xafd   :  { %v2709_v25 = vpop.f32.mrf.mxu0 }
 0xafe   :  { %v2849_v35 = vmul.f32 %v2843_v7, %v2709_v25  ;;  %v2854_v48 = vadd.f32 %v2846_v29, %v2836_v43  ;;  %v5643_v43 = vld [vmem:[%s7592_s24 + $0x40] sm:$0xff] }
 0xb00   :  { %v2857_v25 = vadd.f32 %v2849_v35, %v7145_v41 }
 0xb03   :  { %v2610_v15 = vpop.f32.mrf.mxu2 }
 0xb04   :  { %v2848_v52 = vmul.f32 %v2842_v24, %v2610_v15 }
 0xb05   :  { %v2711_v1 = vpop.f32.mrf.mxu0 }
 0xb06   :  { %v2851_v13 = vmul.f32 %v2843_v7, %v2711_v1  ;;  %v2856_v53 = vadd.f32 %v2848_v52, %v2838_v32  ;;  %v2097_v1 = vld [vmem:[%s7590_s14] sm:$0x3]  ;;  %s5861_s14 = scalar_lea.hbm %s5860_s8, 2 }
 0xb07   :  { %v2879_v32 = vperm.slane %v2097_v1, 0  ;;  %v237_v7 = vld [vmem:[%s7591_s19] sm:$0x1]  ;;  %p5862_p5 = scmp.ne.s32.totalorder %s5860_s8, %s5861_s14 }
 0xb08   :  { %v2859_v44 = vadd.f32 %v2851_v13, %v2841_v37  ;;  %v5636_v13 = vld [vmem:[%s7592_s24 + $0x8] sm:$0xff] }
 0xb0b   :  { %v2612_v40 = vpop.f32.mrf.mxu2 }
 0xb0c   :  { %v2850_v15 = vmul.f32 %v2842_v24, %v2612_v40 }
 0xb0d   :  { %v7151_v56 = vpop.f32.mrf.mxu0 }
 0xb0e   :  { %v2858_v57 = vadd.f32 %v2850_v15, %v2840_v12  ;;  %v2863_v33 = vmul.f32 %v5787_v45, %v7151_v56 }
 0xb10   :  { %v2871_v30 = vadd.f32 %v2863_v33, %v2853_v19 }
 0xb13   :  { %v2615_v60 = vpop.f32.mrf.mxu2 }
 0xb14   :  { %v2862_v11 = vmul.f32 %v5788_v8, %v2615_v60 }
 0xb15   :  { %v7153_v17 = vpop.f32.mrf.mxu0 }
 0xb16   :  { %v2865_v39 = vmul.f32 %v5787_v45, %v7153_v17  ;;  %v2870_v54 = vadd.f32 %v2862_v11, %v2852_v50  ;;  %v5647_v50 = vld [vmem:[%s7593_s30 + $0x14] sm:$0xf0] }
 0xb18   :  { %v2873_v38 = vadd.f32 %v2865_v39, %v2855_v49  ;;  %v7197_v17 = vadd.f32 %v2879_v32, %v2870_v54  ;;  %v5174_v39 = vld [vmem:[%s7593_s30 + $0x8] sm:$0xf0]  ;;  %v5789_v49 = vld [vmem:[%s7594_s6] ss:$0 sm:$0xff] }
 0xb1a   :  { %v2891_v34 = vmax.f32 %v7197_v17, 0.0 }
 0xb1b   :  { %v2617_v9 = vpop.f32.mrf.mxu2 }
 0xb1c   :  { %v2864_v26 = vmul.f32 %v5788_v8, %v2617_v9 }
 0xb1d   :  { %v2719_v31 = vpop.f32.mrf.mxu0 }
 0xb1e   :  { %v2867_v5 = vmul.f32 %v5787_v45, %v2719_v31  ;;  %v2872_v40 = vadd.f32 %v2864_v26, %v2854_v48  ;;  %v2880_v31 = vperm.slane %v2097_v1, 1  ;;  %v5645_v1 = vld [vmem:[%s7593_s30 + $0x4] sm:$0xf0] }
 0xb20   :  { %v2875_v46 = vadd.f32 %v2867_v5, %v2857_v25  ;;  %v7190_v42 = vadd.f32 %v2879_v32, %v2872_v40  ;;  %v7208_v23 = vadd.f32 %v2880_v31, %v2873_v38  ;;  %v7212_v52 = vadd.f32 %v2880_v31, %v2871_v30  ;;  %v5182_v40 = vld [vmem:[%s7593_s30 + $0x18] sm:$0xf0]  ;;  %v5644_v25 = vld [vmem:[%s7593_s30 + $0x4] sm:$0xf] }
 0xb21   :  { %v5177_v54 = vor.u32 %v5644_v25, %v5174_v39 }
 0xb22   :  { %v7201_v56 = vadd.f32 %v2880_v31, %v2875_v46  ;;  %v2893_v47 = vmax.f32 %v7190_v42, 0.0  ;;  %v2894_v55 = vmax.f32 %v7208_v23, 0.0  ;;  %v2892_v63 = vmax.f32 %v7212_v52, 0.0  ;;  %v5250_v23 = vld [vmem:[%s7598_s26 + $0x10] sm:$0xf] }
 0xb23   :  { %v2620_v10 = vpop.f32.mrf.mxu2 }
 0xb24   :  { %v2866_v3 = vmul.f32 %v5788_v8, %v2620_v10  ;;  %v2899_v21 = vpack.c.bf16 %v2893_v47, %v2891_v34  ;;  %v2900_v29 = vpack.c.bf16 %v2894_v55, %v2892_v63 }
 0xb25   :  { %v2721_v2 = vpop.f32.mrf.mxu0 }
 0xb26   :  { %v2869_v14 = vmul.f32 %v5787_v45, %v2721_v2  ;;  %v2874_v51 = vadd.f32 %v2866_v3, %v2856_v53  ;;  %v5641_v3 = vld [vmem:[%s7592_s24 + $0x30] sm:$0xff]  ;;  %v5640_v2 = vld [vmem:[%s7592_s24 + $0x28] sm:$0xff]  ;;  %v5635_v45 = vld [vmem:[%s7592_s24] sm:$0xff] }
 0xb28   :  { %v2877_v60 = vadd.f32 %v2869_v14, %v2859_v44  ;;  %v7187_v6 = vadd.f32 %v2879_v32, %v2874_v51  ;;  %v2121_v14 = vld [vmem:[%s7593_s30 + $0x20] sm:$0x33]  ;;  %v5180_v51 = vld [vmem:[%s7593_s30 + $0x10] sm:$0xf] }
 0xb29   :  { %v3041_v12 = vunpack.c.l.b16 %v2121_v14  ;;  %v5181_v22 = vor.u32 %v5647_v50, %v5180_v51  ;;  %v5172_v44 = vld [vmem:[%s7593_s30] sm:$0xf] }
 0xb2a   :  { %v7195_v41 = vadd.f32 %v2880_v31, %v2877_v60  ;;  %v2895_v58 = vmax.f32 %v7187_v6, 0.0  ;;  %v5173_v5 = vor.u32 %v5645_v1, %v5172_v44  ;;  %v5537_v44 = vld [vmem:[%s7596_s20] sm:$0xff] }
 0xb2b   :  { %v2622_v36 = vpop.f32.mrf.mxu2  ;;  %v3047_v48 = vpack.c.b16 %v3041_v12, %v3041_v12 }
 0xb2c   :  { %v2868_v9 = vmul.f32 %v5788_v8, %v2622_v36  ;;  %v2898_v28 = vmax.f32 %v7195_v41, 0.0  ;;  %v2896_v8 = vmax.f32 %v7201_v56, 0.0  ;;  %v3042_v36 = vunpack.c.h.b16 %v2121_v14  ;;  %v5658_v56 = vld [vmem:[%s7598_s26 + $0x4] sm:$0xf0]  ;;  %v5244_v41 = vld [vmem:[%s7598_s26 + $0x8] sm:$0xf0] }
 0xb2d   :  { %v3058_v11 = vsel %vm1756_vm4, %v3047_v48, 0 }
 0xb2e   :  { %v2876_v4 = vadd.f32 %v2868_v9, %v2858_v57  ;;  %v2902_v59 = vpack.c.bf16 %v2898_v28, %v2896_v8  ;;  %v3048_v57 = vpack.c.b16 %v3042_v36, %v3042_v36 }
 0xb30   :  { %v7192_v24 = vadd.f32 %v2879_v32, %v2876_v4  ;;  %v5646_v32 = vld [vmem:[%s7593_s30 + $0x14] sm:$0xf]  ;;  %v3061_v9 = vsel %vm1756_vm4, %v3048_v57, 0 }
 0xb31   :  { %v5185_v27 = vor.u32 %v5646_v32, %v5182_v40 }
 0xb32   :  { %v2897_v18 = vmax.f32 %v7192_v24, 0.0 }
 0xb34   :  { %v2901_v10 = vpack.c.bf16 %v2897_v18, %v2895_v58 }
 0xb36   :  { %2913 = vmatpush.bf16.msra.mxu3 %v2901_v10  ;;  %v2122_v10 = vld [vmem:[%s7595_s12] sm:$0x3] }
 0xb3a   :  { %2914 = vmatpush.bf16.msra.mxu3 %v2899_v21  ;;  %v3024_v21 = vperm.slane %v2122_v10, 0 }
 0xb3d   :  { %5131 = vmatmul.msk.bf16.vlgmr.msra.gmra.mxu3 %vm2903_vm14, %v237_v7 }
 0xb3e   :  { %2926 = vmatpush.bf16.msrb.mxu3 %v2902_v59 }
 0xb42   :  { %2927 = vmatpush.bf16.msrb.mxu3 %v2900_v29 }
 0xb46   :  { %2995 = vmatpush.bf16.msra.mxu3 %v5642_v61 }
 0xb4a   :  { %2996 = vmatpush.bf16.msra.mxu3 %v5641_v3 }
 0xb4d   :  { %5132 = vmatmul.msk.bf16.vlgmr.msrb.gmra.mxu3 %vm2903_vm14, %v237_v7 }
 0xb4e   :  { %2997 = vmatpush.bf16.msra.mxu3 %v5640_v2 }
 0xb52   :  { %2998 = vmatpush.bf16.msra.mxu3 %v5639_v62  ;;  %v3025_v62 = vperm.slane %v2122_v10, 1  ;;  %v5648_v10 = vld [vmem:[%s7597_s23] sm:$0xff] }
 0xb56   :  { %2999 = vmatpush.bf16.msra.mxu3 %v5638_v16 }
 0xb5a   :  { %3000 = vmatpush.bf16.msra.mxu3 %v5637_v0 }
 0xb5e   :  { %3001 = vmatpush.bf16.msra.mxu3 %v5636_v13 }
 0xb62   :  { %3002 = vmatpush.bf16.msra.mxu3 %v5635_v45 }
 0xb66   :  { %3015 = vmatpush.bf16.msrb.mxu3 %v5643_v43 }
 0xbc0   :  { %v2916_v53 = vpop.f32.mrf.mxu3 }
 0xbc1   :  { %v2933_v15 = vpack.c.bf16 %v2916_v53, %v2916_v53 }
 0xbc3   :  { %3003 = vmatmul.bf16.vlgmr.msra.gmra.mxu3 %v2933_v15 }
 0xbc4   :  { %3068 = vmatpush.bf16.msra.mxu3 %v3058_v11 }
 0xbc8   :  { %v2918_v26 = vpop.f32.mrf.mxu3  ;;  %3069 = vmatpush.bf16.msra.mxu3 %v5181_v22 }
 0xbcc   :  { %3070 = vmatpush.bf16.msra.mxu3 %v5173_v5 }
 0xbd0   :  { %v2929_v20 = vpop.f32.mrf.mxu3 }
 0xbd1   :  { %v2934_v37 = vpack.c.bf16 %v2929_v20, %v2929_v20 }
 0xbd3   :  { %5169 = vmatmul.msk.bf16.vlgmr.msrb.gmra.mxu3 %vm1730_vm3, %v2934_v37 }
 0xbd4   :  { %3081 = vmatpush.bf16.msrb.mxu3 %v3061_v9 }
 0xbd8   :  { %v2931_v35 = vpop.f32.mrf.mxu3  ;;  %3082 = vmatpush.bf16.msrb.mxu3 %v5185_v27 }
 0xbdc   :  { %3083 = vmatpush.bf16.msrb.mxu3 %v5177_v54 }
 0xc46   :  { %v3004_v60 = vpop.f32.mrf.mxu3 }
 0xc47   :  { %v3005_v33 = vadd.f32 %v5789_v49, %v3004_v60  ;;  %v5655_v49 = vld [vmem:[%s7597_s23 + $0x38] sm:$0xff] }
 0xc48   :  { %3261 = vmatpush.bf16.msrb.mxu2 %v5655_v49 }
 0xc4e   :  { %v3006_v4 = vpop.f32.mrf.mxu3 }
 0xc4f   :  { %v5538_v4 = vld [vmem:[%s7596_s20 + $0x8] sm:$0xff] }
 0xc56   :  { %v3017_v31 = vpop.f32.mrf.mxu3 }
 0xc57   :  { %v3018_v46 = vadd.f32 %v3017_v31, %v3005_v33  ;;  %v5654_v33 = vld [vmem:[%s7597_s23 + $0x30] sm:$0xff]  ;;  %v5653_v31 = vld [vmem:[%s7597_s23 + $0x28] sm:$0xff] }
 0xc58   :  { %3262 = vmatpush.bf16.msrb.mxu2 %v5654_v33 }
 0xc59   :  { %v3021_v19 = vmax.f32 %v3018_v46, 0.0  ;;  %v5652_v46 = vld [vmem:[%s7597_s23 + $0x20] sm:$0xff] }
 0xc5b   :  { %v3022_v38 = vpack.c.bf16 %v3021_v19, %v3021_v19  ;;  %v5651_v19 = vld [vmem:[%s7597_s23 + $0x18] sm:$0xff] }
 0xc5c   :  { %3263 = vmatpush.bf16.msrb.mxu2 %v5653_v31 }
 0xc5d   :  { %5186 = vmatmul.msk.bf16.vlgmr.msra.gmra.mxu3 %vm3053_vm15, %v3022_v38 }
 0xc5e   :  { %v3019_v30 = vpop.f32.mrf.mxu3 }
 0xc5f   :  { %v5649_v30 = vld [vmem:[%s7597_s23 + $0x8] sm:$0xff] }
 0xc60   :  { %3264 = vmatpush.bf16.msrb.mxu2 %v5652_v46 }
 0xc64   :  { %3265 = vmatpush.bf16.msrb.mxu2 %v5651_v19 }
 0xc6d   :  { %5187 = vmatmul.msk.bf16.vlgmr.msrb.gmra.mxu3 %vm3053_vm15, %v3022_v38  ;;  %v5650_v38 = vld [vmem:[%s7597_s23 + $0x10] sm:$0xff] }
 0xc6e   :  { %3266 = vmatpush.bf16.msrb.mxu2 %v5650_v38  ;;  %v3317_v38 = vld [vmem:[%s7601_s2] sm:$0x3] }
 0xc72   :  { %3267 = vmatpush.bf16.msrb.mxu2 %v5649_v30 }
 0xc76   :  { %3268 = vmatpush.bf16.msrb.mxu2 %v5648_v10 }
 0xce0   :  { %v3072_v59 = vpop.f32.mrf.mxu3 }
 0xce1   :  { %v3073_v7 = vadd.f32 %v3072_v59, %v3024_v21 }
 0xce3   :  { %v5188_v61 = vmul.f32 -1.442695, %v3073_v7 }
 0xce5   :  { %5804 = vpow2.f32 %v5188_v61 }
 0xce8   :  { %v3074_v29 = vpop.f32.mrf.mxu3 }
 0xce9   :  { %v5656_v29 = vld [vmem:[%s7597_s23 + $0x40] sm:$0xff] }
 0xceb   :  { %v5805_v3 = vpop.eup %5804 }
 0xcec   :  { %v3095_v2 = vadd.f32 1.0, %v5805_v3 }
 0xcee   :  { %5806 = vrcp.f32 %v3095_v2  ;;  %v3108_v26 = vand.u32 2147483648, %v3095_v2  ;;  %v3106_v37 = vand.u32 2147483647, %v3095_v2  ;;  %vm3102_vm1 = vweird.f32 %v3095_v2 }
 0xcf0   :  { %v3085_v16 = vpop.f32.mrf.mxu3  ;;  %v3109_v48 = vor.u32 1.1754944e-38, %v3108_v26  ;;  %vm3107_vm4 = vcmp.eq.f32.partialorder %v3106_v37, 8.507059e+37  ;;  %v5242_v26 = vld [vmem:[%s7598_s26] sm:$0xf] }
 0xcf1   :  { %v3086_v0 = vadd.f32 %v3085_v16, %v3025_v62 }
 0xcf3   :  { %v5189_v13 = vmul.f32 -1.442695, %v3086_v0 }
 0xcf4   :  { %v5807_v45 = vpop.eup %5806 }
 0xcf5   :  { %v3098_v43 = vmul.f32 %v5807_v45, %v3095_v2  ;;  %5808 = vpow2.f32 %v5189_v13  ;;  %vm3103_vm0 = vweird.f32 %v5807_v45 }
 0xcf6   :  { %vm3104_vm2 = vmor %vm3102_vm1, %vm3103_vm0 }
 0xcf7   :  { %v3099_v53 = vsub.f32 1.0, %v3098_v43 }
 0xcf8   :  { %v3087_v15 = vpop.f32.mrf.mxu3 }
 0xcf9   :  { %v3100_v20 = vmul.f32 %v5807_v45, %v3099_v53  ;;  %v5252_v53 = vld [vmem:[%s7598_s26 + $0x18] sm:$0xf0] }
 0xcfb   :  { %v5809_v35 = vpop.eup %5808  ;;  %v3101_v14 = vadd.f32 %v5807_v45, %v3100_v20  ;;  %v5243_v20 = vor.u32 %v5658_v56, %v5242_v26 }
 0xcfc   :  { %v3096_v12 = vadd.f32 1.0, %v5809_v35 }
 0xcfd   :  { %v3105_v11 = vsel %vm3104_vm2, %v5807_v45, %v3101_v14 }
 0xcfe   :  { %5810 = vrcp.f32 %v3096_v12  ;;  %v3110_v51 = vsel %vm3107_vm4, %v3109_v48, %v3105_v11  ;;  %v3123_v57 = vand.u32 2147483648, %v3096_v12  ;;  %v3121_v40 = vand.u32 2147483647, %v3096_v12  ;;  %v5790_v48 = vld [vmem:[%s7599_s28] ss:$0 sm:$0xff] }
 0xcff   :  { %v3127_v50 = vpack.c.bf16 %v3110_v51, %v3110_v51  ;;  %vm3117_vm6 = vweird.f32 %v3096_v12 }
 0xd00   :  { %v3124_v27 = vor.u32 1.1754944e-38, %v3123_v57  ;;  %vm3122_vm8 = vcmp.eq.f32.partialorder %v3121_v40, 8.507059e+37 }
 0xd01   :  { %v3146_v22 = vsel %vm1858_vm10, %v3127_v50, 0  ;;  %v5791_v50 = vld [vmem:[%s7600_s1] ss:$0 sm:$0xff] }
 0xd02   :  { %3158 = vmatpush.bf16.msra.mxu3 %v3146_v22 }
 0xd04   :  { %v5811_v1 = vpop.eup %5810 }
 0xd05   :  { %v3113_v5 = vmul.f32 %v5811_v1, %v3096_v12  ;;  %5198 = vmatmul.msk.bf16.vlgmr.msra.gmra.mxu3 %vm1833_vm11, %v5537_v44  ;;  %vm3118_vm5 = vweird.f32 %v5811_v1 }
 0xd06   :  { %vm3119_vm7 = vmor %vm3117_vm6, %vm3118_vm5 }
 0xd07   :  { %v3114_v36 = vsub.f32 1.0, %v3113_v5 }
 0xd09   :  { %v3115_v32 = vmul.f32 %v5811_v1, %v3114_v36 }
 0xd0b   :  { %v3116_v9 = vadd.f32 %v5811_v1, %v3115_v32 }
 0xd0d   :  { %v3120_v25 = vsel %vm3119_vm7, %v5811_v1, %v3116_v9 }
 0xd0e   :  { %v3125_v39 = vsel %vm3122_vm8, %v3124_v27, %v3120_v25 }
 0xd0f   :  { %v3128_v60 = vpack.c.bf16 %v3125_v39, %v3125_v39 }
 0xd11   :  { %v3149_v54 = vsel %vm1858_vm10, %v3128_v60, 0 }
 0xd12   :  { %3177 = vmatpush.bf16.msrb.mxu3 %v3149_v54 }
 0xd15   :  { %5199 = vmatmul.msk.bf16.gmra.mxu3 %vm1833_vm11, %v5538_v4 }
 0xd16   :  { %3287 = vmatpush.bf16.msra.mxu3 %v5656_v29 }
 0xd25   :  { %5200 = vmatmul.msk.bf16.vlgmr.msrb.gmra.mxu3 %vm1833_vm11, %v5537_v44 }
 0xd35   :  { %5201 = vmatmul.msk.bf16.gmra.mxu3 %vm1833_vm11, %v5538_v4 }
 0xd88   :  { %v3160_v21 = vpop.f32.mrf.mxu3 }
 0xd89   :  { %v3189_v7 = vmul.f32 %v3160_v21, %v2891_v34  ;;  %v3485_v21 = vperm.slane %v3317_v38, 0 }
 0xd90   :  { %v3162_v59 = vpop.f32.mrf.mxu3 }
 0xd91   :  { %v3191_v61 = vmul.f32 %v3162_v59, %v2893_v47  ;;  %v3486_v59 = vperm.slane %v3317_v38, 1 }
 0xd93   :  { %v3197_v3 = vpack.c.bf16 %v3191_v61, %v3189_v7  ;;  %v3318_v7 = vld [vmem:[%s7602_s7] sm:$0x3] }
 0xd95   :  { %3269 = vmatmul.bf16.vlgmr.msrb.gmra.mxu2 %v3197_v3  ;;  %v3498_v3 = vperm.slane %v3318_v7, 0 }
 0xd98   :  { %v3165_v2 = vpop.f32.mrf.mxu3 }
 0xd99   :  { %v3193_v16 = vmul.f32 %v3165_v2, %v2895_v58  ;;  %v3499_v2 = vperm.slane %v3318_v7, 1 }
 0xda0   :  { %v3167_v62 = vpop.f32.mrf.mxu3 }
 0xda1   :  { %v3195_v0 = vmul.f32 %v3167_v62, %v2897_v18 }
 0xda3   :  { %v3199_v13 = vpack.c.bf16 %v3195_v0, %v3193_v16 }
 0xda5   :  { %3274 = vmatmul.bf16.gmra.mxu2 %v3199_v13 }
 0xda8   :  { %v3179_v17 = vpop.f32.mrf.mxu3 }
 0xda9   :  { %v3190_v47 = vmul.f32 %v3179_v17, %v2892_v63  ;;  %v5659_v63 = vld [vmem:[%s7598_s26 + $0x14] sm:$0xf] }
 0xdaa   :  { %v5255_v15 = vor.u32 %v5659_v63, %v5252_v53 }
 0xdac   :  { %3471 = vmatpush.bf16.msrb.mxu3 %v5255_v15 }
 0xdb0   :  { %v3181_v42 = vpop.f32.mrf.mxu3 }
 0xdb1   :  { %v3192_v34 = vmul.f32 %v3181_v42, %v2894_v55  ;;  %v5660_v55 = vld [vmem:[%s7598_s26 + $0x14] sm:$0xf0] }
 0xdb2   :  { %v5251_v43 = vor.u32 %v5660_v55, %v5250_v23 }
 0xdb3   :  { %v3198_v45 = vpack.c.bf16 %v3192_v34, %v3190_v47 }
 0xdb4   :  { %3452 = vmatpush.bf16.msra.mxu2 %v5251_v43 }
 0xdb5   :  { %5238 = vmatmul.msk.bf16.vlgmr.msra.gmra.mxu3 %vm1730_vm3, %v3198_v45 }
 0xdb8   :  { %v3184_v6 = vpop.f32.mrf.mxu3  ;;  %3453 = vmatpush.bf16.msra.mxu2 %v5243_v20 }
 0xdb9   :  { %v3194_v58 = vmul.f32 %v3184_v6, %v2896_v8  ;;  %v5657_v8 = vld [vmem:[%s7598_s26 + $0x4] sm:$0xf] }
 0xdba   :  { %v5247_v37 = vor.u32 %v5657_v8, %v5244_v41 }
 0xdbc   :  { %3472 = vmatpush.bf16.msrb.mxu3 %v5247_v37 }
 0xdc0   :  { %v3186_v24 = vpop.f32.mrf.mxu3 }
 0xdc1   :  { %v3196_v18 = vmul.f32 %v3186_v24, %v2898_v28 }
 0xdc3   :  { %v3200_v52 = vpack.c.bf16 %v3196_v18, %v3194_v58 }
 0xdc5   :  { %5239 = vmatmul.msk.bf16.gmra.mxu3 %vm1730_vm3, %v3200_v52  ;;  %vm4146_vm3 = vcmask 523264  }
 0xe18   :  { %v3270_v28 = vpop.f32.mrf.mxu2 }
 0xe20   :  { %v3272_v14 = vpop.f32.mrf.mxu2 }
 0xe28   :  { %v3275_v36 = vpop.f32.mrf.mxu2 }
 0xe30   :  { %v3277_v9 = vpop.f32.mrf.mxu2 }
 0xe38   :  { %v3289_v35 = vpop.f32.mrf.mxu3 }
 0xe39   :  { %v3290_v12 = vadd.f32 %v3289_v35, %v3270_v28 }
 0xe3b   :  { %v3302_v51 = vmul.f32 %v5790_v48, %v3290_v12  ;;  %v5662_v12 = vld [vmem:[%s7603_s10 + $0x8] sm:$0xff] }
 0xe3d   :  { %v7300_v1 = vadd.f32 %v5791_v50, %v3302_v51  ;;  %v5665_v51 = vld [vmem:[%s7603_s10 + $0x20] sm:$0xff] }
 0xe40   :  { %v3291_v11 = vpop.f32.mrf.mxu3 }
 0xe41   :  { %v3292_v22 = vadd.f32 %v3291_v11, %v3272_v14  ;;  %v5661_v14 = vld [vmem:[%s7603_s10] sm:$0xff]  ;;  %v5664_v11 = vld [vmem:[%s7603_s10 + $0x18] sm:$0xff] }
 0xe43   :  { %v3303_v44 = vmul.f32 %v5790_v48, %v3292_v22  ;;  %v5667_v22 = vld [vmem:[%s7603_s10 + $0x30] sm:$0xff] }
 0xe45   :  { %v7302_v5 = vadd.f32 %v5791_v50, %v3303_v44  ;;  %v5668_v44 = vld [vmem:[%s7603_s10 + $0x38] sm:$0xff] }
 0xe47   :  { %v3418_v57 = vpack.c.bf16 %v7302_v5, %v7300_v1 }
 0xe48   :  { %v3294_v32 = vpop.f32.mrf.mxu3 }
 0xe49   :  { %5256 = vmatmul.msk.bf16.vlgmr.msra.gmra.mxu2 %vm2903_vm14, %v3418_v57  ;;  %5258 = vmatmul.msk.bf16.vlgmr.msrb.gmra.mxu3 %vm2903_vm14, %v3418_v57  ;;  %v3295_v40 = vadd.f32 %v3294_v32, %v3275_v36  ;;  %v5669_v36 = vld [vmem:[%s7603_s10 + $0x40] sm:$0xff] }
 0xe4b   :  { %v3304_v25 = vmul.f32 %v5790_v48, %v3295_v40 }
 0xe4d   :  { %v7308_v54 = vadd.f32 %v5791_v50, %v3304_v25 }
 0xe50   :  { %v3296_v27 = vpop.f32.mrf.mxu3 }
 0xe51   :  { %v3297_v39 = vadd.f32 %v3296_v27, %v3277_v9  ;;  %v5670_v27 = vld [vmem:[%s7603_s10 + $0x48] sm:$0xff] }
 0xe53   :  { %v3305_v60 = vmul.f32 %v5790_v48, %v3297_v39  ;;  %v5663_v48 = vld [vmem:[%s7603_s10 + $0x10] sm:$0xff] }
 0xe55   :  { %v7310_v4 = vadd.f32 %v5791_v50, %v3305_v60  ;;  %v5666_v50 = vld [vmem:[%s7603_s10 + $0x28] sm:$0xff] }
 0xe57   :  { %v3419_v49 = vpack.c.bf16 %v7310_v4, %v7308_v54 }
 0xe59   :  { %5257 = vmatmul.msk.bf16.gmra.mxu2 %vm2903_vm14, %v3419_v49  ;;  %5259 = vmatmul.msk.bf16.gmra.mxu3 %vm2903_vm14, %v3419_v49 }
 0xecc   :  { %v3455_v33 = vpop.f32.mrf.mxu2  ;;  %v3474_v31 = vpop.f32.mrf.mxu3 }
 0xecd   :  { %v3489_v0 = vmul.f32 %v3485_v21, %v3455_v33  ;;  %v3490_v13 = vmul.f32 %v3486_v59, %v3474_v31  ;;  %v5671_v33 = vld [vmem:[%s7603_s10 + $0x50] sm:$0xff]  ;;  %v7350_v31 = vld [vmem:[%s7604_s11] sm:$0xff] }
 0xecf   :  { %v3502_v23 = vadd.f32 %v3498_v3, %v3489_v0  ;;  %v3503_v55 = vadd.f32 %v3499_v2, %v3490_v13 }
 0xed1   :  { %v3510_v41 = vmax.f32 %v3502_v23, 0.0  ;;  %v3511_v37 = vmax.f32 %v3503_v55, 0.0 }
 0xed4   :  { %v3457_v46 = vpop.f32.mrf.mxu2  ;;  %v3476_v19 = vpop.f32.mrf.mxu3 }
 0xed5   :  { %v3491_v62 = vmul.f32 %v3485_v21, %v3457_v46  ;;  %v3492_v16 = vmul.f32 %v3486_v59, %v3476_v19  ;;  %v7353_v46 = vld [vmem:[%s7604_s11 + $0x8] sm:$0xff]  ;;  %v3864_v19 = vperm.slane %v7350_v31, 0 }
 0xed6   :  { %v3865_v38 = vperm.slane %v7353_v46, 0 }
 0xed7   :  { %v3504_v24 = vadd.f32 %v3498_v3, %v3491_v62  ;;  %v3505_v58 = vadd.f32 %v3499_v2, %v3492_v16 }
 0xed9   :  { %v3512_v26 = vmax.f32 %v3504_v24, 0.0  ;;  %v3513_v56 = vmax.f32 %v3505_v58, 0.0 }
 0xedb   :  { %v3518_v28 = vpack.c.bf16 %v3512_v26, %v3510_v41  ;;  %v3519_v35 = vpack.c.bf16 %v3513_v56, %v3511_v37  ;;  %v5673_v41 = vld [vmem:[%s7603_s10 + $0x60] sm:$0xff] }
 0xedc   :  { %v3460_v30 = vpop.f32.mrf.mxu2  ;;  %v3479_v10 = vpop.f32.mrf.mxu3 }
 0xedd   :  { %v3493_v61 = vmul.f32 %v3485_v21, %v3460_v30  ;;  %v3494_v29 = vmul.f32 %v3486_v59, %v3479_v10  ;;  %v3874_v30 = vperm.slane %v7350_v31, 1  ;;  %v3875_v10 = vperm.slane %v7353_v46, 1 }
 0xedf   :  { %v3506_v47 = vadd.f32 %v3498_v3, %v3493_v61  ;;  %v3507_v34 = vadd.f32 %v3499_v2, %v3494_v29 }
 0xee1   :  { %v3514_v63 = vmax.f32 %v3506_v47, 0.0  ;;  %v3515_v43 = vmax.f32 %v3507_v34, 0.0  ;;  %v5672_v34 = vld [vmem:[%s7603_s10 + $0x58] sm:$0xff] }
 0xee4   :  { %v3462_v17 = vpop.f32.mrf.mxu2  ;;  %v3481_v42 = vpop.f32.mrf.mxu3 }
 0xee5   :  { %v3495_v45 = vmul.f32 %v3485_v21, %v3462_v17  ;;  %v3496_v6 = vmul.f32 %v3486_v59, %v3481_v42 }
 0xee7   :  { %v3508_v18 = vadd.f32 %v3498_v3, %v3495_v45  ;;  %v3509_v52 = vadd.f32 %v3499_v2, %v3496_v6 }
 0xee9   :  { %v3516_v53 = vmax.f32 %v3508_v18, 0.0  ;;  %v3517_v15 = vmax.f32 %v3509_v52, 0.0 }
 0xeeb   :  { %v3520_v8 = vpack.c.bf16 %v3516_v53, %v3514_v63  ;;  %v3521_v20 = vpack.c.bf16 %v3517_v15, %v3515_v43 }
 0xeed   :  { %3672 = vmatpush.bf16.msrb.mxu2 %v3520_v8  ;;  %3771 = vmatpush.bf16.msra.mxu3 %v3521_v20 }
 0xef1   :  { %3673 = vmatpush.bf16.msrb.mxu2 %v3518_v28  ;;  %3772 = vmatpush.bf16.msra.mxu3 %v3519_v35  ;;  %v3892_v35 = vperm.slane %v7350_v31, 2 }
 0xef4   :  { %5332 = vmatmul.msk.bf16.vlgmr.msrb.gmra.mxu2 %vm2903_vm14, %v5661_v14  ;;  %5350 = vmatmul.msk.bf16.vlgmr.msra.gmra.mxu3 %vm2903_vm14, %v5661_v14  ;;  %v3893_v14 = vperm.slane %v7353_v46, 2 }
 0xf04   :  { %5333 = vmatmul.msk.bf16.gmra.mxu2 %vm2903_vm14, %v5662_v12  ;;  %5351 = vmatmul.msk.bf16.gmra.mxu3 %vm2903_vm14, %v5662_v12 }
 0xf14   :  { %5334 = vmatmul.msk.bf16.gmra.mxu2 %vm2903_vm14, %v5663_v48  ;;  %5352 = vmatmul.msk.bf16.gmra.mxu3 %vm2903_vm14, %v5663_v48 }
 0xf24   :  { %5335 = vmatmul.msk.bf16.gmra.mxu2 %vm2903_vm14, %v5664_v11  ;;  %5353 = vmatmul.msk.bf16.gmra.mxu3 %vm2903_vm14, %v5664_v11 }
 0xf34   :  { %5336 = vmatmul.msk.bf16.gmra.mxu2 %vm2903_vm14, %v5665_v51  ;;  %5354 = vmatmul.msk.bf16.gmra.mxu3 %vm2903_vm14, %v5665_v51 }
 0xf44   :  { %5337 = vmatmul.msk.bf16.gmra.mxu2 %vm2903_vm14, %v5666_v50  ;;  %5355 = vmatmul.msk.bf16.gmra.mxu3 %vm2903_vm14, %v5666_v50 }
 0xf54   :  { %5338 = vmatmul.msk.bf16.gmra.mxu2 %vm2903_vm14, %v5667_v22  ;;  %5356 = vmatmul.msk.bf16.gmra.mxu3 %vm2903_vm14, %v5667_v22 }
 0xf64   :  { %5339 = vmatmul.msk.bf16.gmra.mxu2 %vm2903_vm14, %v5668_v44  ;;  %5357 = vmatmul.msk.bf16.gmra.mxu3 %vm2903_vm14, %v5668_v44 }
 0xf74   :  { %5340 = vmatmul.msk.bf16.gmra.mxu2 %vm2903_vm14, %v5669_v36  ;;  %5358 = vmatmul.msk.bf16.gmra.mxu3 %vm2903_vm14, %v5669_v36 }
 0xf77   :  { %v3675_v57 = vpop.f32.mrf.mxu2  ;;  %v3774_v32 = vpop.f32.mrf.mxu3 }
 0xf78   :  { %v3866_v7 = vmul.f32 %v3864_v19, %v3675_v57  ;;  %v3867_v61 = vmul.f32 %v3865_v38, %v3774_v32 }
 0xf7f   :  { %v3677_v40 = vpop.f32.mrf.mxu2  ;;  %v3776_v9 = vpop.f32.mrf.mxu3 }
 0xf80   :  { %v3868_v13 = vmul.f32 %v3864_v19, %v3677_v40  ;;  %v3869_v17 = vmul.f32 %v3865_v38, %v3776_v9  ;;  %v5674_v40 = vld [vmem:[%s7603_s10 + $0x68] sm:$0xff] }
 0xf84   :  { %5341 = vmatmul.msk.bf16.gmra.mxu2 %vm2903_vm14, %v5670_v27  ;;  %5359 = vmatmul.msk.bf16.gmra.mxu3 %vm2903_vm14, %v5670_v27 }
 0xf87   :  { %v3680_v25 = vpop.f32.mrf.mxu2  ;;  %v3779_v39 = vpop.f32.mrf.mxu3 }
 0xf88   :  { %v3870_v18 = vmul.f32 %v3864_v19, %v3680_v25  ;;  %v3871_v52 = vmul.f32 %v3865_v38, %v3779_v39 }
 0xf8f   :  { %v3682_v60 = vpop.f32.mrf.mxu2  ;;  %v3781_v49 = vpop.f32.mrf.mxu3 }
 0xf90   :  { %v3872_v26 = vmul.f32 %v3864_v19, %v3682_v60  ;;  %v3873_v56 = vmul.f32 %v3865_v38, %v3781_v49 }
 0xf94   :  { %5342 = vmatmul.msk.bf16.gmra.mxu2 %vm2903_vm14, %v5671_v33  ;;  %5360 = vmatmul.msk.bf16.gmra.mxu3 %vm2903_vm14, %v5671_v33 }
 0xf97   :  { %v3685_v21 = vpop.f32.mrf.mxu2  ;;  %v3784_v59 = vpop.f32.mrf.mxu3 }
 0xf98   :  { %v3876_v29 = vmul.f32 %v3874_v30, %v3685_v21  ;;  %v3877_v3 = vmul.f32 %v3875_v10, %v3784_v59  ;;  %v5675_v59 = vld [vmem:[%s7603_s10 + $0x70] sm:$0xff] }
 0xf9a   :  { %v3884_v2 = vadd.f32 %v3876_v29, %v3866_v7  ;;  %v3885_v62 = vadd.f32 %v3877_v3, %v3867_v61  ;;  %v3910_v29 = vperm.slane %v7350_v31, 3  ;;  %v3911_v3 = vperm.slane %v7353_v46, 3 }
 0xf9f   :  { %v3687_v16 = vpop.f32.mrf.mxu2  ;;  %v3786_v0 = vpop.f32.mrf.mxu3 }
 0xfa0   :  { %v3878_v42 = vmul.f32 %v3874_v30, %v3687_v16  ;;  %v3879_v47 = vmul.f32 %v3875_v10, %v3786_v0 }
 0xfa2   :  { %v3886_v45 = vadd.f32 %v3878_v42, %v3868_v13  ;;  %v3887_v6 = vadd.f32 %v3879_v47, %v3869_v17 }
 0xfa4   :  { %5343 = vmatmul.msk.bf16.gmra.mxu2 %vm2903_vm14, %v5672_v34  ;;  %5361 = vmatmul.msk.bf16.gmra.mxu3 %vm2903_vm14, %v5672_v34  ;;  %v5676_v34 = vld [vmem:[%s7603_s10 + $0x78] sm:$0xff] }
 0xfa7   :  { %v3690_v24 = vpop.f32.mrf.mxu2  ;;  %v3789_v58 = vpop.f32.mrf.mxu3 }
 0xfa8   :  { %v3880_v23 = vmul.f32 %v3874_v30, %v3690_v24  ;;  %v3881_v55 = vmul.f32 %v3875_v10, %v3789_v58 }
 0xfaa   :  { %v3888_v63 = vadd.f32 %v3880_v23, %v3870_v18  ;;  %v3889_v43 = vadd.f32 %v3881_v55, %v3871_v52 }
 0xfaf   :  { %v3692_v53 = vpop.f32.mrf.mxu2  ;;  %v3791_v15 = vpop.f32.mrf.mxu3 }
 0xfb0   :  { %v3882_v8 = vmul.f32 %v3874_v30, %v3692_v53  ;;  %v3883_v20 = vmul.f32 %v3875_v10, %v3791_v15  ;;  %v5677_v53 = vld [vmem:[%s7603_s10 + $0x80] sm:$0xff] }
 0xfb2   :  { %v3890_v37 = vadd.f32 %v3882_v8, %v3872_v26  ;;  %v3891_v28 = vadd.f32 %v3883_v20, %v3873_v56  ;;  %v3928_v56 = vperm.slane %v7350_v31, 4  ;;  %v3929_v8 = vperm.slane %v7353_v46, 4 }
 0xfb4   :  { %5344 = vmatmul.msk.bf16.gmra.mxu2 %vm2903_vm14, %v5673_v41  ;;  %5362 = vmatmul.msk.bf16.gmra.mxu3 %vm2903_vm14, %v5673_v41 }
 0xfb7   :  { %v3695_v12 = vpop.f32.mrf.mxu2  ;;  %v3794_v48 = vpop.f32.mrf.mxu3 }
 0xfb8   :  { %v3894_v11 = vmul.f32 %v3892_v35, %v3695_v12  ;;  %v3895_v51 = vmul.f32 %v3893_v14, %v3794_v48 }
 0xfba   :  { %v3902_v50 = vadd.f32 %v3894_v11, %v3884_v2  ;;  %v3903_v22 = vadd.f32 %v3895_v51, %v3885_v62 }
 0xfbf   :  { %v3697_v44 = vpop.f32.mrf.mxu2  ;;  %v3796_v36 = vpop.f32.mrf.mxu3 }
 0xfc0   :  { %v3896_v57 = vmul.f32 %v3892_v35, %v3697_v44  ;;  %v3897_v32 = vmul.f32 %v3893_v14, %v3796_v36 }
 0xfc2   :  { %v3904_v9 = vadd.f32 %v3896_v57, %v3886_v45  ;;  %v3905_v27 = vadd.f32 %v3897_v32, %v3887_v6  ;;  %v5678_v57 = vld [vmem:[%s7603_s10 + $0x88] sm:$0xff] }
 0xfc4   :  { %5345 = vmatmul.msk.bf16.gmra.mxu2 %vm2903_vm14, %v5674_v40  ;;  %5363 = vmatmul.msk.bf16.gmra.mxu3 %vm2903_vm14, %v5674_v40 }
 0xfc7   :  { %v3700_v25 = vpop.f32.mrf.mxu2  ;;  %v3799_v39 = vpop.f32.mrf.mxu3 }
 0xfc8   :  { %v3898_v60 = vmul.f32 %v3892_v35, %v3700_v25  ;;  %v3899_v49 = vmul.f32 %v3893_v14, %v3799_v39 }
 0xfca   :  { %v3906_v33 = vadd.f32 %v3898_v60, %v3888_v63  ;;  %v3907_v19 = vadd.f32 %v3899_v49, %v3889_v43 }
 0xfcf   :  { %v3702_v38 = vpop.f32.mrf.mxu2  ;;  %v3801_v30 = vpop.f32.mrf.mxu3 }
 0xfd0   :  { %v3900_v10 = vmul.f32 %v3892_v35, %v3702_v38  ;;  %v3901_v21 = vmul.f32 %v3893_v14, %v3801_v30 }
 0xfd2   :  { %v3908_v7 = vadd.f32 %v3900_v10, %v3890_v37  ;;  %v3909_v61 = vadd.f32 %v3901_v21, %v3891_v28 }
 0xfd4   :  { %5346 = vmatmul.msk.bf16.gmra.mxu2 %vm2903_vm14, %v5675_v59  ;;  %5364 = vmatmul.msk.bf16.gmra.mxu3 %vm2903_vm14, %v5675_v59  ;;  %v3946_v59 = vperm.slane %v7350_v31, 5 }
 0xfd7   :  { %v3705_v2 = vpop.f32.mrf.mxu2  ;;  %v3804_v62 = vpop.f32.mrf.mxu3 }
 0xfd8   :  { %v3912_v16 = vmul.f32 %v3910_v29, %v3705_v2  ;;  %v3913_v0 = vmul.f32 %v3911_v3, %v3804_v62 }
 0xfda   :  { %v3920_v13 = vadd.f32 %v3912_v16, %v3902_v50  ;;  %v3921_v17 = vadd.f32 %v3913_v0, %v3903_v22 }
 0xfdf   :  { %v3707_v42 = vpop.f32.mrf.mxu2  ;;  %v3806_v47 = vpop.f32.mrf.mxu3 }
 0xfe0   :  { %v3914_v12 = vmul.f32 %v3910_v29, %v3707_v42  ;;  %v3915_v48 = vmul.f32 %v3911_v3, %v3806_v47 }
 0xfe2   :  { %v3922_v50 = vadd.f32 %v3914_v12, %v3904_v9  ;;  %v3923_v22 = vadd.f32 %v3915_v48, %v3905_v27 }
 0xfe4   :  { %5347 = vmatmul.msk.bf16.gmra.mxu2 %vm2903_vm14, %v5676_v34  ;;  %5365 = vmatmul.msk.bf16.gmra.mxu3 %vm2903_vm14, %v5676_v34 }
 0xfe7   :  { %v3710_v45 = vpop.f32.mrf.mxu2  ;;  %v3809_v6 = vpop.f32.mrf.mxu3 }
 0xfe8   :  { %v3916_v24 = vmul.f32 %v3910_v29, %v3710_v45  ;;  %v3917_v58 = vmul.f32 %v3911_v3, %v3809_v6 }
 0xfea   :  { %v3924_v18 = vadd.f32 %v3916_v24, %v3906_v33  ;;  %v3925_v52 = vadd.f32 %v3917_v58, %v3907_v19 }
 0xfef   :  { %v3712_v23 = vpop.f32.mrf.mxu2  ;;  %v3811_v55 = vpop.f32.mrf.mxu3 }
 0xff0   :  { %v3918_v63 = vmul.f32 %v3910_v29, %v3712_v23  ;;  %v3919_v43 = vmul.f32 %v3911_v3, %v3811_v55 }
 0xff2   :  { %v3926_v15 = vadd.f32 %v3918_v63, %v3908_v7  ;;  %v3927_v26 = vadd.f32 %v3919_v43, %v3909_v61  ;;  %v3947_v7 = vperm.slane %v7353_v46, 5 }
 0xff4   :  { %5348 = vmatmul.msk.bf16.gmra.mxu2 %vm2903_vm14, %v5677_v53  ;;  %5366 = vmatmul.msk.bf16.gmra.mxu3 %vm2903_vm14, %v5677_v53 }
 0xff7   :  { %v3715_v20 = vpop.f32.mrf.mxu2  ;;  %v3814_v41 = vpop.f32.mrf.mxu3 }
 0xff8   :  { %v3930_v37 = vmul.f32 %v3928_v56, %v3715_v20  ;;  %v3931_v28 = vmul.f32 %v3929_v8, %v3814_v41 }
 0xffa   :  { %v3938_v35 = vadd.f32 %v3930_v37, %v3920_v13  ;;  %v3939_v14 = vadd.f32 %v3931_v28, %v3921_v17 }
 0xfff   :  { %v3717_v11 = vpop.f32.mrf.mxu2  ;;  %v3816_v51 = vpop.f32.mrf.mxu3 }
0x1000   :  { %v3932_v44 = vmul.f32 %v3928_v56, %v3717_v11  ;;  %v3933_v36 = vmul.f32 %v3929_v8, %v3816_v51 }
0x1002   :  { %v3940_v32 = vadd.f32 %v3932_v44, %v3922_v50  ;;  %v3941_v40 = vadd.f32 %v3933_v36, %v3923_v22 }
0x1004   :  { %5349 = vmatmul.msk.bf16.gmra.mxu2 %vm2903_vm14, %v5678_v57  ;;  %5367 = vmatmul.msk.bf16.gmra.mxu3 %vm2903_vm14, %v5678_v57 }
0x1007   :  { %v3720_v25 = vpop.f32.mrf.mxu2  ;;  %v3819_v39 = vpop.f32.mrf.mxu3 }
0x1008   :  { %v3934_v60 = vmul.f32 %v3928_v56, %v3720_v25  ;;  %v3935_v49 = vmul.f32 %v3929_v8, %v3819_v39 }
0x100a   :  { %v3942_v33 = vadd.f32 %v3934_v60, %v3924_v18  ;;  %v3943_v19 = vadd.f32 %v3935_v49, %v3925_v52 }
0x100f   :  { %v3722_v38 = vpop.f32.mrf.mxu2  ;;  %v3821_v30 = vpop.f32.mrf.mxu3 }
0x1010   :  { %v3936_v10 = vmul.f32 %v3928_v56, %v3722_v38  ;;  %v3937_v9 = vmul.f32 %v3929_v8, %v3821_v30  ;;  %v3965_v56 = vperm.slane %v7353_v46, 6 }
0x1012   :  { %v3944_v27 = vadd.f32 %v3936_v10, %v3926_v15  ;;  %v3945_v21 = vadd.f32 %v3937_v9, %v3927_v26  ;;  %v3964_v26 = vperm.slane %v7350_v31, 6 }
0x1017   :  { %v3725_v61 = vpop.f32.mrf.mxu2  ;;  %v3824_v29 = vpop.f32.mrf.mxu3 }
0x1018   :  { %v3948_v3 = vmul.f32 %v3946_v59, %v3725_v61  ;;  %v3949_v2 = vmul.f32 %v3947_v7, %v3824_v29  ;;  %v3982_v61 = vperm.slane %v7350_v31, 7 }
0x101a   :  { %v3956_v62 = vadd.f32 %v3948_v3, %v3938_v35  ;;  %v3957_v16 = vadd.f32 %v3949_v2, %v3939_v14 }
0x101f   :  { %v3727_v0 = vpop.f32.mrf.mxu2  ;;  %v3826_v13 = vpop.f32.mrf.mxu3 }
0x1020   :  { %v3950_v17 = vmul.f32 %v3946_v59, %v3727_v0  ;;  %v3951_v42 = vmul.f32 %v3947_v7, %v3826_v13 }
0x1022   :  { %v3958_v47 = vadd.f32 %v3950_v17, %v3940_v32  ;;  %v3959_v34 = vadd.f32 %v3951_v42, %v3941_v40  ;;  %v3983_v17 = vperm.slane %v7353_v46, 7 }
0x1027   :  { %v3730_v45 = vpop.f32.mrf.mxu2  ;;  %v3829_v6 = vpop.f32.mrf.mxu3 }
0x1028   :  { %v3952_v24 = vmul.f32 %v3946_v59, %v3730_v45  ;;  %v3953_v58 = vmul.f32 %v3947_v7, %v3829_v6 }
0x102a   :  { %v3960_v18 = vadd.f32 %v3952_v24, %v3942_v33  ;;  %v3961_v52 = vadd.f32 %v3953_v58, %v3943_v19  ;;  %v3359_v24 = vld [vmem:[%s7605_s15] sm:$0x3] }
0x102f   :  { %v3732_v23 = vpop.f32.mrf.mxu2  ;;  %v3831_v55 = vpop.f32.mrf.mxu3 }
0x1030   :  { %v3954_v63 = vmul.f32 %v3946_v59, %v3732_v23  ;;  %v3955_v43 = vmul.f32 %v3947_v7, %v3831_v55  ;;  %v5793_v23 = vld [vmem:[%s7604_s11 + $0x18] ss:$0 sm:$0xff] }
0x1032   :  { %v3962_v53 = vadd.f32 %v3954_v63, %v3944_v27  ;;  %v3963_v15 = vadd.f32 %v3955_v43, %v3945_v21 }
0x1037   :  { %v3735_v8 = vpop.f32.mrf.mxu2  ;;  %v3834_v20 = vpop.f32.mrf.mxu3 }
0x1038   :  { %v3966_v41 = vmul.f32 %v3964_v26, %v3735_v8  ;;  %v3967_v37 = vmul.f32 %v3965_v56, %v3834_v20  ;;  %v4019_v20 = vperm.slane %v3359_v24, 0 }
0x103a   :  { %v3974_v28 = vadd.f32 %v3966_v41, %v3956_v62  ;;  %v7392_v35 = vadd.f32 %v3967_v37, %v3957_v16  ;;  %v5792_v62 = vld [vmem:[%s7604_s11 + $0x10] ss:$0 sm:$0xff] }
0x103f   :  { %v3737_v14 = vpop.f32.mrf.mxu2  ;;  %v3836_v12 = vpop.f32.mrf.mxu3 }
0x1040   :  { %v3968_v48 = vmul.f32 %v3964_v26, %v3737_v14  ;;  %v3969_v11 = vmul.f32 %v3965_v56, %v3836_v12 }
0x1042   :  { %v3976_v51 = vadd.f32 %v3968_v48, %v3958_v47  ;;  %v3977_v50 = vadd.f32 %v3969_v11, %v3959_v34 }
0x1047   :  { %v3740_v22 = vpop.f32.mrf.mxu2  ;;  %v3839_v44 = vpop.f32.mrf.mxu3 }
0x1048   :  { %v3970_v36 = vmul.f32 %v3964_v26, %v3740_v22  ;;  %v3971_v57 = vmul.f32 %v3965_v56, %v3839_v44 }
0x104a   :  { %v3978_v32 = vadd.f32 %v3970_v36, %v3960_v18  ;;  %v3979_v40 = vadd.f32 %v3971_v57, %v3961_v52 }
0x104f   :  { %v3742_v25 = vpop.f32.mrf.mxu2  ;;  %v3841_v39 = vpop.f32.mrf.mxu3 }
0x1050   :  { %v3972_v16 = vmul.f32 %v3964_v26, %v3742_v25  ;;  %v3973_v0 = vmul.f32 %v3965_v56, %v3841_v39  ;;  %v4020_v25 = vperm.slane %v3359_v24, 1  ;;  %v5680_v24 = vld [vmem:[%s7606_s16 + $0x8] sm:$0xff] }
0x1052   :  { %v3980_v18 = vadd.f32 %v3972_v16, %v3962_v53  ;;  %v3981_v52 = vadd.f32 %v3973_v0, %v3963_v15  ;;  %v5686_v0 = vld [vmem:[%s7606_s16 + $0x38] sm:$0xff] }
0x1057   :  { %v3745_v60 = vpop.f32.mrf.mxu2  ;;  %v3844_v49 = vpop.f32.mrf.mxu3 }
0x1058   :  { %v3984_v13 = vmul.f32 %v3982_v61, %v3745_v60  ;;  %v3985_v22 = vmul.f32 %v3983_v17, %v3844_v49 }
0x105a   :  { %v3992_v55 = vadd.f32 %v3984_v13, %v3974_v28  ;;  %v7438_v13 = vld [vmem:[%s7591_s19] sm:$0x1]  ;;  %s5863_s19 = scalar_lea.hbm %s6182_s4, 2 }
0x105b   :  { %p5865_p7 = scmp.lt.s32.totalorder %s5863_s19, %s5861_s14 }
0x105d   :  { %p5866_p8 = por %p5865_p7, %p5864_p6 }
0x105f   :  { %v3747_v33 = vpop.f32.mrf.mxu2  ;;  %v3846_v19 = vpop.f32.mrf.mxu3  ;;  %p5867_p9 = pnand %p5866_p8, %p5862_p5 }
0x1060   :  { %v3986_v42 = vmul.f32 %v3982_v61, %v3747_v33  ;;  %v3987_v26 = vmul.f32 %v3983_v17, %v3846_v19  ;;  %v3993_v19 = vadd.f32 %v3985_v22, %v7392_v35 }
0x1062   :  { %v3994_v63 = vadd.f32 %v3986_v42, %v3976_v51  ;;  %v3995_v57 = vadd.f32 %v3987_v26, %v3977_v50  ;;  %v5685_v42 = vld [vmem:[%s7606_s16 + $0x30] sm:$0xff] }
0x1067   :  { %v3750_v38 = vpop.f32.mrf.mxu2  ;;  %v3849_v30 = vpop.f32.mrf.mxu3 }
0x1068   :  { %v3988_v2 = vmul.f32 %v3982_v61, %v3750_v38  ;;  %v3989_v31 = vmul.f32 %v3983_v17, %v3849_v30 }
0x106a   :  { %v3996_v45 = vadd.f32 %v3988_v2, %v3978_v32  ;;  %v3997_v44 = vadd.f32 %v3989_v31, %v3979_v40  ;;  %v5688_v31 = vld [vmem:[%s7606_s16 + $0x48] sm:$0xff] }
0x106f   :  { %v3752_v10 = vpop.f32.mrf.mxu2  ;;  %v3851_v9 = vpop.f32.mrf.mxu3 }
0x1070   :  { %v3990_v34 = vmul.f32 %v3982_v61, %v3752_v10  ;;  %v3991_v6 = vmul.f32 %v3983_v17, %v3851_v9 }
0x1072   :  { %v3998_v56 = vadd.f32 %v3990_v34, %v3980_v18  ;;  %v3999_v14 = vadd.f32 %v3991_v6, %v3981_v52  ;;  %v5683_v34 = vld [vmem:[%s7606_s16 + $0x20] sm:$0xff]  ;;  %v5681_v6 = vld [vmem:[%s7606_s16 + $0x10] sm:$0xff]  ;;  %v5690_v18 = vld [vmem:[%s7606_s16 + $0x58] sm:$0xff] }
0x1073   :  { %v5689_v52 = vld [vmem:[%s7606_s16 + $0x50] sm:$0xff] }
0x1077   :  { %v3755_v27 = vpop.f32.mrf.mxu2  ;;  %v3854_v21 = vpop.f32.mrf.mxu3 }
0x1078   :  { %v4002_v43 = vmul.f32 %v5792_v62, %v3755_v27  ;;  %v4003_v32 = vmul.f32 %v5793_v23, %v3854_v21 }
0x107a   :  { %v4010_v15 = vadd.f32 %v4002_v43, %v3992_v55  ;;  %v4011_v9 = vadd.f32 %v4003_v32, %v3993_v19  ;;  %v5691_v32 = vld [vmem:[%s7607_s18 + $0x4] sm:$0xf] }
0x107c   :  { %v7408_v40 = vadd.f32 %v4019_v20, %v4010_v15  ;;  %v7423_v61 = vadd.f32 %v4020_v25, %v4011_v9  ;;  %v5693_v15 = vld [vmem:[%s7607_s18 + $0x14] sm:$0xf]  ;;  %v5794_v9 = vld [vmem:[%s7608_s0] ss:$0 sm:$0xff] }
0x107e   :  { %v4032_v16 = vmax.f32 %v7423_v61, 0.0 }
0x107f   :  { %v3757_v59 = vpop.f32.mrf.mxu2  ;;  %v3856_v7 = vpop.f32.mrf.mxu3 }
0x1080   :  { %v4004_v58 = vmul.f32 %v5792_v62, %v3757_v59  ;;  %v4005_v53 = vmul.f32 %v5793_v23, %v3856_v7  ;;  %v4031_v7 = vmax.f32 %v7408_v40, 0.0 }
0x1082   :  { %v4012_v12 = vadd.f32 %v4004_v58, %v3994_v63  ;;  %v4013_v38 = vadd.f32 %v4005_v53, %v3995_v57  ;;  %v5679_v58 = vld [vmem:[%s7606_s16] sm:$0xff]  ;;  %v5439_v53 = vld [vmem:[%s7607_s18 + $0x28] sm:$0xf0] }
0x1084   :  { %v7401_v60 = vadd.f32 %v4019_v20, %v4012_v12  ;;  %v7419_v21 = vadd.f32 %v4020_v25, %v4013_v38 }
0x1086   :  { %v4033_v27 = vmax.f32 %v7401_v60, 0.0  ;;  %v4034_v2 = vmax.f32 %v7419_v21, 0.0  ;;  %v5710_v21 = vld [vmem:[%s7611_s9 + $0x8] sm:$0xff] }
0x1087   :  { %v3760_v29 = vpop.f32.mrf.mxu2  ;;  %v3859_v3 = vpop.f32.mrf.mxu3 }
0x1088   :  { %v4006_v47 = vmul.f32 %v5792_v62, %v3760_v29  ;;  %v4007_v41 = vmul.f32 %v5793_v23, %v3859_v3  ;;  %v4039_v3 = vpack.c.bf16 %v4033_v27, %v4031_v7  ;;  %v4040_v17 = vpack.c.bf16 %v4034_v2, %v4032_v16 }
0x108a   :  { %v4014_v8 = vadd.f32 %v4006_v47, %v3996_v45  ;;  %v4015_v39 = vadd.f32 %v4007_v41, %v3997_v44  ;;  %v5684_v47 = vld [vmem:[%s7606_s16 + $0x28] sm:$0xff]  ;;  %v5682_v45 = vld [vmem:[%s7606_s16 + $0x18] sm:$0xff]  ;;  %v5695_v44 = vld [vmem:[%s7607_s18 + $0x24] sm:$0xf] }
0x108b   :  { %v5696_v41 = vld [vmem:[%s7607_s18 + $0x24] sm:$0xf0] }
0x108c   :  { %v7399_v36 = vadd.f32 %v4019_v20, %v4014_v8  ;;  %v7412_v50 = vadd.f32 %v4020_v25, %v4015_v39 }
0x108e   :  { %v4035_v49 = vmax.f32 %v7399_v36, 0.0  ;;  %v4036_v29 = vmax.f32 %v7412_v50, 0.0 }
0x108f   :  { %v3762_v46 = vpop.f32.mrf.mxu2  ;;  %v3861_v37 = vpop.f32.mrf.mxu3 }
0x1090   :  { %v4008_v48 = vmul.f32 %v5792_v62, %v3762_v46  ;;  %v4009_v11 = vmul.f32 %v5793_v23, %v3861_v37  ;;  %v5687_v23 = vld [vmem:[%s7606_s16 + $0x40] sm:$0xff]  ;;  %v5429_v37 = vld [vmem:[%s7607_s18 + $0x10] sm:$0xf] }
0x1092   :  { %v4016_v28 = vadd.f32 %v4008_v48, %v3998_v56  ;;  %v4017_v51 = vadd.f32 %v4009_v11, %v3999_v14  ;;  %v5694_v14 = vld [vmem:[%s7607_s18 + $0x14] sm:$0xf0]  ;;  %v5421_v48 = vld [vmem:[%s7607_s18] sm:$0xf]  ;;  %v5692_v11 = vld [vmem:[%s7607_s18 + $0x4] sm:$0xf0] }
0x1093   :  { %v5430_v12 = vor.u32 %v5694_v14, %v5429_v37  ;;  %v5422_v22 = vor.u32 %v5692_v11, %v5421_v48 }
0x1094   :  { %v7403_v33 = vadd.f32 %v4019_v20, %v4016_v28  ;;  %v7406_v30 = vadd.f32 %v4020_v25, %v4017_v51  ;;  %v5437_v20 = vld [vmem:[%s7607_s18 + $0x20] sm:$0xf]  ;;  %v5442_v28 = vor.u32 %v5695_v44, %v5439_v53  ;;  %v5431_v51 = vld [vmem:[%s7607_s18 + $0x18] sm:$0xf0]  ;;  %v5423_v25 = vld [vmem:[%s7607_s18 + $0x8] sm:$0xf0] }
0x1095   :  { %v5438_v46 = vor.u32 %v5696_v41, %v5437_v20  ;;  %v5434_v57 = vor.u32 %v5693_v15, %v5431_v51  ;;  %v5426_v39 = vor.u32 %v5691_v32, %v5423_v25  ;;  %v5821_v51 = vld [vmem:[%s7596_s20] sm:$0xff] }
0x1096   :  { %v4037_v10 = vmax.f32 %v7403_v33, 0.0  ;;  %v4038_v59 = vmax.f32 %v7406_v30, 0.0 }
0x1098   :  { %v4041_v35 = vpack.c.bf16 %v4037_v10, %v4035_v49  ;;  %v4042_v62 = vpack.c.bf16 %v4038_v59, %v4036_v29 }
0x109a   :  { %4049 = vmatpush.bf16.msrb.mxu0 %v4041_v35 }
0x109e   :  { %4050 = vmatpush.bf16.msrb.mxu0 %v4039_v3 }
0x10a1   :  { %5368 = vmatmul.msk.bf16.vlgmr.msrb.gmra.mxu0 %vm2903_vm14, %v7438_v13 }
0x10a2   :  { %4062 = vmatpush.bf16.msra.mxu0 %v4042_v62 }
0x10a6   :  { %4063 = vmatpush.bf16.msra.mxu0 %v4040_v17 }
0x10aa   :  { %4150 = vmatpush.bf16.msrb.mxu0 %v5686_v0 }
0x10ae   :  { %4151 = vmatpush.bf16.msrb.mxu0 %v5685_v42 }
0x10b1   :  { %5369 = vmatmul.msk.bf16.vlgmr.msra.gmra.mxu0 %vm2903_vm14, %v7438_v13 }
0x10b2   :  { %4152 = vmatpush.bf16.msrb.mxu0 %v5684_v47  ;;  %v3391_v47 = vld [vmem:[%s7609_s22] sm:$0x3] }
0x10b6   :  { %4153 = vmatpush.bf16.msrb.mxu0 %v5683_v34  ;;  %v4179_v34 = vperm.slane %v3391_v47, 0 }
0x10ba   :  { %4154 = vmatpush.bf16.msrb.mxu0 %v5682_v45 }
0x10be   :  { %4155 = vmatpush.bf16.msrb.mxu0 %v5681_v6 }
0x10c2   :  { %4156 = vmatpush.bf16.msrb.mxu0 %v5680_v24 }
0x10c6   :  { %4157 = vmatpush.bf16.msrb.mxu0 %v5679_v58 }
0x10ca   :  { %4167 = vmatpush.bf16.msra.mxu0 %v5690_v18 }
0x10ce   :  { %4168 = vmatpush.bf16.msra.mxu0 %v5689_v52 }
0x10d2   :  { %4169 = vmatpush.bf16.msra.mxu0 %v5688_v31  ;;  %v4180_v31 = vperm.slane %v3391_v47, 1  ;;  %v5702_v47 = vld [vmem:[%s7610_s5 + $0x28] sm:$0xff] }
0x10d6   :  { %4170 = vmatpush.bf16.msra.mxu0 %v5687_v23 }
0x111e   :  { %v4052_v55 = vpop.f32.mrf.mxu0 }
0x111f   :  { %v4069_v63 = vpack.c.bf16 %v4052_v55, %v4052_v55 }
0x1121   :  { %4158 = vmatmul.bf16.vlgmr.msrb.gmra.mxu0 %v4069_v63 }
0x1122   :  { %4222 = vmatpush.bf16.msrb.mxu0 %v5438_v46 }
0x1126   :  { %v4054_v43 = vpop.f32.mrf.mxu0  ;;  %4223 = vmatpush.bf16.msrb.mxu0 %v5430_v12 }
0x112a   :  { %4224 = vmatpush.bf16.msrb.mxu0 %v5422_v22 }
0x112e   :  { %v4065_v8 = vpop.f32.mrf.mxu0 }
0x112f   :  { %v4070_v26 = vpack.c.bf16 %v4065_v8, %v4065_v8 }
0x1131   :  { %5418 = vmatmul.msk.bf16.vlgmr.msra.gmra.mxu0 %vm4146_vm3, %v4070_v26 }
0x1132   :  { %4235 = vmatpush.bf16.msra.mxu0 %v5442_v28 }
0x1136   :  { %v4067_v56 = vpop.f32.mrf.mxu0  ;;  %4236 = vmatpush.bf16.msra.mxu0 %v5434_v57 }
0x113a   :  { %4237 = vmatpush.bf16.msra.mxu0 %v5426_v39 }
0x119e   :  { %v4159_v19 = vpop.f32.mrf.mxu0 }
0x119f   :  { %v4160_v35 = vadd.f32 %v5794_v9, %v4159_v19 }
0x11a6   :  { %v4161_v38 = vpop.f32.mrf.mxu0 }
0x11ae   :  { %v4172_v3 = vpop.f32.mrf.mxu0 }
0x11af   :  { %v4173_v62 = vadd.f32 %v4172_v3, %v4160_v35 }
0x11b1   :  { %v4176_v0 = vmax.f32 %v4173_v62, 0.0 }
0x11b3   :  { %v4177_v17 = vpack.c.bf16 %v4176_v0, %v4176_v0  ;;  %v5822_v0 = vld [vmem:[%s7596_s20 + $0x8] sm:$0xff] }
0x11b5   :  { %5443 = vmatmul.msk.bf16.vlgmr.msrb.gmra.mxu0 %vm4213_vm9, %v4177_v17 }
0x11b6   :  { %v4174_v42 = vpop.f32.mrf.mxu0 }
0x11b7   :  { %v5703_v42 = vld [vmem:[%s7610_s5 + $0x30] sm:$0xff] }
0x11c5   :  { %5444 = vmatmul.msk.bf16.vlgmr.msra.gmra.mxu0 %vm4213_vm9, %v4177_v17  ;;  %v5704_v17 = vld [vmem:[%s7610_s5 + $0x38] sm:$0xff] }
0x1232   :  { %v4226_v45 = vpop.f32.mrf.mxu0 }
0x1233   :  { %v4227_v6 = vadd.f32 %v4226_v45, %v4179_v34  ;;  %v5701_v34 = vld [vmem:[%s7610_s5 + $0x20] sm:$0xff]  ;;  %v5700_v45 = vld [vmem:[%s7610_s5 + $0x18] sm:$0xff] }
0x1235   :  { %v5445_v24 = vmul.f32 -1.442695, %v4227_v6  ;;  %v5699_v6 = vld [vmem:[%s7610_s5 + $0x10] sm:$0xff] }
0x1237   :  { %5812 = vpow2.f32 %v5445_v24  ;;  %v5698_v24 = vld [vmem:[%s7610_s5 + $0x8] sm:$0xff] }
0x123a   :  { %v4228_v58 = vpop.f32.mrf.mxu0 }
0x123b   :  { %v5697_v58 = vld [vmem:[%s7610_s5] sm:$0xff] }
0x123d   :  { %v5813_v18 = vpop.eup %5812 }
0x123e   :  { %v4249_v52 = vadd.f32 1.0, %v5813_v18  ;;  %v5708_v18 = vld [vmem:[%s7610_s5 + $0x58] sm:$0xff] }
0x1240   :  { %5814 = vrcp.f32 %v4249_v52  ;;  %v4262_v20 = vand.u32 2147483648, %v4249_v52  ;;  %v4260_v46 = vand.u32 2147483647, %v4249_v52  ;;  %vm4256_vm13 = vweird.f32 %v4249_v52 }
0x1242   :  { %v4239_v23 = vpop.f32.mrf.mxu0  ;;  %v4263_v48 = vor.u32 1.1754944e-38, %v4262_v20  ;;  %vm4261_vm0 = vcmp.eq.f32.partialorder %v4260_v46, 8.507059e+37 }
0x1243   :  { %v4240_v55 = vadd.f32 %v4239_v23, %v4180_v31  ;;  %v5707_v31 = vld [vmem:[%s7610_s5 + $0x50] sm:$0xff]  ;;  %v5706_v23 = vld [vmem:[%s7610_s5 + $0x48] sm:$0xff] }
0x1245   :  { %v5446_v63 = vmul.f32 -1.442695, %v4240_v55 }
0x1246   :  { %v5815_v43 = vpop.eup %5814 }
0x1247   :  { %v4252_v8 = vmul.f32 %v5815_v43, %v4249_v52  ;;  %5816 = vpow2.f32 %v5446_v63  ;;  %vm4257_vm12 = vweird.f32 %v5815_v43 }
0x1248   :  { %vm4258_vm15 = vmor %vm4256_vm13, %vm4257_vm12 }
0x1249   :  { %v4253_v26 = vsub.f32 1.0, %v4252_v8  ;;  %v5705_v8 = vld [vmem:[%s7610_s5 + $0x40] sm:$0xff] }
0x124a   :  { %v4241_v56 = vpop.f32.mrf.mxu0 }
0x124b   :  { %v4254_v41 = vmul.f32 %v5815_v43, %v4253_v26 }
0x124d   :  { %v5817_v37 = vpop.eup %5816  ;;  %v4255_v14 = vadd.f32 %v5815_v43, %v4254_v41 }
0x124e   :  { %v4250_v12 = vadd.f32 1.0, %v5817_v37 }
0x124f   :  { %v4259_v11 = vsel %vm4258_vm15, %v5815_v43, %v4255_v14 }
0x1250   :  { %5818 = vrcp.f32 %v4250_v12  ;;  %v4264_v22 = vsel %vm4261_vm0, %v4263_v48, %v4259_v11  ;;  %v4277_v32 = vand.u32 2147483648, %v4250_v12  ;;  %v4275_v39 = vand.u32 2147483647, %v4250_v12 }
0x1251   :  { %v4281_v44 = vpack.c.bf16 %v4264_v22, %v4264_v22  ;;  %vm4271_vm2 = vweird.f32 %v4250_v12 }
0x1252   :  { %v4278_v38 = vor.u32 1.1754944e-38, %v4277_v32  ;;  %vm4276_vm5 = vcmp.eq.f32.partialorder %v4275_v39, 8.507059e+37 }
0x1253   :  { %v4284_v53 = vsel %vm1858_vm10, %v4281_v44, 0 }
0x1254   :  { %4296 = vmatpush.bf16.msrb.mxu0 %v4284_v53  ;;  %v5795_v53 = vld [vmem:[%s7612_s13] ss:$0 sm:$0xff] }
0x1256   :  { %v5819_v15 = vpop.eup %5818 }
0x1257   :  { %v4267_v28 = vmul.f32 %v5819_v15, %v4250_v12  ;;  %5447 = vmatmul.msk.bf16.vlgmr.msrb.gmra.mxu0 %vm1833_vm11, %v5821_v51  ;;  %vm4272_vm1 = vweird.f32 %v5819_v15 }
0x1258   :  { %vm4273_vm4 = vmor %vm4271_vm2, %vm4272_vm1 }
0x1259   :  { %v4268_v57 = vsub.f32 1.0, %v4267_v28 }
0x125b   :  { %v4269_v25 = vmul.f32 %v5819_v15, %v4268_v57 }
0x125d   :  { %v4270_v19 = vadd.f32 %v5819_v15, %v4269_v25 }
0x125f   :  { %v4274_v9 = vsel %vm4273_vm4, %v5819_v15, %v4270_v19 }
0x1260   :  { %v4279_v35 = vsel %vm4276_vm5, %v4278_v38, %v4274_v9 }
0x1261   :  { %v4282_v3 = vpack.c.bf16 %v4279_v35, %v4279_v35 }
0x1263   :  { %v4287_v62 = vsel %vm1858_vm10, %v4282_v3, 0  ;;  %vm4604_vm10 = vcmask 74752  }
0x1264   :  { %4315 = vmatpush.bf16.msra.mxu0 %v4287_v62 }
0x1267   :  { %5448 = vmatmul.msk.bf16.gmra.mxu0 %vm1833_vm11, %v5822_v0 }
0x1268   :  { %4417 = vmatpush.bf16.msrb.mxu0 %v5704_v17 }
0x126c   :  { %4418 = vmatpush.bf16.msrb.mxu0 %v5703_v42 }
0x1270   :  { %4419 = vmatpush.bf16.msrb.mxu0 %v5702_v47  ;;  %v5714_v47 = vld [vmem:[%s6172_s17 + $0x18] sm:$0xff] }
0x1271   :  { %4595 = vmatpush.bf16.msrb.mxu3 %v5714_v47 }
0x1274   :  { %4420 = vmatpush.bf16.msrb.mxu0 %v5701_v34  ;;  %v5713_v34 = vld [vmem:[%s6172_s17 + $0x10] sm:$0xff] }
0x1275   :  { %4596 = vmatpush.bf16.msrb.mxu3 %v5713_v34 }
0x1277   :  { %5449 = vmatmul.msk.bf16.vlgmr.msra.gmra.mxu0 %vm1833_vm11, %v5821_v51 }
0x1278   :  { %4421 = vmatpush.bf16.msrb.mxu0 %v5700_v45 }
0x127c   :  { %4422 = vmatpush.bf16.msrb.mxu0 %v5699_v6  ;;  %v5712_v6 = vld [vmem:[%s6172_s17 + $0x8] sm:$0xff] }
0x127d   :  { %4597 = vmatpush.bf16.msrb.mxu3 %v5712_v6 }
0x1280   :  { %4423 = vmatpush.bf16.msrb.mxu0 %v5698_v24  ;;  %v5711_v24 = vld [vmem:[%s6172_s17] sm:$0xff]  ;;  %s5928_s17 = smov [#allocation5]  }
0x1281   :  { %4598 = vmatpush.bf16.msrb.mxu3 %v5711_v24 }
0x1284   :  { %4424 = vmatpush.bf16.msrb.mxu0 %v5697_v58 }
0x1287   :  { %5450 = vmatmul.msk.bf16.gmra.mxu0 %vm1833_vm11, %v5822_v0 }
0x1288   :  { %4440 = vmatpush.bf16.msra.mxu0 %v5708_v18  ;;  %v5797_v18 = vld [vmem:[%s7614_s29] ss:$0 sm:$0xff] }
0x128c   :  { %4441 = vmatpush.bf16.msra.mxu0 %v5707_v31 }
0x1290   :  { %4442 = vmatpush.bf16.msra.mxu0 %v5706_v23 }
0x1294   :  { %4443 = vmatpush.bf16.msra.mxu0 %v5705_v8 }
0x12d4   :  { %v4298_v52 = vpop.f32.mrf.mxu0 }
0x12d5   :  { %v4327_v63 = vmul.f32 %v4298_v52, %v4031_v7 }
0x12dc   :  { %v4300_v55 = vpop.f32.mrf.mxu0 }
0x12dd   :  { %v4329_v43 = vmul.f32 %v4300_v55, %v4033_v27 }
0x12df   :  { %v4335_v26 = vpack.c.bf16 %v4329_v43, %v4327_v63 }
0x12e1   :  { %4425 = vmatmul.bf16.vlgmr.msrb.gmra.mxu0 %v4335_v26 }
0x12e2   :  { %4514 = vmatpush.bf16.msrb.mxu0 %v5710_v21 }
0x12e4   :  { %v4303_v56 = vpop.f32.mrf.mxu0 }
0x12e5   :  { %v4331_v41 = vmul.f32 %v4303_v56, %v4035_v49 }
0x12ec   :  { %v4305_v20 = vpop.f32.mrf.mxu0 }
0x12ed   :  { %v4333_v46 = vmul.f32 %v4305_v20, %v4037_v10 }
0x12ef   :  { %v4337_v37 = vpack.c.bf16 %v4333_v46, %v4331_v41 }
0x12f1   :  { %4430 = vmatmul.bf16.gmra.mxu0 %v4337_v37 }
0x12f4   :  { %v4317_v40 = vpop.f32.mrf.mxu0 }
0x12f5   :  { %v4328_v60 = vmul.f32 %v4317_v40, %v4032_v16 }
0x12fc   :  { %v4319_v7 = vpop.f32.mrf.mxu0 }
0x12fd   :  { %v4330_v27 = vmul.f32 %v4319_v7, %v4034_v2  ;;  %v5709_v2 = vld [vmem:[%s7611_s9] sm:$0xff] }
0x12fe   :  { %4515 = vmatpush.bf16.msrb.mxu0 %v5709_v2 }
0x12ff   :  { %v4336_v14 = vpack.c.bf16 %v4330_v27, %v4328_v60 }
0x1301   :  { %5499 = vmatmul.msk.bf16.vlgmr.msra.gmra.mxu0 %vm4146_vm3, %v4336_v14  ;;  %v5799_v14 = vld [vmem:[%s6177_s27] ss:$0 sm:$0xff] }
0x1304   :  { %v4322_v36 = vpop.f32.mrf.mxu0 }
0x1305   :  { %v4332_v33 = vmul.f32 %v4322_v36, %v4036_v29  ;;  %v5796_v29 = vld [vmem:[%s7613_s25] ss:$0 sm:$0xff] }
0x130c   :  { %v4324_v49 = vpop.f32.mrf.mxu0 }
0x130d   :  { %v4334_v10 = vmul.f32 %v4324_v49, %v4038_v59 }
0x130f   :  { %v4338_v12 = vpack.c.bf16 %v4334_v10, %v4332_v33 }
0x1311   :  { %5500 = vmatmul.msk.bf16.gmra.mxu0 %vm4146_vm3, %v4338_v12 }
0x135e   :  { %v4426_v61 = vpop.f32.mrf.mxu0 }
0x1366   :  { %v4428_v16 = vpop.f32.mrf.mxu0 }
0x136e   :  { %v4431_v48 = vpop.f32.mrf.mxu0 }
0x1376   :  { %v4433_v11 = vpop.f32.mrf.mxu0 }
0x137e   :  { %v4445_v22 = vpop.f32.mrf.mxu0 }
0x137f   :  { %v4446_v44 = vadd.f32 %v4445_v22, %v4426_v61 }
0x1381   :  { %v4458_v50 = vmul.f32 %v5795_v53, %v4446_v44 }
0x1383   :  { %v4465_v28 = vadd.f32 %v5796_v29, %v4458_v50 }
0x1385   :  { %v4469_v57 = vadd.f32 %v4465_v28, %v7300_v1 }
0x1386   :  { %v4447_v15 = vpop.f32.mrf.mxu0 }
0x1387   :  { %v4448_v30 = vadd.f32 %v4447_v15, %v4428_v16 }
0x1389   :  { %v4459_v59 = vmul.f32 %v5795_v53, %v4448_v30 }
0x138b   :  { %v4466_v51 = vadd.f32 %v5796_v29, %v4459_v59 }
0x138d   :  { %v4470_v32 = vadd.f32 %v4466_v51, %v7302_v5 }
0x138e   :  { %v4450_v25 = vpop.f32.mrf.mxu0 }
0x138f   :  { %v4488_v39 = vpack.c.bf16 %v4470_v32, %v4469_v57  ;;  %v4451_v19 = vadd.f32 %v4450_v25, %v4431_v48 }
0x1391   :  { %5509 = vmatmul.msk.bf16.vlgmr.msrb.gmra.mxu0 %vm2903_vm14, %v4488_v39  ;;  %v4460_v38 = vmul.f32 %v5795_v53, %v4451_v19 }
0x1393   :  { %v4467_v3 = vadd.f32 %v5796_v29, %v4460_v38 }
0x1395   :  { %v4471_v1 = vadd.f32 %v4467_v3, %v7308_v54  ;;  %v5798_v54 = vld [vmem:[%s6167_s21] ss:$0 sm:$0xff]  ;;  %s4611_s21 = sshll.u32 %s5928_s17, 4  ;;  %s4612_s21 = int_to_ptr.vmem [resolvable:$true] %s4611_s21 }
0x1396   :  { %v4452_v9 = vpop.f32.mrf.mxu0 }
0x1397   :  { %v4453_v35 = vadd.f32 %v4452_v9, %v4433_v11 }
0x1399   :  { %v4461_v62 = vmul.f32 %v5795_v53, %v4453_v35 }
0x139b   :  { %v4468_v0 = vadd.f32 %v5796_v29, %v4461_v62 }
0x139d   :  { %v4472_v5 = vadd.f32 %v4468_v0, %v7310_v4 }
0x139f   :  { %v4489_v17 = vpack.c.bf16 %v4472_v5, %v4471_v1 }
0x13a1   :  { %5510 = vmatmul.msk.bf16.gmra.mxu0 %vm2903_vm14, %v4489_v17 }
0x140e   :  { %v4517_v42 = vpop.f32.mrf.mxu0 }
0x140f   :  { %v4530_v23 = vmul.f32 %v5797_v18, %v4517_v42 }
0x1411   :  { %v4537_v26 = vadd.f32 %v5798_v54, %v4530_v23 }
0x1413   :  { %v4541_v37 = vmax.f32 %v4537_v26, 0.0 }
0x1416   :  { %v4519_v45 = vpop.f32.mrf.mxu0 }
0x1417   :  { %v4531_v31 = vmul.f32 %v5797_v18, %v4519_v45 }
0x1419   :  { %v4538_v43 = vadd.f32 %v5798_v54, %v4531_v31 }
0x141b   :  { %v4542_v41 = vmax.f32 %v4538_v43, 0.0 }
0x141d   :  { %v4545_v40 = vpack.c.bf16 %v4542_v41, %v4541_v37 }
0x141e   :  { %v4522_v58 = vpop.f32.mrf.mxu0 }
0x141f   :  { %v4532_v52 = vmul.f32 %v5797_v18, %v4522_v58 }
0x1421   :  { %v4539_v55 = vadd.f32 %v5798_v54, %v4532_v52 }
0x1423   :  { %v4543_v56 = vmax.f32 %v4539_v55, 0.0 }
0x1426   :  { %v4524_v4 = vpop.f32.mrf.mxu0 }
0x1427   :  { %v4533_v63 = vmul.f32 %v5797_v18, %v4524_v4 }
0x1429   :  { %v4540_v8 = vadd.f32 %v5798_v54, %v4533_v63 }
0x142b   :  { %v4544_v20 = vmax.f32 %v4540_v8, 0.0 }
0x142d   :  { %v4546_v46 = vpack.c.bf16 %v4544_v20, %v4543_v56 }
0x142f   :  { %4553 = vmatpush.bf16.msra.mxu2 %v4546_v46 }
0x1433   :  { %4554 = vmatpush.bf16.msra.mxu2 %v4545_v40 }
0x1436   :  { %5511 = vmatmul.msk.bf16.vlgmr.msra.gmra.mxu2 %vm2903_vm14, %v7438_v13 }
0x14b9   :  { %v4556_v7 = vpop.f32.mrf.mxu2 }
0x14ba   :  { %v4560_v60 = vpack.c.bf16 %v4556_v7, %v4556_v7 }
0x14bc   :  { %5528 = vmatmul.msk.bf16.vlgmr.msrb.gmra.mxu3 %vm4146_vm3, %v4560_v60 }
0x14c1   :  { %v4558_v27 = vpop.f32.mrf.mxu2 }
0x153f   :  { %v4600_v36 = vpop.f32.mrf.mxu3 }
0x1540   :  { %v4601_v49 = vadd.f32 %v5799_v14, %v4600_v36 }
0x1542   :  { %4605 = vst.msk [vmem:[#allocation5] sm:$0x3] %vm4604_vm10, %v4601_v49 }
0x1543   :  { %5870 = shalt.err (!%p5867_p9)
}
0x1544   :  { %4616 = dma.vmem_to_hbm [thread:$0]  %s4612_s21, 32, %s4614_s3, [#allocation4]  }
0x1547   :  { %v4602_v13 = vpop.f32.mrf.mxu3 }
0x1548   :  { %5873 = dma.done.wait [#allocation4], 32  }
0x1549   :  { %5874 = vsyncadd [#allocation4], 4294967264 }
0x154a   :  { %4621 = vsyncpa [#allocation3], 1 }
0x154b   :  { %4622 = vsyncpa [#allocation4], 1 }

</bundles_post_ra>
